<compile_context>
chip_gen: v7x
topology: tpu7x:2x2x1
jax: 0.10.0
libtpu: 0.0.40
codegen_flags: <defaults>
</compile_context>

<pallas_src>
import jax
import jax.numpy as jnp
from jax import lax
from jax.experimental import pallas as pl
from jax.experimental.pallas import tpu as pltpu


def _round_up(x, m):
    return (x + m - 1) // m * m


def _pick_row_tile(rows, cap=256):
    """Largest multiple-of-8 divisor of `rows` that is <= cap (rows % 8 == 0)."""
    tm = min(rows, cap)
    tm -= tm % 8
    tm = max(tm, 8)
    while rows % tm:
        tm -= 8
    return tm


def _num_parallel_cores():
    """2 on chips where a 'parallel' grid axis shards across TensorCores
    (v7x: 2 TCs/chip; v4/v5p megacore); 1 on single-TC chips (v5e/v6e)."""
    try:
        kind = jax.devices()[0].device_kind.lower()
    except Exception:
        return 1
    if "v7" in kind or "v5p" in kind or "v4" in kind:
        return 2
    return 1


def _vmem_limit(bytes_needed):
    """2x working set + margin, clamped to [8 MiB, 48 MiB] (v7x headroom)."""
    return int(min(max(2 * bytes_needed + (2 << 20), 8 << 20), 48 << 20))


# ---------------------------------------------------------------------------
# Kernel 1: serial recurrence (attention + GRU) over the caption length.
# ---------------------------------------------------------------------------
def bahdanau_recurrent_kernel(
    emb_ref,      # (L1, Bb, E)   embedded teacher-forcing inputs
    enc_ref,      # (Bb, T, H)    encoder outputs
    encproj_ref,  # (Bb, T, H)    enc @ Wa_enc^T + b_attn  (precomputed in XLA)
    h0_ref,       # (Bb, H)       initial GRU hidden state (from self.i)
    wa_h_ref,     # (H, H)        attn Linear weight, hidden half (transposed)
    v_ref,        # (1, H)        attention score vector
    wih_e_ref,    # (E, 3H)       GRU W_ih, embedding half (transposed)
    wih_c_ref,    # (H, 3H)       GRU W_ih, context half (transposed)
    whh_ref,      # (H, 3H)       GRU W_hh (transposed)
    b_gru_ref,    # (2, 3H)       [b_ih; b_hh]
    hall_ref,     # out (L1, Bb, H)  per-step hidden states
    attw_ref,     # out (L1, Bb, T)  attention weights
    gie_ref,      # scratch (L1*Bb, 3H)  precomputed emb-side GRU gates
):
    L1, Bb, E = emb_ref.shape
    _, T, H = enc_ref.shape

    # Only the small loop-invariant weight tiles are hoisted (vreg pressure).
    wa_h = wa_h_ref[...]                     # (H, H)
    v = v_ref[...]                           # (1, H)
    wih_c = wih_c_ref[...]                   # (H, 3H)
    whh = whh_ref[...]                       # (H, 3H)
    b_ih = b_gru_ref[0:1, :]                 # (1, 3H)
    b_hh = b_gru_ref[1:2, :]                 # (1, 3H)

    # Hoist the embedding-side GRU input matmul off the serial path:
    # one (L1*Bb, E) @ (E, 3H) MXU call, result parked in VMEM scratch.
    gie_ref[...] = (
        jnp.dot(emb_ref[...].reshape(L1 * Bb, E), wih_e_ref[...],
                preferred_element_type=jnp.float32) + b_ih)

    def step(t, h):                          # h: (Bb, H) carried in registers
        # ---- Bahdanau attention: v . tanh(W_h h + [W_e enc + b]), softmax(T)
        # enc/enc_proj are re-read from VMEM each step (cheap vld) rather than
        # kept live as SSA values across the whole (unrolled) loop.
        hid_proj = jnp.dot(h, wa_h, preferred_element_type=jnp.float32)      # (Bb,H)
        energy = jnp.tanh(encproj_ref[...] + hid_proj[:, None, :])           # (Bb,T,H)
        e = jnp.sum(energy * v, axis=-1)                                     # (Bb,T)
        e_max = jnp.max(e, axis=-1, keepdims=True)
        p = jnp.exp(e - e_max)
        attw = p * pl.reciprocal(jnp.sum(p, axis=-1, keepdims=True), approx=True)

        # ---- context = attn_weights @ encoder_outputs (T small -> reduce)
        context = jnp.sum(attw[:, :, None] * enc_ref[...], axis=1)           # (Bb,H)

        # ---- GRU cell (gate order r, z, n); emb-side gates precomputed above.
        row0 = pl.multiple_of(t * Bb, 8)
        gi = (gie_ref[pl.ds(row0, Bb), :]
              + jnp.dot(context, wih_c, preferred_element_type=jnp.float32)) # (Bb,3H)
        gh = jnp.dot(h, whh, preferred_element_type=jnp.float32) + b_hh      # (Bb,3H)
        r = jax.nn.sigmoid(gi[:, 0 * H:1 * H] + gh[:, 0 * H:1 * H])
        z = jax.nn.sigmoid(gi[:, 1 * H:2 * H] + gh[:, 1 * H:2 * H])
        n = jnp.tanh(gi[:, 2 * H:3 * H] + r * gh[:, 2 * H:3 * H])
        h_new = (1.0 - z) * n + z * h

        attw_ref[t] = attw
        hall_ref[t] = h_new
        return h_new

    # Bounded unroll: full unroll only for short captions (avoids instruction
    # bloat / long live ranges for long L1 while keeping scheduler visibility).
    unroll = L1 if L1 <= 8 else 4
    lax.fori_loop(0, L1, step, h0_ref[...], unroll=unroll)


# ---------------------------------------------------------------------------
# Kernel 2: batched output projection + log_softmax, tiled over rows.
# ---------------------------------------------------------------------------
def output_logsoftmax_kernel(h_ref, wout_ref, bout_ref, logp_ref):
    # h_ref: (tm, H); wout_ref: (H, Vp); bout_ref: (1, Vp); logp_ref: (tm, Vp)
    # Padded vocab columns carry bias = -1e30 -> exp underflows to 0, so the
    # log_softmax over the real vocabulary is exact.
    logits = (jnp.dot(h_ref[...], wout_ref[...], preferred_element_type=jnp.float32)
              + bout_ref[...])
    lmax = jnp.max(logits, axis=-1, keepdims=True)
    lse = jnp.log(jnp.sum(jnp.exp(logits - lmax), axis=-1, keepdims=True)) + lmax
    logp_ref[...] = logits - lse


def bahdanau_decoder_forward(params, encoder_outputs, captions):
    """encoder_outputs: (T, B, H) f32; captions: (B, L) int32.
    Returns (log-probs (B*(L-1), V), attentions (L-1, B, 1, T))."""
    T, B, H = encoder_outputs.shape
    L = captions.shape[1]
    L1 = L - 1
    E = params["embedding"].shape[1]
    V = params["out_w"].shape[0]

    # Batch split across TensorCores only where it helps (2-TC chips, B > 8).
    nb = _num_parallel_cores()
    if nb > 1 and B > 8:
        Bp = _round_up(B, 8 * nb)
    else:
        nb = 1
        Bp = _round_up(B, 8)                 # sublane-dense batch
    Bb = Bp // nb

    # glue: embedding lookup (teacher forcing uses captions[:, :L-1])
    emb = params["embedding"][captions[:, :L1]]          # (B, L1, E)
    emb = jnp.transpose(emb, (1, 0, 2))                  # (L1, B, E)

    enc_bth = jnp.transpose(encoder_outputs, (1, 0, 2))  # (B, T, H)

    wa = params["attn_w"]                                # (H, 2H), cat=[hidden, enc]
    wa_h = wa[:, :H].T                                   # (H, H)
    wa_e = wa[:, H:].T                                   # (H, H)
    # time-invariant encoder-side attention projection (+ bias), precomputed in XLA
    enc_proj = jnp.einsum("bth,hk->btk", enc_bth, wa_e) + params["attn_b"]  # (B,T,H)

    if Bp != B:
        emb = jnp.pad(emb, [(0, 0), (0, Bp - B), (0, 0)])
        enc_bth = jnp.pad(enc_bth, [(0, Bp - B), (0, 0), (0, 0)])
        enc_proj = jnp.pad(enc_proj, [(0, Bp - B), (0, 0), (0, 0)])

    h0 = jnp.broadcast_to(params["i"][0], (Bp, H))       # self.i.repeat(1,B,1)[-1]
    v = params["v"].reshape(1, H)
    wih = params["gru_w_ih"]                             # (3H, E+H), input=[emb,ctx]
    wih_e = wih[:, :E].T                                 # (E, 3H)
    wih_c = wih[:, E:].T                                 # (H, 3H)
    whh = params["gru_w_hh"].T                           # (H, 3H)
    b_gru = jnp.stack([params["gru_b_ih"], params["gru_b_hh"]], axis=0)  # (2, 3H)

    fsz = 4  # f32 bytes
    k1_need = fsz * (
        L1 * Bb * (E + H + T + 3 * H)        # emb, hall, attw, gie scratch
        + 2 * Bb * T * H + Bb * H            # enc, enc_proj, h0
        + H * H + H                          # wa_h, v
        + (E + 2 * H) * 3 * H + 2 * 3 * H)   # wih_e, wih_c, whh, b_gru

    hall, attw = pl.pallas_call(
        bahdanau_recurrent_kernel,
        out_shape=(
            jax.ShapeDtypeStruct((L1, Bp, H), jnp.float32),
            jax.ShapeDtypeStruct((L1, Bp, T), jnp.float32),
        ),
        grid=(nb,),
        in_specs=[
            pl.BlockSpec((L1, Bb, E), lambda c: (0, c, 0)),   # emb
            pl.BlockSpec((Bb, T, H), lambda c: (c, 0, 0)),    # enc
            pl.BlockSpec((Bb, T, H), lambda c: (c, 0, 0)),    # enc_proj
            pl.BlockSpec((Bb, H), lambda c: (c, 0)),          # h0
            pl.BlockSpec((H, H), lambda c: (0, 0)),           # wa_h
            pl.BlockSpec((1, H), lambda c: (0, 0)),           # v
            pl.BlockSpec((E, 3 * H), lambda c: (0, 0)),       # wih_e
            pl.BlockSpec((H, 3 * H), lambda c: (0, 0)),       # wih_c
            pl.BlockSpec((H, 3 * H), lambda c: (0, 0)),       # whh
            pl.BlockSpec((2, 3 * H), lambda c: (0, 0)),       # b_gru
        ],
        out_specs=(
            pl.BlockSpec((L1, Bb, H), lambda c: (0, c, 0)),
            pl.BlockSpec((L1, Bb, T), lambda c: (0, c, 0)),
        ),
        scratch_shapes=[pltpu.VMEM((L1 * Bb, 3 * H), jnp.float32)],
        compiler_params=pltpu.CompilerParams(
            dimension_semantics=("parallel",),
            vmem_limit_bytes=_vmem_limit(k1_need)),
    )(emb, enc_bth, enc_proj, h0, wa_h, v, wih_e, wih_c, whh, b_gru)

    # ---- second call: row-tiled vocab projection + log_softmax --------------
    rows = L1 * Bp
    Vp = _round_up(V, 128)                               # lane-dense logp stores
    tm = _pick_row_tile(rows)
    hall2d = hall.reshape(rows, H)                       # row = t*Bp + b (free reshape)
    wout_p = jnp.pad(params["out_w"].T, [(0, 0), (0, Vp - V)])          # (H, Vp)
    b_out_p = jnp.concatenate(
        [params["out_b"].astype(jnp.float32),
         jnp.full((Vp - V,), -1e30, jnp.float32)]).reshape(1, Vp)

    k2_need = fsz * 2 * (tm * H + H * Vp + Vp + tm * Vp)  # ~double-buffered blocks

    logp = pl.pallas_call(
        output_logsoftmax_kernel,
        out_shape=jax.ShapeDtypeStruct((rows, Vp), jnp.float32),
        grid=(rows // tm,),
        in_specs=[
            pl.BlockSpec((tm, H), lambda i: (i, 0)),          # hidden-state rows
            pl.BlockSpec((H, Vp), lambda i: (0, 0)),          # wout (fetched once)
            pl.BlockSpec((1, Vp), lambda i: (0, 0)),          # bias
        ],
        out_specs=pl.BlockSpec((tm, Vp), lambda i: (i, 0)),
        compiler_params=pltpu.CompilerParams(
            dimension_semantics=("parallel",),
            vmem_limit_bytes=_vmem_limit(k2_need)),
    )(hall2d, wout_p, b_out_p)

    # strip padding; torch.cat(outputs, dim=1).view(-1, V) == b-major, t-minor
    logp = logp.reshape(L1, Bp, Vp)[:, :B, :V]           # (L1, B, V)
    attw = attw[:, :B]                                   # (L1, B, T)
    outputs = jnp.transpose(logp, (1, 0, 2)).reshape(B * L1, V)
    attentions = attw[:, :, None, :]                     # each step: (B, 1, T)
    return outputs, attentions


def reference_forward(params, encoder_outputs, captions):
    """Pure-JAX reference mirroring the PyTorch forward (teacher forcing, eval mode)."""
    T, B, H = encoder_outputs.shape
    L = captions.shape[1]
    V = params["out_w"].shape[0]
    enc_bt = jnp.transpose(encoder_outputs, (1, 0, 2))
    h = jnp.broadcast_to(params["i"][0], (B, H))
    outs, atts = [], []
    for t in range(L - 1):
        x = params["embedding"][captions[:, t]]
        cat = jnp.concatenate(
            [jnp.broadcast_to(h[:, None, :], (B, T, H)), enc_bt], axis=-1)
        energy = jnp.tanh(cat @ params["attn_w"].T + params["attn_b"])
        e = energy @ params["v"]
        attw = jax.nn.softmax(e, axis=-1)
        ctx = jnp.einsum("bt,bth->bh", attw, enc_bt)
        gi = jnp.concatenate([x, ctx], axis=-1) @ params["gru_w_ih"].T + params["gru_b_ih"]
        gh = h @ params["gru_w_hh"].T + params["gru_b_hh"]
        r = jax.nn.sigmoid(gi[:, :H] + gh[:, :H])
        z = jax.nn.sigmoid(gi[:, H:2 * H] + gh[:, H:2 * H])
        n = jnp.tanh(gi[:, 2 * H:] + r * gh[:, 2 * H:])
        h = (1 - z) * n + z * h
        logits = h @ params["out_w"].T + params["out_b"]
        outs.append(jax.nn.log_softmax(logits, axis=-1))
        atts.append(attw)
    outputs = jnp.stack(outs, axis=1).reshape(-1, V)
    return outputs, jnp.stack(atts, axis=0)


if __name__ == "__main__":
    H, E, V = 32, 32, 16          # hidden_size, embed_size, output_size (vocab)
    B, T, L = 2, 8, 6             # batch, encoder length, caption length

    key = jax.random.PRNGKey(0)
    keys = jax.random.split(key, 12)
    s = 0.1
    params = {
        "i":         s * jax.random.normal(keys[0], (1, 1, H), jnp.float32),
        "embedding": s * jax.random.normal(keys[1], (V, E), jnp.float32),
        "attn_w":    s * jax.random.normal(keys[2], (H, 2 * H), jnp.float32),
        "attn_b":    s * jax.random.normal(keys[3], (H,), jnp.float32),
        "v":         s * jax.random.normal(keys[4], (H,), jnp.float32),
        "gru_w_ih":  s * jax.random.normal(keys[5], (3 * H, E + H), jnp.float32),
        "gru_w_hh":  s * jax.random.normal(keys[6], (3 * H, H), jnp.float32),
        "gru_b_ih":  s * jax.random.normal(keys[7], (3 * H,), jnp.float32),
        "gru_b_hh":  s * jax.random.normal(keys[8], (3 * H,), jnp.float32),
        "out_w":     s * jax.random.normal(keys[9], (V, H), jnp.float32),
        "out_b":     s * jax.random.normal(keys[10], (V,), jnp.float32),
    }
    encoder_outputs = jax.random.normal(keys[11], (T, B, H), jnp.float32)
    captions = jax.random.randint(jax.random.PRNGKey(1), (B, L), 0, V, dtype=jnp.int32)

    outputs, attentions = jax.block_until_ready(
        bahdanau_decoder_forward(params, encoder_outputs, captions))

    ref_out, ref_att = reference_forward(params, encoder_outputs, captions)
    assert outputs.shape == (B * (L - 1), V)
    assert attentions.shape == (L - 1, B, 1, T)
    assert bool(jnp.all(jnp.isfinite(outputs)))
    assert jnp.allclose(outputs, ref_out, atol=5e-3, rtol=5e-3)
    assert jnp.allclose(attentions[:, :, 0, :], ref_att, atol=5e-3, rtol=5e-3)
    print("KERNEL_OK")
</pallas_src>

<mosaic_0001>
module attributes {stable_mosaic.version = 11 : i64} {
  func.func @bahdanau_recurrent_kernel(%arg0: i32, %arg1: memref<5x8x32xf32, #tpu.memory_space<vmem>>, %arg2: memref<8x8x32xf32, #tpu.memory_space<vmem>>, %arg3: memref<8x8x32xf32, #tpu.memory_space<vmem>>, %arg4: memref<8x32xf32, #tpu.memory_space<vmem>>, %arg5: memref<32x32xf32, #tpu.memory_space<vmem>>, %arg6: memref<1x32xf32, #tpu.memory_space<vmem>>, %arg7: memref<32x96xf32, #tpu.memory_space<vmem>>, %arg8: memref<32x96xf32, #tpu.memory_space<vmem>>, %arg9: memref<32x96xf32, #tpu.memory_space<vmem>>, %arg10: memref<2x96xf32, #tpu.memory_space<vmem>>, %arg11: memref<5x8x32xf32, #tpu.memory_space<vmem>>, %arg12: memref<5x8x8xf32, #tpu.memory_space<vmem>>, %arg13: memref<40x96xf32, #tpu.memory_space<vmem>>) attributes {dimension_semantics = [#tpu.dimension_semantics<parallel>], iteration_bounds = array<i64: 1>, scalar_prefetch = 0 : i64, scratch_operands = 1 : i64, tpu.core_type = #tpu.core_type<tc>, window_params = [{transform_indices = @transform_0, window_bounds = array<i64: 5, 8, 32>}, {transform_indices = @transform_1, window_bounds = array<i64: 8, 8, 32>}, {transform_indices = @transform_2, window_bounds = array<i64: 8, 8, 32>}, {transform_indices = @transform_3, window_bounds = array<i64: 8, 32>}, {pipeline_mode = #tpu.pipeline_mode<synchronous>, transform_indices = @transform_4, window_bounds = array<i64: 32, 32>}, {pipeline_mode = #tpu.pipeline_mode<synchronous>, transform_indices = @transform_5, window_bounds = array<i64: 1, 32>}, {pipeline_mode = #tpu.pipeline_mode<synchronous>, transform_indices = @transform_6, window_bounds = array<i64: 32, 96>}, {pipeline_mode = #tpu.pipeline_mode<synchronous>, transform_indices = @transform_7, window_bounds = array<i64: 32, 96>}, {pipeline_mode = #tpu.pipeline_mode<synchronous>, transform_indices = @transform_8, window_bounds = array<i64: 32, 96>}, {pipeline_mode = #tpu.pipeline_mode<synchronous>, transform_indices = @transform_9, window_bounds = array<i64: 2, 96>}, {transform_indices = @transform_10, window_bounds = array<i64: 5, 8, 32>}, {transform_indices = @transform_11, window_bounds = array<i64: 5, 8, 8>}]} {
    %c0 = arith.constant 0 : index
    %c0_0 = arith.constant 0 : index
    %0 = vector.load %arg5[%c0, %c0_0] : memref<32x32xf32, #tpu.memory_space<vmem>>, vector<32x32xf32>
    %c0_1 = arith.constant 0 : index
    %c0_2 = arith.constant 0 : index
    %1 = vector.load %arg6[%c0_1, %c0_2] : memref<1x32xf32, #tpu.memory_space<vmem>>, vector<1x32xf32>
    %c0_3 = arith.constant 0 : index
    %c0_4 = arith.constant 0 : index
    %2 = vector.load %arg8[%c0_3, %c0_4] : memref<32x96xf32, #tpu.memory_space<vmem>>, vector<32x96xf32>
    %c0_5 = arith.constant 0 : index
    %c0_6 = arith.constant 0 : index
    %3 = vector.load %arg9[%c0_5, %c0_6] : memref<32x96xf32, #tpu.memory_space<vmem>>, vector<32x96xf32>
    %c0_7 = arith.constant 0 : index
    %c0_8 = arith.constant 0 : index
    %4 = vector.load %arg10[%c0_7, %c0_8] : memref<2x96xf32, #tpu.memory_space<vmem>>, vector<1x96xf32>
    %c1 = arith.constant 1 : index
    %c0_9 = arith.constant 0 : index
    %5 = vector.load %arg10[%c1, %c0_9] : memref<2x96xf32, #tpu.memory_space<vmem>>, vector<1x96xf32>
    %c0_10 = arith.constant 0 : index
    %c0_11 = arith.constant 0 : index
    %c0_12 = arith.constant 0 : index
    %6 = vector.load %arg1[%c0_10, %c0_11, %c0_12] : memref<5x8x32xf32, #tpu.memory_space<vmem>>, vector<5x8x32xf32>
    %7 = vector.shape_cast %6 : vector<5x8x32xf32> to vector<40x32xf32>
    %c0_13 = arith.constant 0 : index
    %c0_14 = arith.constant 0 : index
    %8 = vector.load %arg7[%c0_13, %c0_14] : memref<32x96xf32, #tpu.memory_space<vmem>>, vector<32x96xf32>
    %cst = arith.constant dense<0.000000e+00> : vector<40x96xf32>
    %9 = tpu.matmul %7, %8, %cst {dimension_numbers = #tpu.dot_dimension_numbers<[1], [0], [0], [1], [0, 0, 1, 1], [], []>} : vector<40x32xf32>, vector<32x96xf32>, vector<40x96xf32> -> vector<40x96xf32>
    %10 = vector.broadcast %4 : vector<1x96xf32> to vector<40x96xf32>
    %11 = arith.addf %9, %10 : vector<40x96xf32>
    %c0_15 = arith.constant 0 : index
    %c0_16 = arith.constant 0 : index
    %12 = vector.load %arg13[%c0_15, %c0_16] : memref<40x96xf32, #tpu.memory_space<vmem>>, vector<40x96xf32>
    tpu.vector_store %arg13[%c0_15, %c0_16], %11 {strides = array<i32>} : memref<40x96xf32, #tpu.memory_space<vmem>>, vector<40x96xf32>,
    %c0_17 = arith.constant 0 : index
    %c0_18 = arith.constant 0 : index
    %13 = vector.load %arg4[%c0_17, %c0_18] : memref<8x32xf32, #tpu.memory_space<vmem>>, vector<8x32xf32>
    %c0_i32 = arith.constant 0 : i32
    %cst_19 = arith.constant dense<0.000000e+00> : vector<8x32xf32>
    %14 = tpu.matmul %13, %0, %cst_19 {dimension_numbers = #tpu.dot_dimension_numbers<[1], [0], [0], [1], [0, 0, 1, 1], [], []>} : vector<8x32xf32>, vector<32x32xf32>, vector<8x32xf32> -> vector<8x32xf32>
    %c0_20 = arith.constant 0 : index
    %c0_21 = arith.constant 0 : index
    %c0_22 = arith.constant 0 : index
    %15 = vector.load %arg3[%c0_20, %c0_21, %c0_22] : memref<8x8x32xf32, #tpu.memory_space<vmem>>, vector<8x8x32xf32>
    %16 = vector.shape_cast %14 : vector<8x32xf32> to vector<8x1x32xf32>
    %17 = vector.broadcast %16 : vector<8x1x32xf32> to vector<8x8x32xf32>
    %18 = arith.addf %15, %17 : vector<8x8x32xf32>
    %19 = math.tanh %18 : vector<8x8x32xf32>
    %20 = vector.shape_cast %1 : vector<1x32xf32> to vector<1x1x32xf32>
    %21 = vector.broadcast %20 : vector<1x1x32xf32> to vector<8x8x32xf32>
    %22 = arith.mulf %19, %21 : vector<8x8x32xf32>
    %cst_23 = arith.constant dense<0.000000e+00> : vector<8x8xf32>
    %23 = vector.multi_reduction <add>, %22, %cst_23 [2] : vector<8x8x32xf32> to vector<8x8xf32>
    %cst_24 = arith.constant dense<0xFF800000> : vector<8xf32>
    %24 = vector.multi_reduction <maximumf>, %23, %cst_24 [1] : vector<8x8xf32> to vector<8xf32>
    %25 = vector.shape_cast %24 : vector<8xf32> to vector<8x1xf32>
    %26 = vector.broadcast %25 : vector<8x1xf32> to vector<8x8xf32>
    %27 = arith.subf %23, %26 : vector<8x8xf32>
    %28 = math.exp %27 : vector<8x8xf32>
    %cst_25 = arith.constant dense<0.000000e+00> : vector<8xf32>
    %29 = vector.multi_reduction <add>, %28, %cst_25 [1] : vector<8x8xf32> to vector<8xf32>
    %30 = vector.shape_cast %29 : vector<8xf32> to vector<8x1xf32>
    %31 = tpu.reciprocal %30 {approx = true} : vector<8x1xf32> -> vector<8x1xf32>
    %32 = vector.broadcast %31 : vector<8x1xf32> to vector<8x8xf32>
    %33 = arith.mulf %28, %32 : vector<8x8xf32>
    %34 = vector.shape_cast %33 : vector<8x8xf32> to vector<8x8x1xf32>
    %c0_26 = arith.constant 0 : index
    %c0_27 = arith.constant 0 : index
    %c0_28 = arith.constant 0 : index
    %35 = vector.load %arg2[%c0_26, %c0_27, %c0_28] : memref<8x8x32xf32, #tpu.memory_space<vmem>>, vector<8x8x32xf32>
    %36 = vector.broadcast %34 : vector<8x8x1xf32> to vector<8x8x32xf32>
    %37 = arith.mulf %36, %35 : vector<8x8x32xf32>
    %cst_29 = arith.constant dense<0.000000e+00> : vector<8x32xf32>
    %38 = vector.multi_reduction <add>, %37, %cst_29 [1] : vector<8x8x32xf32> to vector<8x32xf32>
    %c8_i32 = arith.constant 8 : i32
    %39 = arith.muli %c0_i32, %c8_i32 : i32
    %40 = tpu.assume_multiple %39, 8 : i32
    %41 = arith.index_cast %40 : i32 to index
    %c0_30 = arith.constant 0 : index
    %42 = vector.load %arg13[%41, %c0_30] : memref<40x96xf32, #tpu.memory_space<vmem>>, vector<8x96xf32>
    %cst_31 = arith.constant dense<0.000000e+00> : vector<8x96xf32>
    %43 = tpu.matmul %38, %2, %cst_31 {dimension_numbers = #tpu.dot_dimension_numbers<[1], [0], [0], [1], [0, 0, 1, 1], [], []>} : vector<8x32xf32>, vector<32x96xf32>, vector<8x96xf32> -> vector<8x96xf32>
    %44 = arith.addf %42, %43 : vector<8x96xf32>
    %cst_32 = arith.constant dense<0.000000e+00> : vector<8x96xf32>
    %45 = tpu.matmul %13, %3, %cst_32 {dimension_numbers = #tpu.dot_dimension_numbers<[1], [0], [0], [1], [0, 0, 1, 1], [], []>} : vector<8x32xf32>, vector<32x96xf32>, vector<8x96xf32> -> vector<8x96xf32>
    %46 = vector.broadcast %5 : vector<1x96xf32> to vector<8x96xf32>
    %47 = arith.addf %45, %46 : vector<8x96xf32>
    %48 = vector.extract_strided_slice %44 {offsets = [0, 0], sizes = [8, 32], strides = [1, 1]} : vector<8x96xf32> to vector<8x32xf32>
    %49 = vector.extract_strided_slice %47 {offsets = [0, 0], sizes = [8, 32], strides = [1, 1]} : vector<8x96xf32> to vector<8x32xf32>
    %50 = arith.addf %48, %49 : vector<8x32xf32>
    %51 = arith.negf %50 : vector<8x32xf32>
    %52 = math.exp %51 : vector<8x32xf32>
    %cst_33 = arith.constant 1.000000e+00 : f32
    %53 = vector.broadcast %cst_33 : f32 to vector<8x32xf32>
    %54 = arith.addf %53, %52 : vector<8x32xf32>
    %55 = arith.divf %53, %54 : vector<8x32xf32>
    %56 = vector.extract_strided_slice %44 {offsets = [0, 32], sizes = [8, 32], strides = [1, 1]} : vector<8x96xf32> to vector<8x32xf32>
    %57 = vector.extract_strided_slice %47 {offsets = [0, 32], sizes = [8, 32], strides = [1, 1]} : vector<8x96xf32> to vector<8x32xf32>
    %58 = arith.addf %56, %57 : vector<8x32xf32>
    %59 = arith.negf %58 : vector<8x32xf32>
    %60 = math.exp %59 : vector<8x32xf32>
    %cst_34 = arith.constant 1.000000e+00 : f32
    %61 = vector.broadcast %cst_34 : f32 to vector<8x32xf32>
    %62 = arith.addf %61, %60 : vector<8x32xf32>
    %63 = arith.divf %61, %62 : vector<8x32xf32>
    %64 = vector.extract_strided_slice %44 {offsets = [0, 64], sizes = [8, 32], strides = [1, 1]} : vector<8x96xf32> to vector<8x32xf32>
    %65 = vector.extract_strided_slice %47 {offsets = [0, 64], sizes = [8, 32], strides = [1, 1]} : vector<8x96xf32> to vector<8x32xf32>
    %66 = arith.mulf %55, %65 : vector<8x32xf32>
    %67 = arith.addf %64, %66 : vector<8x32xf32>
    %68 = math.tanh %67 : vector<8x32xf32>
    %cst_35 = arith.constant 1.000000e+00 : f32
    %69 = vector.broadcast %cst_35 : f32 to vector<8x32xf32>
    %70 = arith.subf %69, %63 : vector<8x32xf32>
    %71 = arith.mulf %70, %68 : vector<8x32xf32>
    %72 = arith.mulf %63, %13 : vector<8x32xf32>
    %73 = arith.addf %71, %72 : vector<8x32xf32>
    %74 = arith.index_cast %c0_i32 : i32 to index
    %c0_36 = arith.constant 0 : index
    %c0_37 = arith.constant 0 : index
    %75 = vector.load %arg12[%74, %c0_36, %c0_37] : memref<5x8x8xf32, #tpu.memory_space<vmem>>, vector<1x8x8xf32>
    %76 = vector.shape_cast %75 : vector<1x8x8xf32> to vector<8x8xf32>
    %77 = vector.shape_cast %33 : vector<8x8xf32> to vector<1x8x8xf32>
    tpu.vector_store %arg12[%74, %c0_36, %c0_37], %77 {strides = array<i32>} : memref<5x8x8xf32, #tpu.memory_space<vmem>>, vector<1x8x8xf32>,
    %78 = arith.index_cast %c0_i32 : i32 to index
    %c0_38 = arith.constant 0 : index
    %c0_39 = arith.constant 0 : index
    %79 = vector.load %arg11[%78, %c0_38, %c0_39] : memref<5x8x32xf32, #tpu.memory_space<vmem>>, vector<1x8x32xf32>
    %80 = vector.shape_cast %79 : vector<1x8x32xf32> to vector<8x32xf32>
    %81 = vector.shape_cast %73 : vector<8x32xf32> to vector<1x8x32xf32>
    tpu.vector_store %arg11[%78, %c0_38, %c0_39], %81 {strides = array<i32>} : memref<5x8x32xf32, #tpu.memory_space<vmem>>, vector<1x8x32xf32>,
    %c1_i32 = arith.constant 1 : i32
    %cst_40 = arith.constant dense<0.000000e+00> : vector<8x32xf32>
    %82 = tpu.matmul %73, %0, %cst_40 {dimension_numbers = #tpu.dot_dimension_numbers<[1], [0], [0], [1], [0, 0, 1, 1], [], []>} : vector<8x32xf32>, vector<32x32xf32>, vector<8x32xf32> -> vector<8x32xf32>
    %c0_41 = arith.constant 0 : index
    %c0_42 = arith.constant 0 : index
    %c0_43 = arith.constant 0 : index
    %83 = vector.load %arg3[%c0_41, %c0_42, %c0_43] : memref<8x8x32xf32, #tpu.memory_space<vmem>>, vector<8x8x32xf32>
    %84 = vector.shape_cast %82 : vector<8x32xf32> to vector<8x1x32xf32>
    %85 = vector.broadcast %84 : vector<8x1x32xf32> to vector<8x8x32xf32>
    %86 = arith.addf %83, %85 : vector<8x8x32xf32>
    %87 = math.tanh %86 : vector<8x8x32xf32>
    %88 = vector.shape_cast %1 : vector<1x32xf32> to vector<1x1x32xf32>
    %89 = vector.broadcast %88 : vector<1x1x32xf32> to vector<8x8x32xf32>
    %90 = arith.mulf %87, %89 : vector<8x8x32xf32>
    %cst_44 = arith.constant dense<0.000000e+00> : vector<8x8xf32>
    %91 = vector.multi_reduction <add>, %90, %cst_44 [2] : vector<8x8x32xf32> to vector<8x8xf32>
    %cst_45 = arith.constant dense<0xFF800000> : vector<8xf32>
    %92 = vector.multi_reduction <maximumf>, %91, %cst_45 [1] : vector<8x8xf32> to vector<8xf32>
    %93 = vector.shape_cast %92 : vector<8xf32> to vector<8x1xf32>
    %94 = vector.broadcast %93 : vector<8x1xf32> to vector<8x8xf32>
    %95 = arith.subf %91, %94 : vector<8x8xf32>
    %96 = math.exp %95 : vector<8x8xf32>
    %cst_46 = arith.constant dense<0.000000e+00> : vector<8xf32>
    %97 = vector.multi_reduction <add>, %96, %cst_46 [1] : vector<8x8xf32> to vector<8xf32>
    %98 = vector.shape_cast %97 : vector<8xf32> to vector<8x1xf32>
    %99 = tpu.reciprocal %98 {approx = true} : vector<8x1xf32> -> vector<8x1xf32>
    %100 = vector.broadcast %99 : vector<8x1xf32> to vector<8x8xf32>
    %101 = arith.mulf %96, %100 : vector<8x8xf32>
    %102 = vector.shape_cast %101 : vector<8x8xf32> to vector<8x8x1xf32>
    %c0_47 = arith.constant 0 : index
    %c0_48 = arith.constant 0 : index
    %c0_49 = arith.constant 0 : index
    %103 = vector.load %arg2[%c0_47, %c0_48, %c0_49] : memref<8x8x32xf32, #tpu.memory_space<vmem>>, vector<8x8x32xf32>
    %104 = vector.broadcast %102 : vector<8x8x1xf32> to vector<8x8x32xf32>
    %105 = arith.mulf %104, %103 : vector<8x8x32xf32>
    %cst_50 = arith.constant dense<0.000000e+00> : vector<8x32xf32>
    %106 = vector.multi_reduction <add>, %105, %cst_50 [1] : vector<8x8x32xf32> to vector<8x32xf32>
    %c8_i32_51 = arith.constant 8 : i32
    %107 = arith.muli %c1_i32, %c8_i32_51 : i32
    %108 = tpu.assume_multiple %107, 8 : i32
    %109 = arith.index_cast %108 : i32 to index
    %c0_52 = arith.constant 0 : index
    %110 = vector.load %arg13[%109, %c0_52] : memref<40x96xf32, #tpu.memory_space<vmem>>, vector<8x96xf32>
    %cst_53 = arith.constant dense<0.000000e+00> : vector<8x96xf32>
    %111 = tpu.matmul %106, %2, %cst_53 {dimension_numbers = #tpu.dot_dimension_numbers<[1], [0], [0], [1], [0, 0, 1, 1], [], []>} : vector<8x32xf32>, vector<32x96xf32>, vector<8x96xf32> -> vector<8x96xf32>
    %112 = arith.addf %110, %111 : vector<8x96xf32>
    %cst_54 = arith.constant dense<0.000000e+00> : vector<8x96xf32>
    %113 = tpu.matmul %73, %3, %cst_54 {dimension_numbers = #tpu.dot_dimension_numbers<[1], [0], [0], [1], [0, 0, 1, 1], [], []>} : vector<8x32xf32>, vector<32x96xf32>, vector<8x96xf32> -> vector<8x96xf32>
    %114 = vector.broadcast %5 : vector<1x96xf32> to vector<8x96xf32>
    %115 = arith.addf %113, %114 : vector<8x96xf32>
    %116 = vector.extract_strided_slice %112 {offsets = [0, 0], sizes = [8, 32], strides = [1, 1]} : vector<8x96xf32> to vector<8x32xf32>
    %117 = vector.extract_strided_slice %115 {offsets = [0, 0], sizes = [8, 32], strides = [1, 1]} : vector<8x96xf32> to vector<8x32xf32>
    %118 = arith.addf %116, %117 : vector<8x32xf32>
    %119 = arith.negf %118 : vector<8x32xf32>
    %120 = math.exp %119 : vector<8x32xf32>
    %cst_55 = arith.constant 1.000000e+00 : f32
    %121 = vector.broadcast %cst_55 : f32 to vector<8x32xf32>
    %122 = arith.addf %121, %120 : vector<8x32xf32>
    %123 = arith.divf %121, %122 : vector<8x32xf32>
    %124 = vector.extract_strided_slice %112 {offsets = [0, 32], sizes = [8, 32], strides = [1, 1]} : vector<8x96xf32> to vector<8x32xf32>
    %125 = vector.extract_strided_slice %115 {offsets = [0, 32], sizes = [8, 32], strides = [1, 1]} : vector<8x96xf32> to vector<8x32xf32>
    %126 = arith.addf %124, %125 : vector<8x32xf32>
    %127 = arith.negf %126 : vector<8x32xf32>
    %128 = math.exp %127 : vector<8x32xf32>
    %cst_56 = arith.constant 1.000000e+00 : f32
    %129 = vector.broadcast %cst_56 : f32 to vector<8x32xf32>
    %130 = arith.addf %129, %128 : vector<8x32xf32>
    %131 = arith.divf %129, %130 : vector<8x32xf32>
    %132 = vector.extract_strided_slice %112 {offsets = [0, 64], sizes = [8, 32], strides = [1, 1]} : vector<8x96xf32> to vector<8x32xf32>
    %133 = vector.extract_strided_slice %115 {offsets = [0, 64], sizes = [8, 32], strides = [1, 1]} : vector<8x96xf32> to vector<8x32xf32>
    %134 = arith.mulf %123, %133 : vector<8x32xf32>
    %135 = arith.addf %132, %134 : vector<8x32xf32>
    %136 = math.tanh %135 : vector<8x32xf32>
    %cst_57 = arith.constant 1.000000e+00 : f32
    %137 = vector.broadcast %cst_57 : f32 to vector<8x32xf32>
    %138 = arith.subf %137, %131 : vector<8x32xf32>
    %139 = arith.mulf %138, %136 : vector<8x32xf32>
    %140 = arith.mulf %131, %73 : vector<8x32xf32>
    %141 = arith.addf %139, %140 : vector<8x32xf32>
    %142 = arith.index_cast %c1_i32 : i32 to index
    %c0_58 = arith.constant 0 : index
    %c0_59 = arith.constant 0 : index
    %143 = vector.load %arg12[%142, %c0_58, %c0_59] : memref<5x8x8xf32, #tpu.memory_space<vmem>>, vector<1x8x8xf32>
    %144 = vector.shape_cast %143 : vector<1x8x8xf32> to vector<8x8xf32>
    %145 = vector.shape_cast %101 : vector<8x8xf32> to vector<1x8x8xf32>
    tpu.vector_store %arg12[%142, %c0_58, %c0_59], %145 {strides = array<i32>} : memref<5x8x8xf32, #tpu.memory_space<vmem>>, vector<1x8x8xf32>,
    %146 = arith.index_cast %c1_i32 : i32 to index
    %c0_60 = arith.constant 0 : index
    %c0_61 = arith.constant 0 : index
    %147 = vector.load %arg11[%146, %c0_60, %c0_61] : memref<5x8x32xf32, #tpu.memory_space<vmem>>, vector<1x8x32xf32>
    %148 = vector.shape_cast %147 : vector<1x8x32xf32> to vector<8x32xf32>
    %149 = vector.shape_cast %141 : vector<8x32xf32> to vector<1x8x32xf32>
    tpu.vector_store %arg11[%146, %c0_60, %c0_61], %149 {strides = array<i32>} : memref<5x8x32xf32, #tpu.memory_space<vmem>>, vector<1x8x32xf32>,
    %c2_i32 = arith.constant 2 : i32
    %cst_62 = arith.constant dense<0.000000e+00> : vector<8x32xf32>
    %150 = tpu.matmul %141, %0, %cst_62 {dimension_numbers = #tpu.dot_dimension_numbers<[1], [0], [0], [1], [0, 0, 1, 1], [], []>} : vector<8x32xf32>, vector<32x32xf32>, vector<8x32xf32> -> vector<8x32xf32>
    %c0_63 = arith.constant 0 : index
    %c0_64 = arith.constant 0 : index
    %c0_65 = arith.constant 0 : index
    %151 = vector.load %arg3[%c0_63, %c0_64, %c0_65] : memref<8x8x32xf32, #tpu.memory_space<vmem>>, vector<8x8x32xf32>
    %152 = vector.shape_cast %150 : vector<8x32xf32> to vector<8x1x32xf32>
    %153 = vector.broadcast %152 : vector<8x1x32xf32> to vector<8x8x32xf32>
    %154 = arith.addf %151, %153 : vector<8x8x32xf32>
    %155 = math.tanh %154 : vector<8x8x32xf32>
    %156 = vector.shape_cast %1 : vector<1x32xf32> to vector<1x1x32xf32>
    %157 = vector.broadcast %156 : vector<1x1x32xf32> to vector<8x8x32xf32>
    %158 = arith.mulf %155, %157 : vector<8x8x32xf32>
    %cst_66 = arith.constant dense<0.000000e+00> : vector<8x8xf32>
    %159 = vector.multi_reduction <add>, %158, %cst_66 [2] : vector<8x8x32xf32> to vector<8x8xf32>
    %cst_67 = arith.constant dense<0xFF800000> : vector<8xf32>
    %160 = vector.multi_reduction <maximumf>, %159, %cst_67 [1] : vector<8x8xf32> to vector<8xf32>
    %161 = vector.shape_cast %160 : vector<8xf32> to vector<8x1xf32>
    %162 = vector.broadcast %161 : vector<8x1xf32> to vector<8x8xf32>
    %163 = arith.subf %159, %162 : vector<8x8xf32>
    %164 = math.exp %163 : vector<8x8xf32>
    %cst_68 = arith.constant dense<0.000000e+00> : vector<8xf32>
    %165 = vector.multi_reduction <add>, %164, %cst_68 [1] : vector<8x8xf32> to vector<8xf32>
    %166 = vector.shape_cast %165 : vector<8xf32> to vector<8x1xf32>
    %167 = tpu.reciprocal %166 {approx = true} : vector<8x1xf32> -> vector<8x1xf32>
    %168 = vector.broadcast %167 : vector<8x1xf32> to vector<8x8xf32>
    %169 = arith.mulf %164, %168 : vector<8x8xf32>
    %170 = vector.shape_cast %169 : vector<8x8xf32> to vector<8x8x1xf32>
    %c0_69 = arith.constant 0 : index
    %c0_70 = arith.constant 0 : index
    %c0_71 = arith.constant 0 : index
    %171 = vector.load %arg2[%c0_69, %c0_70, %c0_71] : memref<8x8x32xf32, #tpu.memory_space<vmem>>, vector<8x8x32xf32>
    %172 = vector.broadcast %170 : vector<8x8x1xf32> to vector<8x8x32xf32>
    %173 = arith.mulf %172, %171 : vector<8x8x32xf32>
    %cst_72 = arith.constant dense<0.000000e+00> : vector<8x32xf32>
    %174 = vector.multi_reduction <add>, %173, %cst_72 [1] : vector<8x8x32xf32> to vector<8x32xf32>
    %c8_i32_73 = arith.constant 8 : i32
    %175 = arith.muli %c2_i32, %c8_i32_73 : i32
    %176 = tpu.assume_multiple %175, 8 : i32
    %177 = arith.index_cast %176 : i32 to index
    %c0_74 = arith.constant 0 : index
    %178 = vector.load %arg13[%177, %c0_74] : memref<40x96xf32, #tpu.memory_space<vmem>>, vector<8x96xf32>
    %cst_75 = arith.constant dense<0.000000e+00> : vector<8x96xf32>
    %179 = tpu.matmul %174, %2, %cst_75 {dimension_numbers = #tpu.dot_dimension_numbers<[1], [0], [0], [1], [0, 0, 1, 1], [], []>} : vector<8x32xf32>, vector<32x96xf32>, vector<8x96xf32> -> vector<8x96xf32>
    %180 = arith.addf %178, %179 : vector<8x96xf32>
    %cst_76 = arith.constant dense<0.000000e+00> : vector<8x96xf32>
    %181 = tpu.matmul %141, %3, %cst_76 {dimension_numbers = #tpu.dot_dimension_numbers<[1], [0], [0], [1], [0, 0, 1, 1], [], []>} : vector<8x32xf32>, vector<32x96xf32>, vector<8x96xf32> -> vector<8x96xf32>
    %182 = vector.broadcast %5 : vector<1x96xf32> to vector<8x96xf32>
    %183 = arith.addf %181, %182 : vector<8x96xf32>
    %184 = vector.extract_strided_slice %180 {offsets = [0, 0], sizes = [8, 32], strides = [1, 1]} : vector<8x96xf32> to vector<8x32xf32>
    %185 = vector.extract_strided_slice %183 {offsets = [0, 0], sizes = [8, 32], strides = [1, 1]} : vector<8x96xf32> to vector<8x32xf32>
    %186 = arith.addf %184, %185 : vector<8x32xf32>
    %187 = arith.negf %186 : vector<8x32xf32>
    %188 = math.exp %187 : vector<8x32xf32>
    %cst_77 = arith.constant 1.000000e+00 : f32
    %189 = vector.broadcast %cst_77 : f32 to vector<8x32xf32>
    %190 = arith.addf %189, %188 : vector<8x32xf32>
    %191 = arith.divf %189, %190 : vector<8x32xf32>
    %192 = vector.extract_strided_slice %180 {offsets = [0, 32], sizes = [8, 32], strides = [1, 1]} : vector<8x96xf32> to vector<8x32xf32>
    %193 = vector.extract_strided_slice %183 {offsets = [0, 32], sizes = [8, 32], strides = [1, 1]} : vector<8x96xf32> to vector<8x32xf32>
    %194 = arith.addf %192, %193 : vector<8x32xf32>
    %195 = arith.negf %194 : vector<8x32xf32>
    %196 = math.exp %195 : vector<8x32xf32>
    %cst_78 = arith.constant 1.000000e+00 : f32
    %197 = vector.broadcast %cst_78 : f32 to vector<8x32xf32>
    %198 = arith.addf %197, %196 : vector<8x32xf32>
    %199 = arith.divf %197, %198 : vector<8x32xf32>
    %200 = vector.extract_strided_slice %180 {offsets = [0, 64], sizes = [8, 32], strides = [1, 1]} : vector<8x96xf32> to vector<8x32xf32>
    %201 = vector.extract_strided_slice %183 {offsets = [0, 64], sizes = [8, 32], strides = [1, 1]} : vector<8x96xf32> to vector<8x32xf32>
    %202 = arith.mulf %191, %201 : vector<8x32xf32>
    %203 = arith.addf %200, %202 : vector<8x32xf32>
    %204 = math.tanh %203 : vector<8x32xf32>
    %cst_79 = arith.constant 1.000000e+00 : f32
    %205 = vector.broadcast %cst_79 : f32 to vector<8x32xf32>
    %206 = arith.subf %205, %199 : vector<8x32xf32>
    %207 = arith.mulf %206, %204 : vector<8x32xf32>
    %208 = arith.mulf %199, %141 : vector<8x32xf32>
    %209 = arith.addf %207, %208 : vector<8x32xf32>
    %210 = arith.index_cast %c2_i32 : i32 to index
    %c0_80 = arith.constant 0 : index
    %c0_81 = arith.constant 0 : index
    %211 = vector.load %arg12[%210, %c0_80, %c0_81] : memref<5x8x8xf32, #tpu.memory_space<vmem>>, vector<1x8x8xf32>
    %212 = vector.shape_cast %211 : vector<1x8x8xf32> to vector<8x8xf32>
    %213 = vector.shape_cast %169 : vector<8x8xf32> to vector<1x8x8xf32>
    tpu.vector_store %arg12[%210, %c0_80, %c0_81], %213 {strides = array<i32>} : memref<5x8x8xf32, #tpu.memory_space<vmem>>, vector<1x8x8xf32>,
    %214 = arith.index_cast %c2_i32 : i32 to index
    %c0_82 = arith.constant 0 : index
    %c0_83 = arith.constant 0 : index
    %215 = vector.load %arg11[%214, %c0_82, %c0_83] : memref<5x8x32xf32, #tpu.memory_space<vmem>>, vector<1x8x32xf32>
    %216 = vector.shape_cast %215 : vector<1x8x32xf32> to vector<8x32xf32>
    %217 = vector.shape_cast %209 : vector<8x32xf32> to vector<1x8x32xf32>
    tpu.vector_store %arg11[%214, %c0_82, %c0_83], %217 {strides = array<i32>} : memref<5x8x32xf32, #tpu.memory_space<vmem>>, vector<1x8x32xf32>,
    %c3_i32 = arith.constant 3 : i32
    %cst_84 = arith.constant dense<0.000000e+00> : vector<8x32xf32>
    %218 = tpu.matmul %209, %0, %cst_84 {dimension_numbers = #tpu.dot_dimension_numbers<[1], [0], [0], [1], [0, 0, 1, 1], [], []>} : vector<8x32xf32>, vector<32x32xf32>, vector<8x32xf32> -> vector<8x32xf32>
    %c0_85 = arith.constant 0 : index
    %c0_86 = arith.constant 0 : index
    %c0_87 = arith.constant 0 : index
    %219 = vector.load %arg3[%c0_85, %c0_86, %c0_87] : memref<8x8x32xf32, #tpu.memory_space<vmem>>, vector<8x8x32xf32>
    %220 = vector.shape_cast %218 : vector<8x32xf32> to vector<8x1x32xf32>
    %221 = vector.broadcast %220 : vector<8x1x32xf32> to vector<8x8x32xf32>
    %222 = arith.addf %219, %221 : vector<8x8x32xf32>
    %223 = math.tanh %222 : vector<8x8x32xf32>
    %224 = vector.shape_cast %1 : vector<1x32xf32> to vector<1x1x32xf32>
    %225 = vector.broadcast %224 : vector<1x1x32xf32> to vector<8x8x32xf32>
    %226 = arith.mulf %223, %225 : vector<8x8x32xf32>
    %cst_88 = arith.constant dense<0.000000e+00> : vector<8x8xf32>
    %227 = vector.multi_reduction <add>, %226, %cst_88 [2] : vector<8x8x32xf32> to vector<8x8xf32>
    %cst_89 = arith.constant dense<0xFF800000> : vector<8xf32>
    %228 = vector.multi_reduction <maximumf>, %227, %cst_89 [1] : vector<8x8xf32> to vector<8xf32>
    %229 = vector.shape_cast %228 : vector<8xf32> to vector<8x1xf32>
    %230 = vector.broadcast %229 : vector<8x1xf32> to vector<8x8xf32>
    %231 = arith.subf %227, %230 : vector<8x8xf32>
    %232 = math.exp %231 : vector<8x8xf32>
    %cst_90 = arith.constant dense<0.000000e+00> : vector<8xf32>
    %233 = vector.multi_reduction <add>, %232, %cst_90 [1] : vector<8x8xf32> to vector<8xf32>
    %234 = vector.shape_cast %233 : vector<8xf32> to vector<8x1xf32>
    %235 = tpu.reciprocal %234 {approx = true} : vector<8x1xf32> -> vector<8x1xf32>
    %236 = vector.broadcast %235 : vector<8x1xf32> to vector<8x8xf32>
    %237 = arith.mulf %232, %236 : vector<8x8xf32>
    %238 = vector.shape_cast %237 : vector<8x8xf32> to vector<8x8x1xf32>
    %c0_91 = arith.constant 0 : index
    %c0_92 = arith.constant 0 : index
    %c0_93 = arith.constant 0 : index
    %239 = vector.load %arg2[%c0_91, %c0_92, %c0_93] : memref<8x8x32xf32, #tpu.memory_space<vmem>>, vector<8x8x32xf32>
    %240 = vector.broadcast %238 : vector<8x8x1xf32> to vector<8x8x32xf32>
    %241 = arith.mulf %240, %239 : vector<8x8x32xf32>
    %cst_94 = arith.constant dense<0.000000e+00> : vector<8x32xf32>
    %242 = vector.multi_reduction <add>, %241, %cst_94 [1] : vector<8x8x32xf32> to vector<8x32xf32>
    %c8_i32_95 = arith.constant 8 : i32
    %243 = arith.muli %c3_i32, %c8_i32_95 : i32
    %244 = tpu.assume_multiple %243, 8 : i32
    %245 = arith.index_cast %244 : i32 to index
    %c0_96 = arith.constant 0 : index
    %246 = vector.load %arg13[%245, %c0_96] : memref<40x96xf32, #tpu.memory_space<vmem>>, vector<8x96xf32>
    %cst_97 = arith.constant dense<0.000000e+00> : vector<8x96xf32>
    %247 = tpu.matmul %242, %2, %cst_97 {dimension_numbers = #tpu.dot_dimension_numbers<[1], [0], [0], [1], [0, 0, 1, 1], [], []>} : vector<8x32xf32>, vector<32x96xf32>, vector<8x96xf32> -> vector<8x96xf32>
    %248 = arith.addf %246, %247 : vector<8x96xf32>
    %cst_98 = arith.constant dense<0.000000e+00> : vector<8x96xf32>
    %249 = tpu.matmul %209, %3, %cst_98 {dimension_numbers = #tpu.dot_dimension_numbers<[1], [0], [0], [1], [0, 0, 1, 1], [], []>} : vector<8x32xf32>, vector<32x96xf32>, vector<8x96xf32> -> vector<8x96xf32>
    %250 = vector.broadcast %5 : vector<1x96xf32> to vector<8x96xf32>
    %251 = arith.addf %249, %250 : vector<8x96xf32>
    %252 = vector.extract_strided_slice %248 {offsets = [0, 0], sizes = [8, 32], strides = [1, 1]} : vector<8x96xf32> to vector<8x32xf32>
    %253 = vector.extract_strided_slice %251 {offsets = [0, 0], sizes = [8, 32], strides = [1, 1]} : vector<8x96xf32> to vector<8x32xf32>
    %254 = arith.addf %252, %253 : vector<8x32xf32>
    %255 = arith.negf %254 : vector<8x32xf32>
    %256 = math.exp %255 : vector<8x32xf32>
    %cst_99 = arith.constant 1.000000e+00 : f32
    %257 = vector.broadcast %cst_99 : f32 to vector<8x32xf32>
    %258 = arith.addf %257, %256 : vector<8x32xf32>
    %259 = arith.divf %257, %258 : vector<8x32xf32>
    %260 = vector.extract_strided_slice %248 {offsets = [0, 32], sizes = [8, 32], strides = [1, 1]} : vector<8x96xf32> to vector<8x32xf32>
    %261 = vector.extract_strided_slice %251 {offsets = [0, 32], sizes = [8, 32], strides = [1, 1]} : vector<8x96xf32> to vector<8x32xf32>
    %262 = arith.addf %260, %261 : vector<8x32xf32>
    %263 = arith.negf %262 : vector<8x32xf32>
    %264 = math.exp %263 : vector<8x32xf32>
    %cst_100 = arith.constant 1.000000e+00 : f32
    %265 = vector.broadcast %cst_100 : f32 to vector<8x32xf32>
    %266 = arith.addf %265, %264 : vector<8x32xf32>
    %267 = arith.divf %265, %266 : vector<8x32xf32>
    %268 = vector.extract_strided_slice %248 {offsets = [0, 64], sizes = [8, 32], strides = [1, 1]} : vector<8x96xf32> to vector<8x32xf32>
    %269 = vector.extract_strided_slice %251 {offsets = [0, 64], sizes = [8, 32], strides = [1, 1]} : vector<8x96xf32> to vector<8x32xf32>
    %270 = arith.mulf %259, %269 : vector<8x32xf32>
    %271 = arith.addf %268, %270 : vector<8x32xf32>
    %272 = math.tanh %271 : vector<8x32xf32>
    %cst_101 = arith.constant 1.000000e+00 : f32
    %273 = vector.broadcast %cst_101 : f32 to vector<8x32xf32>
    %274 = arith.subf %273, %267 : vector<8x32xf32>
    %275 = arith.mulf %274, %272 : vector<8x32xf32>
    %276 = arith.mulf %267, %209 : vector<8x32xf32>
    %277 = arith.addf %275, %276 : vector<8x32xf32>
    %278 = arith.index_cast %c3_i32 : i32 to index
    %c0_102 = arith.constant 0 : index
    %c0_103 = arith.constant 0 : index
    %279 = vector.load %arg12[%278, %c0_102, %c0_103] : memref<5x8x8xf32, #tpu.memory_space<vmem>>, vector<1x8x8xf32>
    %280 = vector.shape_cast %279 : vector<1x8x8xf32> to vector<8x8xf32>
    %281 = vector.shape_cast %237 : vector<8x8xf32> to vector<1x8x8xf32>
    tpu.vector_store %arg12[%278, %c0_102, %c0_103], %281 {strides = array<i32>} : memref<5x8x8xf32, #tpu.memory_space<vmem>>, vector<1x8x8xf32>,
    %282 = arith.index_cast %c3_i32 : i32 to index
    %c0_104 = arith.constant 0 : index
    %c0_105 = arith.constant 0 : index
    %283 = vector.load %arg11[%282, %c0_104, %c0_105] : memref<5x8x32xf32, #tpu.memory_space<vmem>>, vector<1x8x32xf32>
    %284 = vector.shape_cast %283 : vector<1x8x32xf32> to vector<8x32xf32>
    %285 = vector.shape_cast %277 : vector<8x32xf32> to vector<1x8x32xf32>
    tpu.vector_store %arg11[%282, %c0_104, %c0_105], %285 {strides = array<i32>} : memref<5x8x32xf32, #tpu.memory_space<vmem>>, vector<1x8x32xf32>,
    %c4_i32 = arith.constant 4 : i32
    %cst_106 = arith.constant dense<0.000000e+00> : vector<8x32xf32>
    %286 = tpu.matmul %277, %0, %cst_106 {dimension_numbers = #tpu.dot_dimension_numbers<[1], [0], [0], [1], [0, 0, 1, 1], [], []>} : vector<8x32xf32>, vector<32x32xf32>, vector<8x32xf32> -> vector<8x32xf32>
    %c0_107 = arith.constant 0 : index
    %c0_108 = arith.constant 0 : index
    %c0_109 = arith.constant 0 : index
    %287 = vector.load %arg3[%c0_107, %c0_108, %c0_109] : memref<8x8x32xf32, #tpu.memory_space<vmem>>, vector<8x8x32xf32>
    %288 = vector.shape_cast %286 : vector<8x32xf32> to vector<8x1x32xf32>
    %289 = vector.broadcast %288 : vector<8x1x32xf32> to vector<8x8x32xf32>
    %290 = arith.addf %287, %289 : vector<8x8x32xf32>
    %291 = math.tanh %290 : vector<8x8x32xf32>
    %292 = vector.shape_cast %1 : vector<1x32xf32> to vector<1x1x32xf32>
    %293 = vector.broadcast %292 : vector<1x1x32xf32> to vector<8x8x32xf32>
    %294 = arith.mulf %291, %293 : vector<8x8x32xf32>
    %cst_110 = arith.constant dense<0.000000e+00> : vector<8x8xf32>
    %295 = vector.multi_reduction <add>, %294, %cst_110 [2] : vector<8x8x32xf32> to vector<8x8xf32>
    %cst_111 = arith.constant dense<0xFF800000> : vector<8xf32>
    %296 = vector.multi_reduction <maximumf>, %295, %cst_111 [1] : vector<8x8xf32> to vector<8xf32>
    %297 = vector.shape_cast %296 : vector<8xf32> to vector<8x1xf32>
    %298 = vector.broadcast %297 : vector<8x1xf32> to vector<8x8xf32>
    %299 = arith.subf %295, %298 : vector<8x8xf32>
    %300 = math.exp %299 : vector<8x8xf32>
    %cst_112 = arith.constant dense<0.000000e+00> : vector<8xf32>
    %301 = vector.multi_reduction <add>, %300, %cst_112 [1] : vector<8x8xf32> to vector<8xf32>
    %302 = vector.shape_cast %301 : vector<8xf32> to vector<8x1xf32>
    %303 = tpu.reciprocal %302 {approx = true} : vector<8x1xf32> -> vector<8x1xf32>
    %304 = vector.broadcast %303 : vector<8x1xf32> to vector<8x8xf32>
    %305 = arith.mulf %300, %304 : vector<8x8xf32>
    %306 = vector.shape_cast %305 : vector<8x8xf32> to vector<8x8x1xf32>
    %c0_113 = arith.constant 0 : index
    %c0_114 = arith.constant 0 : index
    %c0_115 = arith.constant 0 : index
    %307 = vector.load %arg2[%c0_113, %c0_114, %c0_115] : memref<8x8x32xf32, #tpu.memory_space<vmem>>, vector<8x8x32xf32>
    %308 = vector.broadcast %306 : vector<8x8x1xf32> to vector<8x8x32xf32>
    %309 = arith.mulf %308, %307 : vector<8x8x32xf32>
    %cst_116 = arith.constant dense<0.000000e+00> : vector<8x32xf32>
    %310 = vector.multi_reduction <add>, %309, %cst_116 [1] : vector<8x8x32xf32> to vector<8x32xf32>
    %c8_i32_117 = arith.constant 8 : i32
    %311 = arith.muli %c4_i32, %c8_i32_117 : i32
    %312 = tpu.assume_multiple %311, 8 : i32
    %313 = arith.index_cast %312 : i32 to index
    %c0_118 = arith.constant 0 : index
    %314 = vector.load %arg13[%313, %c0_118] : memref<40x96xf32, #tpu.memory_space<vmem>>, vector<8x96xf32>
    %cst_119 = arith.constant dense<0.000000e+00> : vector<8x96xf32>
    %315 = tpu.matmul %310, %2, %cst_119 {dimension_numbers = #tpu.dot_dimension_numbers<[1], [0], [0], [1], [0, 0, 1, 1], [], []>} : vector<8x32xf32>, vector<32x96xf32>, vector<8x96xf32> -> vector<8x96xf32>
    %316 = arith.addf %314, %315 : vector<8x96xf32>
    %cst_120 = arith.constant dense<0.000000e+00> : vector<8x96xf32>
    %317 = tpu.matmul %277, %3, %cst_120 {dimension_numbers = #tpu.dot_dimension_numbers<[1], [0], [0], [1], [0, 0, 1, 1], [], []>} : vector<8x32xf32>, vector<32x96xf32>, vector<8x96xf32> -> vector<8x96xf32>
    %318 = vector.broadcast %5 : vector<1x96xf32> to vector<8x96xf32>
    %319 = arith.addf %317, %318 : vector<8x96xf32>
    %320 = vector.extract_strided_slice %316 {offsets = [0, 0], sizes = [8, 32], strides = [1, 1]} : vector<8x96xf32> to vector<8x32xf32>
    %321 = vector.extract_strided_slice %319 {offsets = [0, 0], sizes = [8, 32], strides = [1, 1]} : vector<8x96xf32> to vector<8x32xf32>
    %322 = arith.addf %320, %321 : vector<8x32xf32>
    %323 = arith.negf %322 : vector<8x32xf32>
    %324 = math.exp %323 : vector<8x32xf32>
    %cst_121 = arith.constant 1.000000e+00 : f32
    %325 = vector.broadcast %cst_121 : f32 to vector<8x32xf32>
    %326 = arith.addf %325, %324 : vector<8x32xf32>
    %327 = arith.divf %325, %326 : vector<8x32xf32>
    %328 = vector.extract_strided_slice %316 {offsets = [0, 32], sizes = [8, 32], strides = [1, 1]} : vector<8x96xf32> to vector<8x32xf32>
    %329 = vector.extract_strided_slice %319 {offsets = [0, 32], sizes = [8, 32], strides = [1, 1]} : vector<8x96xf32> to vector<8x32xf32>
    %330 = arith.addf %328, %329 : vector<8x32xf32>
    %331 = arith.negf %330 : vector<8x32xf32>
    %332 = math.exp %331 : vector<8x32xf32>
    %cst_122 = arith.constant 1.000000e+00 : f32
    %333 = vector.broadcast %cst_122 : f32 to vector<8x32xf32>
    %334 = arith.addf %333, %332 : vector<8x32xf32>
    %335 = arith.divf %333, %334 : vector<8x32xf32>
    %336 = vector.extract_strided_slice %316 {offsets = [0, 64], sizes = [8, 32], strides = [1, 1]} : vector<8x96xf32> to vector<8x32xf32>
    %337 = vector.extract_strided_slice %319 {offsets = [0, 64], sizes = [8, 32], strides = [1, 1]} : vector<8x96xf32> to vector<8x32xf32>
    %338 = arith.mulf %327, %337 : vector<8x32xf32>
    %339 = arith.addf %336, %338 : vector<8x32xf32>
    %340 = math.tanh %339 : vector<8x32xf32>
    %cst_123 = arith.constant 1.000000e+00 : f32
    %341 = vector.broadcast %cst_123 : f32 to vector<8x32xf32>
    %342 = arith.subf %341, %335 : vector<8x32xf32>
    %343 = arith.mulf %342, %340 : vector<8x32xf32>
    %344 = arith.mulf %335, %277 : vector<8x32xf32>
    %345 = arith.addf %343, %344 : vector<8x32xf32>
    %346 = arith.index_cast %c4_i32 : i32 to index
    %c0_124 = arith.constant 0 : index
    %c0_125 = arith.constant 0 : index
    %347 = vector.load %arg12[%346, %c0_124, %c0_125] : memref<5x8x8xf32, #tpu.memory_space<vmem>>, vector<1x8x8xf32>
    %348 = vector.shape_cast %347 : vector<1x8x8xf32> to vector<8x8xf32>
    %349 = vector.shape_cast %305 : vector<8x8xf32> to vector<1x8x8xf32>
    tpu.vector_store %arg12[%346, %c0_124, %c0_125], %349 {strides = array<i32>} : memref<5x8x8xf32, #tpu.memory_space<vmem>>, vector<1x8x8xf32>,
    %350 = arith.index_cast %c4_i32 : i32 to index
    %c0_126 = arith.constant 0 : index
    %c0_127 = arith.constant 0 : index
    %351 = vector.load %arg11[%350, %c0_126, %c0_127] : memref<5x8x32xf32, #tpu.memory_space<vmem>>, vector<1x8x32xf32>
    %352 = vector.shape_cast %351 : vector<1x8x32xf32> to vector<8x32xf32>
    %353 = vector.shape_cast %345 : vector<8x32xf32> to vector<1x8x32xf32>
    tpu.vector_store %arg11[%350, %c0_126, %c0_127], %353 {strides = array<i32>} : memref<5x8x32xf32, #tpu.memory_space<vmem>>, vector<1x8x32xf32>,
    %c5_i32 = arith.constant 5 : i32
    return
  }
  func.func @transform_0(%arg0: i32) -> (i32, i32, i32) {
    %c0_i32 = arith.constant 0 : i32
    %c0_i32_0 = arith.constant 0 : i32
    %c0_i32_1 = arith.constant 0 : i32
    return %c0_i32, %arg0, %c0_i32_0 : i32, i32, i32
  }
  func.func @transform_1(%arg0: i32) -> (i32, i32, i32) {
    %c0_i32 = arith.constant 0 : i32
    %c0_i32_0 = arith.constant 0 : i32
    %c0_i32_1 = arith.constant 0 : i32
    return %arg0, %c0_i32, %c0_i32_0 : i32, i32, i32
  }
  func.func @transform_2(%arg0: i32) -> (i32, i32, i32) {
    %c0_i32 = arith.constant 0 : i32
    %c0_i32_0 = arith.constant 0 : i32
    %c0_i32_1 = arith.constant 0 : i32
    return %arg0, %c0_i32, %c0_i32_0 : i32, i32, i32
  }
  func.func @transform_3(%arg0: i32) -> (i32, i32) {
    %c0_i32 = arith.constant 0 : i32
    %c0_i32_0 = arith.constant 0 : i32
    return %arg0, %c0_i32 : i32, i32
  }
  func.func @transform_4(%arg0: i32) -> (i32, i32) {
    %c0_i32 = arith.constant 0 : i32
    %c0_i32_0 = arith.constant 0 : i32
    %c0_i32_1 = arith.constant 0 : i32
    return %c0_i32, %c0_i32_0 : i32, i32
  }
  func.func @transform_5(%arg0: i32) -> (i32, i32) {
    %c0_i32 = arith.constant 0 : i32
    %c0_i32_0 = arith.constant 0 : i32
    %c0_i32_1 = arith.constant 0 : i32
    return %c0_i32, %c0_i32_0 : i32, i32
  }
  func.func @transform_6(%arg0: i32) -> (i32, i32) {
    %c0_i32 = arith.constant 0 : i32
    %c0_i32_0 = arith.constant 0 : i32
    %c0_i32_1 = arith.constant 0 : i32
    return %c0_i32, %c0_i32_0 : i32, i32
  }
  func.func @transform_7(%arg0: i32) -> (i32, i32) {
    %c0_i32 = arith.constant 0 : i32
    %c0_i32_0 = arith.constant 0 : i32
    %c0_i32_1 = arith.constant 0 : i32
    return %c0_i32, %c0_i32_0 : i32, i32
  }
  func.func @transform_8(%arg0: i32) -> (i32, i32) {
    %c0_i32 = arith.constant 0 : i32
    %c0_i32_0 = arith.constant 0 : i32
    %c0_i32_1 = arith.constant 0 : i32
    return %c0_i32, %c0_i32_0 : i32, i32
  }
  func.func @transform_9(%arg0: i32) -> (i32, i32) {
    %c0_i32 = arith.constant 0 : i32
    %c0_i32_0 = arith.constant 0 : i32
    %c0_i32_1 = arith.constant 0 : i32
    return %c0_i32, %c0_i32_0 : i32, i32
  }
  func.func @transform_10(%arg0: i32) -> (i32, i32, i32) {
    %c0_i32 = arith.constant 0 : i32
    %c0_i32_0 = arith.constant 0 : i32
    %c0_i32_1 = arith.constant 0 : i32
    return %c0_i32, %arg0, %c0_i32_0 : i32, i32, i32
  }
  func.func @transform_11(%arg0: i32) -> (i32, i32, i32) {
    %c0_i32 = arith.constant 0 : i32
    %c0_i32_0 = arith.constant 0 : i32
    %c0_i32_1 = arith.constant 0 : i32
    return %c0_i32, %arg0, %c0_i32_0 : i32, i32, i32
  }
}

</mosaic_0001>

<bundles_post_ra>
// kernel: tpu_custom_call.1
= control target key start
LH: loop header
LB: loop body
LE: loop exit
PB: predicated region body
PF: predicated region fallthrough
CT: control target
= control target key end

     0   :  { %17 = vsyncpa [#allocation4], 0  ;;  %s6378_s0 = inlined_call_operand.hbm [shape: f32[5,8,32], index: 0, kind: input, shape index: {}]   ;;  %s6379_s1 = inlined_call_operand.hbm [shape: f32[8,8,32], index: 1, kind: input, shape index: {}]   ;;  %s6380_s2 = inlined_call_operand.hbm [shape: f32[8,8,32], index: 2, kind: input, shape index: {}]   ;;  %s6381_s3 = inlined_call_operand.vmem [shape: f32[8,32], index: 3, kind: input, shape index: {}]   ;;  %s6382_s4 = inlined_call_operand.hbm [shape: f32[32,32], index: 4, kind: input, shape index: {}]   ;;  %s6383_s5 = inlined_call_operand.vmem [shape: f32[1,32], index: 5, kind: input, shape index: {}]   ;;  %s6384_s6 = inlined_call_operand.hbm [shape: f32[32,96], index: 6, kind: input, shape index: {}]   ;;  %s6385_s7 = inlined_call_operand.hbm [shape: f32[32,96], index: 7, kind: input, shape index: {}]   ;;  %s6386_s8 = inlined_call_operand.hbm [shape: f32[32,96], index: 8, kind: input, shape index: {}]   ;;  %s6387_s9 = inlined_call_operand.vmem [shape: f32[2,96], index: 9, kind: input, shape index: {}]   ;;  %s6388_s10 = inlined_call_operand.hbm [shape: f32[5,8,32], index: 10, kind: output, shape index: {0}]   ;;  %s6389_s11 = inlined_call_operand.hbm [shape: f32[5,8,8], index: 11, kind: output, shape index: {1}]  }
   0x1   :  { %18 = vsyncpa [#allocation7], 0 }
   0x2   :  { %19 = vsyncpa [#allocation10], 0 }
   0x3   :  { %20 = vsyncpa [#allocation13], 0 }
   0x4   :  { %21 = vsyncpa [#allocation5], 0 }
   0x5   :  { %22 = vsyncpa [#allocation17], 0  ;;  %s5188_s17 = smov [#allocation6]   ;;  %s5189_s19 = smov [#allocation9]  }
   0x6   :  { %s40_s18 = sshll.u32 %s5188_s17, 4  ;;  %s66_s20 = sshll.u32 %s5189_s19, 4  ;;  %s41_s18 = int_to_ptr.vmem [resolvable:$true] %s40_s18  ;;  %s5267_s20 = int_to_ptr.vmem [resolvable:$true] %s66_s20 }
   0x7   :  { %s4978_s23 = scalar_lea.hbm %s6379_s1, 1024 }
   0x8   :  { %p4979_p0 = scmp.ne.s32.totalorder %s6379_s1, %s4978_s23  ;;  %p4982_p1 = scmp.lt.u32.totalorder %s4978_s23, %s6379_s1 }
   0xa   :  { %p4984_p2 = pnand %p4982_p1, %p4979_p0 }
   0xc   :  { %4987 = shalt.err (!%p4984_p2)
}
   0xd   :  { %s4988_s28 = scalar_lea.vmem %s41_s18, 1024  ;;  %p4993_p4 = scmp.lt.s32.totalorder %s41_s18, %s41_s18 }
   0xe   :  { %p4989_p3 = scmp.ne.s32.totalorder %s41_s18, %s4988_s28  ;;  %p4994_p5 = scmp.lt.s32.totalorder %s4988_s28, %s4988_s28 }
  0x10   :  { %p4995_p6 = por %p4994_p5, %p4993_p4 }
  0x12   :  { %p4996_p7 = pnand %p4995_p6, %p4989_p3 }
  0x14   :  { %4999 = shalt.err (!%p4996_p7)
}
  0x15   :  { %s5190_s29 = smov 128   ;;  %s5191_s30 = smov 8  }
  0x16   :  { %46 = dma.hbm_to_vmem [thread:$0]  %s6379_s1, 1024, %s41_s18, [#allocation7], %s5190_s29, %s5190_s29, %s5191_s30  }
  0x17   :  { %s5000_s16 = scalar_lea.hbm %s6382_s4, 512 }
  0x18   :  { %p5001_p8 = scmp.ne.s32.totalorder %s6382_s4, %s5000_s16  ;;  %p5004_p9 = scmp.lt.u32.totalorder %s5000_s16, %s6382_s4 }
  0x1a   :  { %p5006_p10 = pnand %p5004_p9, %p5001_p8 }
  0x1c   :  { %5009 = shalt.err (!%p5006_p10)
}
  0x1d   :  { %s5010_s23 = scalar_lea.vmem %s5267_s20, 512  ;;  %p5015_p12 = scmp.lt.s32.totalorder %s5267_s20, %s5267_s20 }
  0x1e   :  { %p5011_p11 = scmp.ne.s32.totalorder %s5267_s20, %s5010_s23  ;;  %p5016_p13 = scmp.lt.s32.totalorder %s5010_s23, %s5010_s23 }
  0x20   :  { %p5017_p0 = por %p5016_p13, %p5015_p12 }
  0x22   :  { %p5018_p1 = pnand %p5017_p0, %p5011_p11 }
  0x24   :  { %5021 = shalt.err (!%p5018_p1)
}
  0x25   :  { %72 = dma.hbm_to_vmem [thread:$0]  %s6382_s4, 512, %s5267_s20, [#allocation10], %s5190_s29, %s5190_s29, %s5191_s30  }
  0x26   :  { %s5192_s24 = smov [#allocation12]   ;;  %s5193_s26 = smov [#allocation3]  }
  0x27   :  { %s92_s25 = sshll.u32 %s5192_s24, 4  ;;  %s28_s27 = sshll.u32 %s5193_s26, 4  ;;  %s93_s25 = int_to_ptr.vmem [resolvable:$true] %s92_s25  ;;  %s5304_s27 = int_to_ptr.vmem [resolvable:$true] %s28_s27 }
  0x28   :  { %s5022_s13 = scalar_lea.hbm %s6385_s7, 512 }
  0x29   :  { %p5023_p2 = scmp.ne.s32.totalorder %s6385_s7, %s5022_s13  ;;  %p5026_p3 = scmp.lt.u32.totalorder %s5022_s13, %s6385_s7 }
  0x2b   :  { %p5028_p4 = pnand %p5026_p3, %p5023_p2 }
  0x2d   :  { %5031 = shalt.err (!%p5028_p4)
}
  0x2e   :  { %s5032_s4 = scalar_lea.vmem %s93_s25, 512  ;;  %p5037_p6 = scmp.lt.s32.totalorder %s93_s25, %s93_s25 }
  0x2f   :  { %p5033_p5 = scmp.ne.s32.totalorder %s93_s25, %s5032_s4  ;;  %p5038_p7 = scmp.lt.s32.totalorder %s5032_s4, %s5032_s4 }
  0x31   :  { %p5039_p8 = por %p5038_p7, %p5037_p6 }
  0x33   :  { %p5040_p9 = pnand %p5039_p8, %p5033_p5 }
  0x35   :  { %5043 = shalt.err (!%p5040_p9)
}
  0x36   :  { %98 = dma.hbm_to_vmem [thread:$0]  %s6385_s7, 512, %s93_s25, [#allocation13], %s5190_s29, %s5190_s29, %s5191_s30  }
  0x37   :  { %s5044_s23 = scalar_lea.hbm %s6378_s0, 640 }
  0x38   :  { %p5045_p10 = scmp.ne.s32.totalorder %s6378_s0, %s5044_s23  ;;  %p5048_p11 = scmp.lt.u32.totalorder %s5044_s23, %s6378_s0 }
  0x3a   :  { %p5050_p12 = pnand %p5048_p11, %p5045_p10 }
  0x3c   :  { %5053 = shalt.err (!%p5050_p12)
}
  0x3d   :  { %s5054_s28 = scalar_lea.vmem %s5304_s27, 640  ;;  %p5059_p0 = scmp.lt.s32.totalorder %s5304_s27, %s5304_s27 }
  0x3e   :  { %p5055_p13 = scmp.ne.s32.totalorder %s5304_s27, %s5054_s28  ;;  %p5060_p1 = scmp.lt.s32.totalorder %s5054_s28, %s5054_s28 }
  0x40   :  { %p5061_p2 = por %p5060_p1, %p5059_p0 }
  0x42   :  { %p5062_p3 = pnand %p5061_p2, %p5055_p13 }
  0x44   :  { %5065 = shalt.err (!%p5062_p3)
}
  0x45   :  { %34 = dma.hbm_to_vmem [thread:$0]  %s6378_s0, 640, %s5304_s27, [#allocation4], %s5190_s29, %s5190_s29, %s5191_s30  }
  0x46   :  { %s5194_s12 = smov [#allocation8]   ;;  %s5195_s14 = smov [#allocation11]  }
  0x47   :  { %s52_s13 = sshll.u32 %s5194_s12, 4  ;;  %s80_s15 = sshll.u32 %s5195_s14, 4  ;;  %s53_s13 = int_to_ptr.vmem [resolvable:$true] %s52_s13  ;;  %s5341_s15 = int_to_ptr.vmem [resolvable:$true] %s80_s15 }
  0x48   :  { %s5066_s4 = scalar_lea.hbm %s6380_s2, 1024 }
  0x49   :  { %p5067_p4 = scmp.ne.s32.totalorder %s6380_s2, %s5066_s4  ;;  %p5070_p5 = scmp.lt.u32.totalorder %s5066_s4, %s6380_s2 }
  0x4b   :  { %p5072_p6 = pnand %p5070_p5, %p5067_p4 }
  0x4d   :  { %5075 = shalt.err (!%p5072_p6)
}
  0x4e   :  { %s5076_s0 = scalar_lea.vmem %s53_s13, 1024  ;;  %p5081_p8 = scmp.lt.s32.totalorder %s53_s13, %s53_s13 }
  0x4f   :  { %p5077_p7 = scmp.ne.s32.totalorder %s53_s13, %s5076_s0  ;;  %p5082_p9 = scmp.lt.s32.totalorder %s5076_s0, %s5076_s0 }
  0x51   :  { %p5083_p10 = por %p5082_p9, %p5081_p8 }
  0x53   :  { %p5084_p11 = pnand %p5083_p10, %p5077_p7 }
  0x55   :  { %5087 = shalt.err (!%p5084_p11)
}
  0x56   :  { %58 = dma.hbm_to_vmem [thread:$0]  %s6380_s2, 1024, %s53_s13, [#allocation7], %s5190_s29, %s5190_s29, %s5191_s30  }
  0x57   :  { %s5088_s24 = scalar_lea.hbm %s6384_s6, 512 }
  0x58   :  { %p5089_p12 = scmp.ne.s32.totalorder %s6384_s6, %s5088_s24  ;;  %p5092_p13 = scmp.lt.u32.totalorder %s5088_s24, %s6384_s6 }
  0x5a   :  { %p5094_p0 = pnand %p5092_p13, %p5089_p12 }
  0x5c   :  { %5097 = shalt.err (!%p5094_p0)
}
  0x5d   :  { %s5098_s12 = scalar_lea.vmem %s5341_s15, 512  ;;  %p5103_p2 = scmp.lt.s32.totalorder %s5341_s15, %s5341_s15 }
  0x5e   :  { %p5099_p1 = scmp.ne.s32.totalorder %s5341_s15, %s5098_s12  ;;  %p5104_p3 = scmp.lt.s32.totalorder %s5098_s12, %s5098_s12 }
  0x60   :  { %p5105_p4 = por %p5104_p3, %p5103_p2 }
  0x62   :  { %p5106_p5 = pnand %p5105_p4, %p5099_p1 }
  0x64   :  { %5109 = shalt.err (!%p5106_p5)
}
  0x65   :  { %86 = dma.hbm_to_vmem [thread:$0]  %s6384_s6, 512, %s5341_s15, [#allocation10], %s5190_s29, %s5190_s29, %s5191_s30  }
  0x66   :  { %s5196_s14 = smov [#allocation14]   ;;  %s5110_s20 = scalar_lea.hbm %s6386_s8, 512 }
  0x67   :  { %s104_s16 = sshll.u32 %s5196_s14, 4  ;;  %p5111_p6 = scmp.ne.s32.totalorder %s6386_s8, %s5110_s20  ;;  %s105_s16 = int_to_ptr.vmem [resolvable:$true] %s104_s16 }
  0x68   :  { %p5114_p7 = scmp.lt.u32.totalorder %s5110_s20, %s6386_s8 }
  0x6a   :  { %p5116_p8 = pnand %p5114_p7, %p5111_p6 }
  0x6c   :  { %5119 = shalt.err (!%p5116_p8)
}
  0x6d   :  { %s5120_s27 = scalar_lea.vmem %s105_s16, 512  ;;  %p5125_p10 = scmp.lt.s32.totalorder %s105_s16, %s105_s16 }
  0x6e   :  { %p5121_p9 = scmp.ne.s32.totalorder %s105_s16, %s5120_s27  ;;  %p5126_p11 = scmp.lt.s32.totalorder %s5120_s27, %s5120_s27 }
  0x70   :  { %p5127_p12 = por %p5126_p11, %p5125_p10 }
  0x72   :  { %p5128_p13 = pnand %p5127_p12, %p5121_p9 }
  0x74   :  { %5131 = shalt.err (!%p5128_p13)
}
  0x75   :  { %110 = dma.hbm_to_vmem [thread:$0]  %s6386_s8, 512, %s105_s16, [#allocation13], %s5190_s29, %s5190_s29, %s5191_s30  }
  0x76   :  { %5176 = dma.done.wait [#allocation4], 640  }
  0x77   :  { %5177 = vsyncadd [#allocation4], 4294966656 }
  0x78   :  { %5178 = dma.done.wait [#allocation7], 2048  }
  0x79   :  { %5179 = vsyncadd [#allocation7], 4294965248 }
  0x7a   :  { %5180 = dma.done.wait [#allocation10], 1024  }
  0x7b   :  { %5181 = vsyncadd [#allocation10], 4294966272 }
  0x7c   :  { %5182 = dma.done.wait [#allocation13], 1024  }
  0x7d   :  { %5183 = vsyncadd [#allocation13], 4294966272  ;;  %v6390_v0 = vmov 0.0|0.0   ;;  %vm5198_vm0 = vmmov 0   ;;  %v6392_v1 = vmov 0.0   ;;  %v134_v2 = vld [vmem:[#allocation9] sm:$0xff]  ;;  %v361_v11 = vlaneseq }
  0x7e   :  { %4663 = vmatprep.subr.bf16.mxu1 %v6390_v0  ;;  %4500 = vmatprep.mubr.msk.f32.mxu1 %vm5198_vm0, %v6392_v1  ;;  %v135_v3 = vld [vmem:[#allocation9 + $0x8] sm:$0xff]  ;;  %v136_v4 = vld [vmem:[#allocation9 + $0x10] sm:$0xff]  ;;  %v137_v6 = vld [vmem:[#allocation9 + $0x18] sm:$0xff]  ;;  %vm162_vm1 = vcmask 261120   ;;  %v5200_v9 = vmov 1966171168  }
  0x7f   :  { %4657 = vmatprep.subr.bf16.mxu0 %v6390_v0  ;;  %4477 = vmatprep.mubr.msk.f32.mxu0 %vm5198_vm0, %v6392_v1  ;;  %v5399_v5 = vpack.c.bf16 %v135_v3, %v134_v2  ;;  %v5402_v7 = vpack.c.bf16 %v137_v6, %v136_v4  ;;  %v5409_v8 = vld [vmem:[%s6381_s3] sm:$0xff]  ;;  %v359_v10 = vunpack.c.l.s4 %v5200_v9  ;;  %v5417_v13 = vshrl.u32 %v361_v11, 7  ;;  %v5428_v23 = vld [vmem:[#allocation8] sm:$0xff]  ;;  %v5433_v29 = vld [vmem:[#allocation8 + $0x8] sm:$0xff]  ;;  %s5202_s7 = smov 64   ;;  %s5203_s25 = smov 96  }
  0x80   :  { %v5435_v30 = vld [vmem:[#allocation8 + $0x10] sm:$0xff]  ;;  %v5439_v35 = vld [vmem:[#allocation8 + $0x18] sm:$0xff]  ;;  %v5441_v36 = vld [vmem:[#allocation8 + $0x20] sm:$0xff]  ;;  %vm542_vm2 = vcmask 1041409   ;;  %vm544_vm3 = vcmask 1042434   ;;  %vm546_vm4 = vcmask 1043459  }
  0x81   :  { %4665 = vmatpush3.bf16.msra.mxu1 %v5399_v5  ;;  %6402 = vst [vmem:[#allocation24_spill] sm:$0xff] %v5402_v7  ;;  %v360_v12 = vunpack.c.0.s8 %v359_v10  ;;  %v5424_v19 = vsub.s32 0, %v5417_v13  ;;  %v5448_v43 = vld [vmem:[#allocation8 + $0x28] sm:$0xff]  ;;  %v5453_v47 = vld [vmem:[#allocation8 + $0x30] sm:$0xff]  ;;  %v5459_v52 = vld [vmem:[#allocation8 + $0x38] sm:$0xff]  ;;  %vm548_vm5 = vcmask 1044484  }
  0x82   :  { %4666 = vmatprep.subr.bf16.mxu1 %v6390_v0  ;;  %v5466_v55 = vld [vmem:[%s6383_s5] ss:$0 sm:$0xff]  ;;  %vm550_vm6 = vcmask 1045509   ;;  %vm552_vm7 = vcmask 1046534   ;;  %vm554_vm8 = vcmask 1047559   ;;  %vm557_vm9 = vcmask 64512  }
  0x83   :  { %v5420_v14 = vsub.s32 %v360_v12, %v5417_v13  ;;  %vm268_vm10 = vcmask 785408   ;;  %s5204_s12 = smov 32  }
  0x85   :  { %4668 = vmatpush3.bf16.msra.mxu1 %v5402_v7 }
  0x86   :  { %4669 = vmatprep.subr.bf16.mxu1 %v6390_v0 }
  0x88   :  { %4501 = vmatmul.mubr.msk.f32.vlgmr.msra.gmra.mrb[0].mxu1 %vm162_vm1, %v5409_v8 }
  0x89   :  { %4511 = vmatprep.mubr.msk.f32.mxu1 %vm5198_vm0, %v6392_v1 }
 0x15b   :  { %v344_v15 = vpop.f32.mrb[0].mxu1 }
 0x15c   :  { %v357_v16 = vcombine.high %v344_v15, %v344_v15  ;;  %v364_v17 = vrot.slane %v344_v15, %v5420_v14  ;;  %v4502_v18 = vpop.f32.mrb[1].mxu1 }
 0x15e   :  { %v371_v20 = vrot.slane %v357_v16, %v5420_v14  ;;  %v372_v21 = vcombine.high %v364_v17, %v364_v17  ;;  %v380_v22 = vrot.slane %v364_v17, %v5420_v14 }
 0x160   :  { %v373_v24 = vcombine.high %v371_v20, %v371_v20  ;;  %v387_v25 = vrot.slane %v371_v20, %v5420_v14  ;;  %v394_v26 = vrot.slane %v372_v21, %v5420_v14  ;;  %v402_v27 = vcombine.high %v380_v22, %v380_v22 }
 0x161   :  { %v409_v28 = vrot.slane %v380_v22, %v5424_v19 }
 0x162   :  { %v401_v31 = vrot.slane %v373_v24, %v5420_v14  ;;  %v403_v32 = vcombine.high %v387_v25, %v387_v25  ;;  %v404_v33 = vcombine.high %v394_v26, %v394_v26  ;;  %v413_v34 = vrot.slane %v394_v26, %v5424_v19 }
 0x163   :  { %v417_v37 = vrot.slane %v402_v27, %v5424_v19  ;;  %v425_v38 = vrot.slane %v387_v25, %v5424_v19  ;;  %v446_v39 = vadd.f32 %v409_v28, %v5428_v23  ;;  %v509_v26 = vand.u32 127, %v361_v11 }
 0x164   :  { %v405_v40 = vcombine.high %v401_v31, %v401_v31  ;;  %v421_v41 = vrot.slane %v404_v33, %v5424_v19  ;;  %v429_v42 = vrot.slane %v401_v31, %v5424_v19  ;;  %v433_v44 = vrot.slane %v403_v32, %v5424_v19 }
 0x165   :  { %v447_v45 = vadd.f32 %v413_v34, %v5433_v29  ;;  %v448_v46 = vadd.f32 %v417_v37, %v5435_v30  ;;  %4774 = vtanh.f32 %v446_v39  ;;  %v450_v49 = vadd.f32 %v425_v38, %v5441_v36 }
 0x166   :  { %v449_v48 = vadd.f32 %v421_v41, %v5439_v35  ;;  %v437_v50 = vrot.slane %v405_v40, %v5424_v19  ;;  %v451_v51 = vadd.f32 %v429_v42, %v5448_v43  ;;  %v452_v53 = vadd.f32 %v433_v44, %v5453_v47 }
 0x167   :  { %4776 = vtanh.f32 %v447_v45  ;;  %v5486_v28 = vsub.s32 %v509_v26, %v5417_v13 }
 0x168   :  { %4778 = vtanh.f32 %v448_v46  ;;  %v453_v54 = vadd.f32 %v437_v50, %v5459_v52 }
 0x169   :  { %4780 = vtanh.f32 %v449_v48 }
 0x16a   :  { %4782 = vtanh.f32 %v450_v49 }
 0x16b   :  { %4784 = vtanh.f32 %v451_v51 }
 0x16c   :  { %4786 = vtanh.f32 %v452_v53 }
 0x16d   :  { %4788 = vtanh.f32 %v453_v54 }
 0x16f   :  { %v4775_v56 = vpop.eup %4774 }
 0x170   :  { %v468_v57 = vmul.f32 %v4775_v56, %v5466_v55 }
 0x171   :  { %v4777_v58 = vpop.eup %4776 }
 0x172   :  { %v4779_v59 = vpop.eup %4778  ;;  %v476_v60 = vsel %vm162_vm1, %v468_v57, 0.0  ;;  %v469_v61 = vmul.f32 %v4777_v58, %v5466_v55 }
 0x173   :  { %v4781_v62 = vpop.eup %4780  ;;  %477 = vadd.xlane.f32.xlu0 %v476_v60  ;;  %v470_v63 = vmul.f32 %v4779_v59, %v5466_v55  ;;  %v5201_v59 = vmov 0   ;;  %v5505_v60 = vsub.s32 1, %v5417_v13 }
 0x174   :  { %v4783_v2 = vpop.eup %4782  ;;  %v471_v4 = vmul.f32 %v4781_v62, %v5466_v55  ;;  %v479_v9 = vsel %vm162_vm1, %v469_v61, 0.0  ;;  %4773 = vset.pattern.permute.xlu0 %v5201_v59  ;;  %4772 = vset.pattern.permute.xlu1 %v5201_v59  ;;  %v5508_v61 = vsub.s32 2, %v5417_v13  ;;  %v5511_v62 = vsub.s32 3, %v5417_v13 }
 0x175   :  { %v482_v3 = vsel %vm162_vm1, %v470_v63, 0.0  ;;  %v4785_v6 = vpop.eup %4784  ;;  %v472_v10 = vmul.f32 %v4783_v2, %v5466_v55 }
 0x176   :  { %483 = vadd.xlane.f32.xlu1 %v482_v3  ;;  %v4787_v12 = vpop.eup %4786  ;;  %v485_v15 = vsel %vm162_vm1, %v471_v4, 0.0  ;;  %v473_v16 = vmul.f32 %v4785_v6, %v5466_v55 }
 0x177   :  { %480 = vadd.xlane.f32.xlu0 %v479_v9  ;;  %v4789_v17 = vpop.eup %4788  ;;  %v488_v18 = vsel %vm162_vm1, %v472_v10, 0.0  ;;  %v474_v20 = vmul.f32 %v4787_v12, %v5466_v55  ;;  %v5517_v10 = vsub.s32 4, %v5417_v13 }
 0x178   :  { %v491_v21 = vsel %vm162_vm1, %v473_v16, 0.0  ;;  %v475_v22 = vmul.f32 %v4789_v17, %v5466_v55 }
 0x179   :  { %v494_v24 = vsel %vm162_vm1, %v474_v20, 0.0 }
 0x17a   :  { %486 = vadd.xlane.f32.xlu1 %v485_v15  ;;  %v497_v25 = vsel %vm162_vm1, %v475_v22, 0.0 }
 0x17b   :  { %489 = vadd.xlane.f32.xlu0 %v488_v18  ;;  %v5521_v18 = vsub.s32 5, %v5417_v13 }
 0x17e   :  { %492 = vadd.xlane.f32.xlu1 %v491_v21 }
 0x17f   :  { %495 = vadd.xlane.f32.xlu0 %v494_v24  ;;  %v5525_v24 = vsub.s32 6, %v5417_v13 }
 0x182   :  { %498 = vadd.xlane.f32.xlu1 %v497_v25 }
 0x200   :  { %v478_v27 = vpop.xlane.xlu0 %477 }
 0x201   :  { %v513_v33 = vrot.slane %v478_v27, %v5486_v28 }
 0x203   :  { %v484_v31 = vpop.xlane.xlu1 %483 }
 0x204   :  { %v481_v32 = vpop.xlane.xlu0 %480  ;;  %v521_v37 = vrot.slane %v484_v31, %v5486_v28 }
 0x205   :  { %v517_v34 = vrot.slane %v481_v32, %v5486_v28 }
 0x207   :  { %v543_v38 = vsel %vm542_vm2, %v517_v34, %v513_v33  ;;  %v487_v39 = vpop.xlane.xlu1 %486 }
 0x208   :  { %v545_v11 = vsel %vm544_vm3, %v521_v37, %v543_v38  ;;  %v525_v40 = vrot.slane %v487_v39, %v5486_v28  ;;  %v490_v41 = vpop.xlane.xlu0 %489 }
 0x209   :  { %v529_v42 = vrot.slane %v490_v41, %v5486_v28 }
 0x20a   :  { %v547_v44 = vsel %vm546_vm4, %v525_v40, %v545_v11 }
 0x20b   :  { %v549_v45 = vsel %vm548_vm5, %v529_v42, %v547_v44  ;;  %v493_v46 = vpop.xlane.xlu1 %492 }
 0x20c   :  { %v533_v48 = vrot.slane %v493_v46, %v5486_v28  ;;  %v496_v49 = vpop.xlane.xlu0 %495 }
 0x20d   :  { %v537_v50 = vrot.slane %v496_v49, %v5486_v28 }
 0x20e   :  { %v551_v51 = vsel %vm550_vm6, %v533_v48, %v549_v45 }
 0x20f   :  { %v499_v53 = vpop.xlane.xlu1 %498  ;;  %v553_v54 = vsel %vm552_vm7, %v537_v50, %v551_v51 }
 0x210   :  { %v541_v56 = vrot.slane %v499_v53, %v5486_v28 }
 0x212   :  { %v555_v57 = vsel %vm554_vm8, %v541_v56, %v553_v54 }
 0x213   :  { %v558_v58 = vsel %vm557_vm9, %v555_v57, -inf }
 0x214   :  { %559 = vmax.xlane.f32.xlu0 %v558_v58 }
 0x2a1   :  { %v560_v63 = vpop.xlane.xlu0 %559 }
 0x2a2   :  { %v565_v2 = vrot.slane %v560_v63, %v5424_v19  ;;  %v569_v3 = vrot.slane %v560_v63, %v5505_v60  ;;  %v573_v4 = vrot.slane %v560_v63, %v5508_v61  ;;  %v577_v12 = vrot.slane %v560_v63, %v5511_v62 }
 0x2a3   :  { %v581_v20 = vrot.slane %v560_v63, %v5517_v10  ;;  %v585_v25 = vrot.slane %v560_v63, %v5521_v18 }
 0x2a4   :  { %v603_v6 = vsub.f32 %v481_v32, %v569_v3  ;;  %v602_v9 = vsub.f32 %v478_v27, %v565_v2  ;;  %v604_v15 = vsub.f32 %v484_v31, %v573_v4  ;;  %v605_v22 = vsub.f32 %v487_v39, %v577_v12 }
 0x2a5   :  { %v606_v27 = vsub.f32 %v490_v41, %v581_v20  ;;  %v5529_v31 = vsub.s32 7, %v5417_v13  ;;  %v589_v32 = vrot.slane %v560_v63, %v5525_v24  ;;  %v607_v34 = vsub.f32 %v493_v46, %v585_v25 }
 0x2a6   :  { %v612_v16 = vmul.f32 1.442695, %v603_v6  ;;  %v610_v17 = vmul.f32 1.442695, %v602_v9  ;;  %v614_v21 = vmul.f32 1.442695, %v604_v15 }
 0x2a7   :  { %v616_v26 = vmul.f32 1.442695, %v605_v22  ;;  %v618_v33 = vmul.f32 1.442695, %v606_v27  ;;  %v593_v39 = vrot.slane %v560_v63, %v5529_v31  ;;  %v620_v11 = vmul.f32 1.442695, %v607_v34 }
 0x2a8   :  { %4790 = vpow2.f32 %v612_v16  ;;  %v608_v40 = vsub.f32 %v496_v49, %v589_v32 }
 0x2a9   :  { %4792 = vpow2.f32 %v610_v17  ;;  %v609_v13 = vsub.f32 %v499_v53, %v593_v39 }
 0x2aa   :  { %4794 = vpow2.f32 %v614_v21  ;;  %v622_v41 = vmul.f32 1.442695, %v608_v40 }
 0x2ab   :  { %4796 = vpow2.f32 %v616_v26  ;;  %v624_v45 = vmul.f32 1.442695, %v609_v13 }
 0x2ac   :  { %4798 = vpow2.f32 %v618_v33 }
 0x2ad   :  { %4800 = vpow2.f32 %v620_v11 }
 0x2ae   :  { %4802 = vpow2.f32 %v622_v41 }
 0x2af   :  { %4804 = vpow2.f32 %v624_v45 }
 0x2b2   :  { %v4791_v37 = vpop.eup %4790 }
 0x2b3   :  { %v4793_v38 = vpop.eup %4792  ;;  %638 = vperm.xlu0 %4773, %v4791_v37  }
 0x2b4   :  { %635 = vperm.xlu1 %4772, %v4793_v38   ;;  %v4795_v42 = vpop.eup %4794 }
 0x2b5   :  { %v4797_v44 = vpop.eup %4796 }
 0x2b6   :  { %v4799_v48 = vpop.eup %4798 }
 0x2b7   :  { %v4801_v46 = vpop.eup %4800 }
 0x2b8   :  { %641 = vperm.xlu1 %4772, %v4795_v42   ;;  %v4803_v50 = vpop.eup %4802 }
 0x2b9   :  { %v4805_v51 = vpop.eup %4804 }
 0x2bc   :  { %644 = vperm.xlu1 %4772, %v4797_v44  }
 0x2c0   :  { %647 = vperm.xlu1 %4772, %v4799_v48  }
 0x2c4   :  { %650 = vperm.xlu1 %4772, %v4801_v46  }
 0x2c8   :  { %653 = vperm.xlu1 %4772, %v4803_v50  }
 0x2cc   :  { %656 = vperm.xlu1 %4772, %v4805_v51  }
 0x332   :  { %v639_v58 = vpop.permute.xlu0 %638 }
 0x333   :  { %v636_v54 = vpop.permute.xlu1 %635  ;;  %v665_v53 = vrot.slane %v639_v58, %v5486_v28 }
 0x334   :  { %v661_v63 = vrot.slane %v636_v54, %v5486_v28 }
 0x336   :  { %v690_v9 = vsel %vm542_vm2, %v665_v53, %v661_v63  ;;  %v154_v63 = vld [vmem:[#allocation11] sm:$0xff] }
 0x337   :  { %v642_v49 = vpop.permute.xlu1 %641 }
 0x338   :  { %v669_v2 = vrot.slane %v642_v49, %v5486_v28 }
 0x33a   :  { %v691_v15 = vsel %vm544_vm3, %v669_v2, %v690_v9  ;;  %v155_v2 = vld [vmem:[#allocation11 + $0x8] sm:$0xff] }
 0x33b   :  { %v645_v56 = vpop.permute.xlu1 %644 }
 0x33c   :  { %v673_v3 = vrot.slane %v645_v56, %v5486_v28 }
 0x33e   :  { %v692_v17 = vsel %vm546_vm4, %v673_v3, %v691_v15  ;;  %v157_v3 = vld [vmem:[#allocation11 + $0x18] sm:$0xff] }
 0x33f   :  { %v648_v57 = vpop.permute.xlu1 %647 }
 0x340   :  { %v677_v4 = vrot.slane %v648_v57, %v5486_v28 }
 0x342   :  { %v693_v20 = vsel %vm548_vm5, %v677_v4, %v692_v17  ;;  %v5574_v17 = vld [vmem:[#allocation6 + $0x8] sm:$0xff] }
 0x343   :  { %v651_v59 = vpop.permute.xlu1 %650 }
 0x344   :  { %v681_v12 = vrot.slane %v651_v59, %v5486_v28 }
 0x346   :  { %v694_v25 = vsel %vm550_vm6, %v681_v12, %v693_v20  ;;  %v142_v12 = vld [vmem:[#allocation12 + $0x18] sm:$0xff] }
 0x347   :  { %v654_v6 = vpop.permute.xlu1 %653 }
 0x348   :  { %v685_v16 = vrot.slane %v654_v6, %v5486_v28  ;;  %v139_v6 = vld [vmem:[#allocation12] sm:$0xff] }
 0x34a   :  { %v695_v26 = vsel %vm552_vm7, %v685_v16, %v694_v25 }
 0x34b   :  { %v657_v21 = vpop.permute.xlu1 %656 }
 0x34c   :  { %v689_v22 = vrot.slane %v657_v21, %v5486_v28  ;;  %v5576_v21 = vld [vmem:[#allocation6] sm:$0xff] }
 0x34e   :  { %v696_v27 = vsel %vm554_vm8, %v689_v22, %v695_v26  ;;  %v5578_v22 = vld [vmem:[#allocation6 + $0x10] sm:$0xff] }
 0x34f   :  { %v698_v32 = vsel %vm557_vm9, %v696_v27, 0.0 }
 0x350   :  { %699 = vadd.xlane.f32.xlu1 %v698_v32 }
 0x3dd   :  { %v700_v33 = vpop.xlane.xlu1 %699 }
 0x3de   :  { %4806 = vrcp.f32 %v700_v33  ;;  %v5583_v33 = vld [vmem:[#allocation6 + $0x18] sm:$0xff] }
 0x3e8   :  { %v4807_v34 = vpop.eup %4806 }
 0x3e9   :  { %v706_v39 = vrot.slane %v4807_v34, %v5424_v19  ;;  %v710_v40 = vrot.slane %v4807_v34, %v5505_v60  ;;  %v714_v13 = vrot.slane %v4807_v34, %v5508_v61  ;;  %v718_v54 = vrot.slane %v4807_v34, %v5511_v62 }
 0x3ea   :  { %v722_v56 = vrot.slane %v4807_v34, %v5517_v10  ;;  %v726_v58 = vrot.slane %v4807_v34, %v5521_v18  ;;  %v730_v59 = vrot.slane %v4807_v34, %v5525_v24  ;;  %v734_v53 = vrot.slane %v4807_v34, %v5529_v31 }
 0x3eb   :  { %v743_v11 = vmul.f32 %v4793_v38, %v706_v39  ;;  %v744_v41 = vmul.f32 %v4791_v37, %v710_v40  ;;  %v745_v45 = vmul.f32 %v4795_v42, %v714_v13  ;;  %v746_v49 = vmul.f32 %v4797_v44, %v718_v54 }
 0x3ec   :  { %v747_v57 = vmul.f32 %v4799_v48, %v722_v56  ;;  %v748_v38 = vmul.f32 %v4801_v46, %v726_v58  ;;  %v749_v37 = vmul.f32 %v4803_v50, %v730_v59  ;;  %v750_v42 = vmul.f32 %v4805_v51, %v734_v53  ;;  %v156_v48 = vld [vmem:[#allocation11 + $0x10] sm:$0xff]  ;;  %v149_v46 = vld [vmem:[#allocation3] sm:$0xff]  ;;  %v140_v50 = vld [vmem:[#allocation12 + $0x8] sm:$0xff] }
 0x3ed   :  { %761 = vperm.xlu0 %4773, %v743_v11   ;;  %v4658_v44 = vpack.c.bf16 %v155_v2, %v154_v63  ;;  %v4661_v4 = vpack.c.bf16 %v157_v3, %v156_v48  ;;  %v5560_v9 = vpack.c.bf16 %v140_v50, %v139_v6  ;;  %v141_v51 = vld [vmem:[#allocation12 + $0x10] sm:$0xff] }
 0x3ee   :  { %v5566_v15 = vpack.c.bf16 %v142_v12, %v141_v51  ;;  %v5600_v12 = vld [vmem:[#allocation6 + $0x30] sm:$0xff] }
 0x3ef   :  { %4659 = vmatpush3.bf16.msra.mxu0 %v4658_v44  ;;  %4671 = vmatpush3.bf16.msra.mxu1 %v5560_v9 }
 0x3f0   :  { %4660 = vmatprep.subr.bf16.mxu0 %v6390_v0  ;;  %4672 = vmatprep.subr.bf16.mxu1 %v6390_v0 }
 0x3f1   :  { %766 = vperm.xlu0 %4773, %v744_v41  }
 0x3f3   :  { %4662 = vmatpush3.bf16.msra.mxu0 %v4661_v4  ;;  %4674 = vmatpush3.bf16.msra.mxu1 %v5566_v15 }
 0x3f4   :  { %4681 = vmatprep.subr.bf16.mxu0 %v6390_v0  ;;  %4675 = vmatprep.subr.bf16.mxu1 %v6390_v0 }
 0x3f5   :  { %771 = vperm.xlu0 %4773, %v745_v45   ;;  %v5589_v45 = vld [vmem:[#allocation6 + $0x20] sm:$0xff] }
 0x3f6   :  { %4478 = vmatmul.mubr.msk.f32.vlgmr.msra.gmra.mrb[0].mxu0 %vm162_vm1, %v149_v46 }
 0x3f7   :  { %4683 = vmatpush3.bf16.msra.mxu0 %v5399_v5  ;;  %4480 = vmatprep.mubr.msk.f32.mxu0 %vm5198_vm0, %v6392_v1 }
 0x3f8   :  { %4684 = vmatprep.subr.bf16.mxu0 %v6390_v0 }
 0x3f9   :  { %776 = vperm.xlu0 %4773, %v746_v49  }
 0x3fb   :  { %4686 = vmatpush3.bf16.msra.mxu0 %v5402_v7 }
 0x3fc   :  { %4693 = vmatprep.subr.bf16.mxu0 %v6390_v0 }
 0x3fd   :  { %781 = vperm.xlu0 %4773, %v747_v57  }
 0x401   :  { %786 = vperm.xlu0 %4773, %v748_v38  }
 0x405   :  { %791 = vperm.xlu0 %4773, %v749_v37   ;;  %v5593_v37 = vld [vmem:[#allocation6 + $0x28] sm:$0xff] }
 0x409   :  { %796 = vperm.xlu0 %4773, %v750_v42  }
 0x46c   :  { %v762_v16 = vpop.permute.xlu0 %761 }
 0x46d   :  { %v799_v26 = vmul.f32 %v762_v16, %v5576_v21  ;;  %v1058_v46 = vrot.slane %v762_v16, %v5486_v28 }
 0x46f   :  { %v807_v39 = vsel %vm162_vm1, %v799_v26, 0.0 }
 0x470   :  { %v767_v20 = vpop.permute.xlu0 %766  ;;  %v808_v54 = vrot.slane %v807_v39, 4 }
 0x471   :  { %v800_v25 = vmul.f32 %v767_v20, %v5574_v17  ;;  %v1062_v3 = vrot.slane %v767_v20, %v5486_v28 }
 0x472   :  { %v809_v53 = vadd.f32 %v808_v54, %v807_v39 }
 0x473   :  { %v814_v34 = vsel %vm162_vm1, %v800_v25, 0.0 }
 0x474   :  { %v772_v27 = vpop.permute.xlu0 %771  ;;  %v815_v13 = vrot.slane %v814_v34, 4  ;;  %v810_v25 = vrot.slane %v809_v53, 2 }
 0x475   :  { %v801_v32 = vmul.f32 %v772_v27, %v5578_v22  ;;  %v1066_v50 = vrot.slane %v772_v27, %v5486_v28 }
 0x476   :  { %v816_v59 = vadd.f32 %v815_v13, %v814_v34  ;;  %v1087_v13 = vsel %vm542_vm2, %v1062_v3, %v1058_v46 }
 0x477   :  { %v821_v11 = vsel %vm162_vm1, %v801_v32, 0.0 }
 0x478   :  { %v777_v40 = vpop.permute.xlu0 %776  ;;  %v822_v49 = vrot.slane %v821_v11, 4  ;;  %v817_v6 = vrot.slane %v816_v59, 2 }
 0x479   :  { %v802_v41 = vmul.f32 %v777_v40, %v5583_v33  ;;  %v1070_v32 = vrot.slane %v777_v40, %v5486_v28 }
 0x47a   :  { %v823_v42 = vadd.f32 %v822_v49, %v821_v11  ;;  %v818_v49 = vadd.f32 %v817_v6, %v816_v59 }
 0x47b   :  { %v828_v56 = vsel %vm162_vm1, %v802_v41, 0.0 }
 0x47c   :  { %v829_v57 = vrot.slane %v828_v56, 4  ;;  %v782_v58 = vpop.permute.xlu0 %781  ;;  %v824_v26 = vrot.slane %v823_v42, 2 }
 0x47d   :  { %v803_v38 = vmul.f32 %v782_v58, %v5589_v45  ;;  %v1074_v11 = vrot.slane %v782_v58, %v5486_v28 }
 0x47e   :  { %v830_v2 = vadd.f32 %v829_v57, %v828_v56  ;;  %v1088_v56 = vsel %vm544_vm3, %v1066_v50, %v1087_v13 }
 0x47f   :  { %v835_v63 = vsel %vm162_vm1, %v803_v38, 0.0  ;;  %v5610_v38 = vld [vmem:[#allocation6 + $0x38] sm:$0xff]  ;;  %v1089_v58 = vsel %vm546_vm4, %v1070_v32, %v1088_v56 }
 0x480   :  { %v836_v44 = vrot.slane %v835_v63, 4  ;;  %v787_v48 = vpop.permute.xlu0 %786  ;;  %v831_v39 = vrot.slane %v830_v2, 2  ;;  %v1090_v46 = vsel %vm548_vm5, %v1074_v11, %v1089_v58 }
 0x481   :  { %v804_v4 = vmul.f32 %v787_v48, %v5593_v37  ;;  %v1078_v54 = vrot.slane %v787_v48, %v5486_v28 }
 0x482   :  { %v837_v51 = vadd.f32 %v836_v44, %v835_v63  ;;  %v811_v63 = vadd.f32 %v810_v25, %v809_v53  ;;  %v825_v44 = vadd.f32 %v824_v26, %v823_v42  ;;  %v832_v3 = vadd.f32 %v831_v39, %v830_v2 }
 0x483   :  { %v842_v34 = vsel %vm162_vm1, %v804_v4, 0.0  ;;  %v1091_v6 = vsel %vm550_vm6, %v1078_v54, %v1090_v46 }
 0x484   :  { %v843_v20 = vrot.slane %v842_v34, 4  ;;  %v792_v41 = vpop.permute.xlu0 %791  ;;  %v838_v16 = vrot.slane %v837_v51, 2  ;;  %v826_v26 = vrot.slane %v825_v44, 1  ;;  %v812_v39 = vrot.slane %v811_v63, 1 }
 0x485   :  { %v805_v27 = vmul.f32 %v792_v41, %v5600_v12  ;;  %v1082_v40 = vrot.slane %v792_v41, %v5486_v28  ;;  %v833_v11 = vrot.slane %v832_v3, 1 }
 0x486   :  { %v844_v57 = vadd.f32 %v843_v20, %v842_v34  ;;  %v839_v59 = vadd.f32 %v838_v16, %v837_v51  ;;  %v819_v20 = vrot.slane %v818_v49, 1  ;;  %v827_v56 = vadd.f32 %v826_v26, %v825_v44 }
 0x487   :  { %v849_v4 = vsel %vm162_vm1, %v805_v27, 0.0  ;;  %v1092_v25 = vsel %vm552_vm7, %v1082_v40, %v1091_v6 }
 0x488   :  { %v845_v48 = vrot.slane %v844_v57, 2  ;;  %v850_v0 = vrot.slane %v849_v4, 4  ;;  %v797_v1 = vpop.permute.xlu0 %796  ;;  %v840_v13 = vrot.slane %v839_v59, 1  ;;  %v820_v16 = vadd.f32 %v819_v20, %v818_v49 }
 0x489   :  { %v806_v50 = vmul.f32 %v797_v1, %v5610_v38  ;;  %v1086_v34 = vrot.slane %v797_v1, %v5486_v28 }
 0x48a   :  { %v846_v53 = vadd.f32 %v845_v48, %v844_v57  ;;  %v851_v42 = vadd.f32 %v850_v0, %v849_v4  ;;  %v813_v0 = vadd.f32 %v812_v39, %v811_v63  ;;  %v834_v57 = vadd.f32 %v833_v11, %v832_v3  ;;  %v5651_v11 = vld [vmem:[%s6387_s9] ss:$0 sm:$0xff] }
 0x48b   :  { %v856_v2 = vsel %vm162_vm1, %v806_v50, 0.0  ;;  %v1093_v32 = vsel %vm554_vm8, %v1086_v34, %v1092_v25  ;;  %v841_v4 = vadd.f32 %v840_v13, %v839_v59  ;;  %v143_v25 = vld [vmem:[#allocation14] sm:$0xff]  ;;  %v6403_v39 = vmov 0.0  }
 0x48c   :  { %v852_v41 = vrot.slane %v851_v42, 2  ;;  %v857_v51 = vrot.slane %v856_v2, 4  ;;  %1095 = vst.msk [vmem:[#allocation16] sm:$0xff] %vm557_vm9, %v1093_v32  ;;  %v847_v54 = vrot.slane %v846_v53, 1  ;;  %v872_v46 = vsel %vm542_vm2, %v820_v16, %v813_v0  ;;  %v144_v32 = vld [vmem:[#allocation14 + $0x8] sm:$0xff] }
 0x48d   :  { %v873_v50 = vsel %vm544_vm3, %v827_v56, %v872_v46  ;;  %v5627_v3 = vpack.c.bf16 %v144_v32, %v143_v25 }
 0x48e   :  { %v853_v1 = vadd.f32 %v852_v41, %v851_v42  ;;  %v858_v27 = vadd.f32 %v857_v51, %v856_v2  ;;  %v848_v48 = vadd.f32 %v847_v54, %v846_v53  ;;  %v874_v49 = vsel %vm546_vm4, %v834_v57, %v873_v50  ;;  %v145_v42 = vld [vmem:[#allocation14 + $0x10] sm:$0xff]  ;;  %v146_v53 = vld [vmem:[#allocation14 + $0x18] sm:$0xff] }
 0x48f   :  { %v875_v20 = vsel %vm548_vm5, %v841_v4, %v874_v49  ;;  %v5633_v2 = vpack.c.bf16 %v146_v53, %v145_v42  ;;  %v150_v49 = vld [vmem:[#allocation3 + $0x8] sm:$0xff] }
 0x490   :  { %v854_v40 = vrot.slane %v853_v1, 1  ;;  %v859_v58 = vrot.slane %v858_v27, 2  ;;  %v876_v63 = vsel %vm550_vm6, %v848_v48, %v875_v20  ;;  %4481 = vmatmul.mubr.msk.f32.gmra.mrb[2].mxu0 %vm162_vm1, %v150_v49  ;;  %v151_v20 = vld [vmem:[#allocation3 + $0x10] sm:$0xff] }
 0x491   :  { %4483 = vmatprep.mubr.msk.f32.mxu0 %vm5198_vm0, %v6403_v39 }
 0x492   :  { %v860_v6 = vadd.f32 %v859_v58, %v858_v27  ;;  %v855_v34 = vadd.f32 %v854_v40, %v853_v1  ;;  %v5658_v1 = vld [vmem:[%s6387_s9 + $0x1] ss:$0 sm:$0xff] }
 0x494   :  { %v861_v7 = vrot.slane %v860_v6, 1  ;;  %v877_v59 = vsel %vm552_vm7, %v855_v34, %v876_v63  ;;  %4484 = vmatmul.mubr.msk.f32.gmra.mrb[4].mxu0 %vm162_vm1, %v151_v20  ;;  %v152_v63 = vld [vmem:[#allocation3 + $0x18] sm:$0xff] }
 0x495   :  { %4486 = vmatprep.mubr.msk.f32.mxu0 %vm5198_vm0, %v6403_v39 }
 0x496   :  { %v862_v44 = vadd.f32 %v861_v7, %v860_v6  ;;  %v6404_v7 = vmov 0.0|0.0  }
 0x498   :  { %v878_v26 = vsel %vm554_vm8, %v862_v44, %v877_v59  ;;  %4487 = vmatmul.mubr.msk.f32.gmra.mrb[6].mxu0 %vm162_vm1, %v152_v63  ;;  %v153_v59 = vld [vmem:[#allocation3 + $0x20] sm:$0xff] }
 0x499   :  { %4512 = vmatmul.mubr.msk.f32.vlgmr.msra.gmra.mrb[2].mxu1 %vm162_vm1, %v878_v26  ;;  %4489 = vmatprep.mubr.msk.f32.mxu0 %vm5198_vm0, %v6403_v39 }
 0x49a   :  { %4677 = vmatpush3.bf16.msra.mxu1 %v5627_v3  ;;  %4522 = vmatprep.mubr.msk.f32.mxu1 %vm5198_vm0, %v6403_v39 }
 0x49b   :  { %4678 = vmatprep.subr.bf16.mxu1 %v6404_v7 }
 0x49c   :  { %4490 = vmatmul.mubr.msk.f32.gmra.mrb[8].mxu0 %vm162_vm1, %v153_v59 }
 0x49d   :  { %4533 = vmatprep.mubr.msk.f32.mxu0 %vm5198_vm0, %v6403_v39 }
 0x49e   :  { %4680 = vmatpush3.bf16.msra.mxu1 %v5633_v2 }
 0x49f   :  { %4687 = vmatprep.subr.bf16.mxu1 %v6404_v7 }
 0x4a1   :  { %4523 = vmatmul.mubr.msk.f32.vlgmr.msra.gmra.mrb[4].mxu1 %vm162_vm1, %v5409_v8 }
 0x4a2   :  { %4689 = vmatpush3.bf16.msra.mxu1 %v5560_v9  ;;  %4544 = vmatprep.mubr.msk.f32.mxu1 %vm5198_vm0, %v6403_v39 }
 0x4a3   :  { %4690 = vmatprep.subr.bf16.mxu1 %v6404_v7 }
 0x4a6   :  { %4692 = vmatpush3.bf16.msra.mxu1 %v5566_v15 }
 0x4a7   :  { %4699 = vmatprep.subr.bf16.mxu1 %v6404_v7 }
 0x4c9   :  { %v244_v41 = vpop.f32.mrb[0].mxu0 }
 0x4ca   :  { %v245_v51 = vadd.f32 %v5651_v11, %v244_v41  ;;  %v4479_v13 = vpop.f32.mrb[1].mxu0 }
 0x4cc   :  { %269 = vst.msk [vmem:[#allocation2] sm:$0xff] %vm268_vm10, %v245_v51 }
 0x4d3   :  { %v863_v57 = vld [vmem:[#allocation2] sm:$0xff] }
 0x56c   :  { %v947_v16 = vpop.f32.mrb[2].mxu1 }
 0x56d   :  { %v4513_v54 = vpop.f32.mrb[3].mxu1  ;;  %v951_v40 = vadd.f32 %v947_v16, %v863_v57 }
 0x574   :  { %v1022_v27 = vpop.f32.mrb[4].mxu1 }
 0x575   :  { %v1023_v56 = vadd.f32 %v5658_v1, %v1022_v27  ;;  %v4524_v0 = vpop.f32.mrb[5].mxu1 }
 0x577   :  { %1034 = vrot.lane.b32.xlu1 %v1023_v56, %s5202_s7  ;;  %v1026_v58 = vadd.f32 %v1023_v56, %v951_v40 }
 0x579   :  { %v4368_v4 = vmul.f32 -1.442695, %v1026_v58 }
 0x57b   :  { %4808 = vpow2.f32 %v4368_v4 }
 0x585   :  { %v4809_v46 = vpop.eup %4808 }
 0x586   :  { %v1030_v48 = vadd.f32 1.0, %v4809_v46 }
 0x588   :  { %4810 = vrcp.f32 %v1030_v48 }
 0x592   :  { %v4811_v6 = vpop.eup %4810 }
 0x593   :  { %v1044_v53 = vsub.f32 1.0, %v4811_v6 }
 0x5e9   :  { %v1035_v50 = vpop.permute.xlu1 %1034 }
 0x5ea   :  { %v1037_v34 = vmul.f32 %v4811_v6, %v1035_v50 }
 0x5ec   :  { %1039 = vrot.lane.b32.xlu0 %v1037_v34, %s5202_s7 }
 0x65e   :  { %v1040_v25 = vpop.permute.xlu0 %1039 }
 0x65f   :  { %v1042_v32 = vadd.f32 %v1040_v25, %v951_v40 }
 0x661   :  { %4812 = vtanh.f32 %v1042_v32 }
 0x66b   :  { %v4813_v44 = vpop.eup %4812 }
 0x66c   :  { %1046 = vrot.lane.b32.xlu0 %v4813_v44, %s5203_s25 }
 0x670   :  { %1050 = vrot.lane.b32.xlu0 %v5409_v8, %s5204_s12  ;;  %v249_v8 = vpop.f32.mrb[2].mxu0 }
 0x671   :  { %v250_v16 = vadd.f32 %v5651_v11, %v249_v8  ;;  %v4482_v54 = vpop.f32.mrb[3].mxu0 }
 0x672   :  { %v254_v27 = vpop.f32.mrb[4].mxu0 }
 0x673   :  { %270 = vst.msk [vmem:[#allocation2 + $0x8] sm:$0xff] %vm268_vm10, %v250_v16  ;;  %v255_v56 = vadd.f32 %v5651_v11, %v254_v27  ;;  %v4485_v0 = vpop.f32.mrb[5].mxu0 }
 0x674   :  { %v259_v57 = vpop.f32.mrb[6].mxu0 }
 0x675   :  { %271 = vst.msk [vmem:[#allocation2 + $0x10] sm:$0xff] %vm268_vm10, %v255_v56  ;;  %v260_v40 = vadd.f32 %v5651_v11, %v259_v57  ;;  %v4488_v58 = vpop.f32.mrb[7].mxu0 }
 0x676   :  { %v264_v4 = vpop.f32.mrb[8].mxu0 }
 0x677   :  { %272 = vst.msk [vmem:[#allocation2 + $0x18] sm:$0xff] %vm268_vm10, %v260_v40  ;;  %v265_v46 = vadd.f32 %v5651_v11, %v264_v4  ;;  %v4491_v48 = vpop.f32.mrb[9].mxu0 }
 0x679   :  { %273 = vst.msk [vmem:[#allocation2 + $0x20] sm:$0xff] %vm268_vm10, %v265_v46 }
 0x6de   :  { %v1047_v42 = vpop.permute.xlu0 %1046 }
 0x6df   :  { %v1049_v41 = vmul.f32 %v1047_v42, %v1044_v53 }
 0x6e2   :  { %v1051_v26 = vpop.permute.xlu0 %1050 }
 0x6e3   :  { %v1053_v51 = vmul.f32 %v4811_v6, %v1051_v26 }
 0x6e5   :  { %v5677_v13 = vadd.f32 %v1053_v51, %v1049_v41 }
 0x6e7   :  { %1097 = vrot.lane.b32.xlu0 %v5677_v13, %s5203_s25 }
 0x759   :  { %v1098_v6 = vpop.permute.xlu0 %1097 }
 0x75a   :  { %1100 = vst.msk [vmem:[#allocation15] sm:$0xff] %vm162_vm1, %v1098_v6  ;;  %4534 = vmatmul.mubr.msk.f32.vlgmr.msra.gmra.mrb[10].mxu0 %vm162_vm1, %v1098_v6 }
 0x75b   :  { %4695 = vmatpush3.bf16.msra.mxu0 %v5627_v3  ;;  %4555 = vmatprep.mubr.msk.f32.mxu0 %vm5198_vm0, %v6403_v39 }
 0x75c   :  { %4696 = vmatprep.subr.bf16.mxu0 %v6404_v7 }
 0x75f   :  { %4698 = vmatpush3.bf16.msra.mxu0 %v5633_v2 }
 0x760   :  { %4705 = vmatprep.subr.bf16.mxu0 %v6404_v7 }
 0x762   :  { %4556 = vmatmul.mubr.msk.f32.vlgmr.msra.gmra.mrb[12].mxu0 %vm162_vm1, %v1098_v6 }
 0x763   :  { %4707 = vmatpush3.bf16.msra.mxu0 %v5560_v9  ;;  %4577 = vmatprep.mubr.msk.f32.mxu0 %vm5198_vm0, %v6403_v39 }
 0x764   :  { %4708 = vmatprep.subr.bf16.mxu0 %v6404_v7 }
 0x767   :  { %4710 = vmatpush3.bf16.msra.mxu0 %v5566_v15 }
 0x768   :  { %4717 = vmatprep.subr.bf16.mxu0 %v6404_v7 }
 0x82d   :  { %v1169_v11 = vpop.f32.mrb[10].mxu0 }
 0x82e   :  { %v1182_v50 = vcombine.high %v1169_v11, %v1169_v11  ;;  %v1189_v34 = vrot.slane %v1169_v11, %v5420_v14  ;;  %v4535_v25 = vpop.f32.mrb[11].mxu0 }
 0x830   :  { %v1196_v32 = vrot.slane %v1182_v50, %v5420_v14  ;;  %v1197_v49 = vcombine.high %v1189_v34, %v1189_v34  ;;  %v1205_v20 = vrot.slane %v1189_v34, %v5420_v14 }
 0x832   :  { %v1198_v44 = vcombine.high %v1196_v32, %v1196_v32  ;;  %v1212_v63 = vrot.slane %v1196_v32, %v5420_v14  ;;  %v1219_v59 = vrot.slane %v1197_v49, %v5420_v14  ;;  %v1227_v42 = vcombine.high %v1205_v20, %v1205_v20 }
 0x833   :  { %v1234_v53 = vrot.slane %v1205_v20, %v5424_v19 }
 0x834   :  { %v1226_v26 = vrot.slane %v1198_v44, %v5420_v14  ;;  %v1229_v41 = vcombine.high %v1219_v59, %v1219_v59  ;;  %v1238_v51 = vrot.slane %v1219_v59, %v5424_v19  ;;  %v1228_v8 = vcombine.high %v1212_v63, %v1212_v63 }
 0x835   :  { %v1242_v16 = vrot.slane %v1227_v42, %v5424_v19  ;;  %v1250_v54 = vrot.slane %v1212_v63, %v5424_v19  ;;  %v1271_v27 = vadd.f32 %v1234_v53, %v5428_v23  ;;  %v5715_v56 = vpop.f32.mrb[12].mxu0 }
 0x836   :  { %v1230_v0 = vcombine.high %v1226_v26, %v1226_v26  ;;  %v1246_v57 = vrot.slane %v1229_v41, %v5424_v19  ;;  %v1254_v40 = vrot.slane %v1226_v26, %v5424_v19  ;;  %v4557_v58 = vpop.f32.mrb[13].mxu0  ;;  %v1272_v4 = vadd.f32 %v1238_v51, %v5433_v29 }
 0x837   :  { %v1273_v46 = vadd.f32 %v1242_v16, %v5435_v30  ;;  %4814 = vtanh.f32 %v1271_v27  ;;  %v1275_v11 = vadd.f32 %v1250_v54, %v5441_v36  ;;  %v1258_v23 = vrot.slane %v1228_v8, %v5424_v19 }
 0x838   :  { %v1262_v48 = vrot.slane %v1230_v0, %v5424_v19  ;;  %v1274_v6 = vadd.f32 %v1246_v57, %v5439_v35  ;;  %v1276_v50 = vadd.f32 %v1254_v40, %v5448_v43  ;;  %4816 = vtanh.f32 %v1272_v4 }
 0x839   :  { %4818 = vtanh.f32 %v1273_v46  ;;  %v1277_v29 = vadd.f32 %v1258_v23, %v5453_v47 }
 0x83a   :  { %v1278_v34 = vadd.f32 %v1262_v48, %v5459_v52  ;;  %4820 = vtanh.f32 %v1274_v6 }
 0x83b   :  { %4822 = vtanh.f32 %v1275_v11 }
 0x83c   :  { %4824 = vtanh.f32 %v1276_v50 }
 0x83d   :  { %4826 = vtanh.f32 %v1278_v34 }
 0x83e   :  { %4828 = vtanh.f32 %v1277_v29 }
 0x841   :  { %v4815_v30 = vpop.eup %4814 }
 0x842   :  { %v1287_v35 = vmul.f32 %v4815_v30, %v5466_v55  ;;  %v4817_v25 = vpop.eup %4816 }
 0x843   :  { %v4819_v36 = vpop.eup %4818  ;;  %v1288_v43 = vmul.f32 %v4817_v25, %v5466_v55 }
 0x844   :  { %v1295_v32 = vsel %vm162_vm1, %v1287_v35, 0.0  ;;  %v4821_v49 = vpop.eup %4820  ;;  %v1289_v47 = vmul.f32 %v4819_v36, %v5466_v55 }
 0x845   :  { %1296 = vadd.xlane.f32.xlu1 %v1295_v32  ;;  %v4823_v20 = vpop.eup %4822  ;;  %v1298_v52 = vsel %vm162_vm1, %v1288_v43, 0.0  ;;  %v1290_v44 = vmul.f32 %v4821_v49, %v5466_v55 }
 0x846   :  { %v4825_v63 = vpop.eup %4824  ;;  %1299 = vadd.xlane.f32.xlu0 %v1298_v52  ;;  %v1301_v26 = vsel %vm162_vm1, %v1289_v47, 0.0  ;;  %v1291_v41 = vmul.f32 %v4823_v20, %v5466_v55 }
 0x847   :  { %v1304_v59 = vsel %vm162_vm1, %v1290_v44, 0.0  ;;  %v1292_v42 = vmul.f32 %v4825_v63, %v5466_v55  ;;  %v4827_v53 = vpop.eup %4826 }
 0x848   :  { %v4829_v51 = vpop.eup %4828  ;;  %v1294_v16 = vmul.f32 %v4827_v53, %v5466_v55  ;;  %v1307_v54 = vsel %vm162_vm1, %v1291_v41, 0.0 }
 0x849   :  { %1305 = vadd.xlane.f32.xlu1 %v1304_v59  ;;  %v1310_v8 = vsel %vm162_vm1, %v1292_v42, 0.0  ;;  %v1293_v27 = vmul.f32 %v4829_v51, %v5466_v55 }
 0x84a   :  { %1302 = vadd.xlane.f32.xlu0 %v1301_v26  ;;  %v1316_v0 = vsel %vm162_vm1, %v1294_v16, 0.0 }
 0x84b   :  { %v1313_v57 = vsel %vm162_vm1, %v1293_v27, 0.0 }
 0x84d   :  { %1311 = vadd.xlane.f32.xlu1 %v1310_v8 }
 0x84e   :  { %1308 = vadd.xlane.f32.xlu0 %v1307_v54 }
 0x851   :  { %1317 = vadd.xlane.f32.xlu1 %v1316_v0 }
 0x852   :  { %1314 = vadd.xlane.f32.xlu0 %v1313_v57 }
 0x8d2   :  { %v1297_v40 = vpop.xlane.xlu1 %1296 }
 0x8d3   :  { %v1300_v58 = vpop.xlane.xlu0 %1299  ;;  %v1330_v48 = vrot.slane %v1297_v40, %v5486_v28 }
 0x8d4   :  { %v1334_v4 = vrot.slane %v1300_v58, %v5486_v28 }
 0x8d6   :  { %v1306_v46 = vpop.xlane.xlu1 %1305  ;;  %v1359_v23 = vsel %vm542_vm2, %v1334_v4, %v1330_v48 }
 0x8d7   :  { %v1303_v6 = vpop.xlane.xlu0 %1302  ;;  %v1342_v34 = vrot.slane %v1306_v46, %v5486_v28 }
 0x8d8   :  { %v1338_v11 = vrot.slane %v1303_v6, %v5486_v28 }
 0x8da   :  { %v1312_v55 = vpop.xlane.xlu1 %1311  ;;  %v1360_v50 = vsel %vm544_vm3, %v1338_v11, %v1359_v23 }
 0x8db   :  { %v1309_v29 = vpop.xlane.xlu0 %1308  ;;  %v1361_v35 = vsel %vm546_vm4, %v1342_v34, %v1360_v50  ;;  %v1350_v32 = vrot.slane %v1312_v55, %v5486_v28 }
 0x8dc   :  { %v1346_v30 = vrot.slane %v1309_v29, %v5486_v28 }
 0x8de   :  { %v1362_v25 = vsel %vm548_vm5, %v1346_v30, %v1361_v35  ;;  %v1318_v36 = vpop.xlane.xlu1 %1317 }
 0x8df   :  { %v1315_v43 = vpop.xlane.xlu0 %1314  ;;  %v1358_v20 = vrot.slane %v1318_v36, %v5486_v28  ;;  %v1363_v52 = vsel %vm550_vm6, %v1350_v32, %v1362_v25 }
 0x8e0   :  { %v1354_v49 = vrot.slane %v1315_v43, %v5486_v28 }
 0x8e2   :  { %v1364_v44 = vsel %vm552_vm7, %v1354_v49, %v1363_v52 }
 0x8e3   :  { %v1365_v47 = vsel %vm554_vm8, %v1358_v20, %v1364_v44 }
 0x8e4   :  { %v1367_v63 = vsel %vm557_vm9, %v1365_v47, -inf }
 0x8e5   :  { %1368 = vmax.xlane.f32.xlu0 %v1367_v63 }
 0x972   :  { %v1369_v59 = vpop.xlane.xlu0 %1368 }
 0x973   :  { %v1374_v42 = vrot.slane %v1369_v59, %v5424_v19  ;;  %v1378_v53 = vrot.slane %v1369_v59, %v5505_v60  ;;  %v1382_v26 = vrot.slane %v1369_v59, %v5508_v61  ;;  %v1390_v41 = vrot.slane %v1369_v59, %v5517_v10 }
 0x974   :  { %v1398_v51 = vrot.slane %v1369_v59, %v5525_v24  ;;  %v1386_v54 = vrot.slane %v1369_v59, %v5511_v62  ;;  %v1394_v23 = vrot.slane %v1369_v59, %v5521_v18  ;;  %v1402_v35 = vrot.slane %v1369_v59, %v5529_v31 }
 0x975   :  { %v1412_v8 = vsub.f32 %v1300_v58, %v1378_v53  ;;  %v1411_v16 = vsub.f32 %v1297_v40, %v1374_v42  ;;  %v1415_v27 = vsub.f32 %v1309_v29, %v1390_v41  ;;  %v1413_v0 = vsub.f32 %v1303_v6, %v1382_v26 }
 0x976   :  { %v1417_v11 = vsub.f32 %v1315_v43, %v1398_v51  ;;  %v1414_v34 = vsub.f32 %v1306_v46, %v1386_v54  ;;  %v1416_v58 = vsub.f32 %v1312_v55, %v1394_v23  ;;  %v1418_v29 = vsub.f32 %v1318_v36, %v1402_v35 }
 0x977   :  { %v1421_v57 = vmul.f32 1.442695, %v1412_v8  ;;  %v1419_v4 = vmul.f32 1.442695, %v1411_v16  ;;  %v1427_v48 = vmul.f32 1.442695, %v1415_v27 }
 0x978   :  { %v1423_v50 = vmul.f32 1.442695, %v1413_v0  ;;  %v1431_v30 = vmul.f32 1.442695, %v1417_v11  ;;  %v1425_v40 = vmul.f32 1.442695, %v1414_v34 }
 0x979   :  { %4830 = vpow2.f32 %v1421_v57  ;;  %v1429_v6 = vmul.f32 1.442695, %v1416_v58  ;;  %v1433_v43 = vmul.f32 1.442695, %v1418_v29  ;;  %v5786_v58 = vadd.f32 %v5658_v1, %v5715_v56 }
 0x97a   :  { %4832 = vpow2.f32 %v1419_v4 }
 0x97b   :  { %4834 = vpow2.f32 %v1427_v48 }
 0x97c   :  { %4836 = vpow2.f32 %v1423_v50 }
 0x97d   :  { %4838 = vpow2.f32 %v1431_v30 }
 0x97e   :  { %4840 = vpow2.f32 %v1425_v40 }
 0x97f   :  { %4842 = vpow2.f32 %v1429_v6 }
 0x980   :  { %4844 = vpow2.f32 %v1433_v43 }
 0x983   :  { %v4831_v25 = vpop.eup %4830 }
 0x984   :  { %v4833_v32 = vpop.eup %4832  ;;  %1447 = vperm.xlu0 %4773, %v4831_v25  }
 0x985   :  { %1444 = vperm.xlu1 %4772, %v4833_v32   ;;  %v4835_v49 = vpop.eup %4834 }
 0x986   :  { %v4837_v20 = vpop.eup %4836 }
 0x987   :  { %v4839_v46 = vpop.eup %4838 }
 0x988   :  { %1456 = vperm.xlu0 %4773, %v4835_v49   ;;  %v4841_v52 = vpop.eup %4840 }
 0x989   :  { %1450 = vperm.xlu1 %4772, %v4837_v20   ;;  %v4843_v55 = vpop.eup %4842 }
 0x98a   :  { %v4845_v44 = vpop.eup %4844 }
 0x98c   :  { %1462 = vperm.xlu0 %4773, %v4839_v46  }
 0x98d   :  { %1453 = vperm.xlu1 %4772, %v4841_v52  }
 0x991   :  { %1459 = vperm.xlu1 %4772, %v4843_v55  }
 0x995   :  { %1465 = vperm.xlu1 %4772, %v4845_v44  }
 0xa03   :  { %v1448_v47 = vpop.permute.xlu0 %1447 }
 0xa04   :  { %v1445_v36 = vpop.permute.xlu1 %1444  ;;  %v1474_v59 = vrot.slane %v1448_v47, %v5486_v28 }
 0xa05   :  { %v1470_v42 = vrot.slane %v1445_v36, %v5486_v28 }
 0xa07   :  { %v1457_v26 = vpop.permute.xlu0 %1456  ;;  %v1499_v51 = vsel %vm542_vm2, %v1474_v59, %v1470_v42 }
 0xa08   :  { %v1451_v63 = vpop.permute.xlu1 %1450  ;;  %v1486_v27 = vrot.slane %v1457_v26, %v5486_v28 }
 0xa09   :  { %v1478_v53 = vrot.slane %v1451_v63, %v5486_v28 }
 0xa0b   :  { %v1500_v16 = vsel %vm544_vm3, %v1478_v53, %v1499_v51  ;;  %v1463_v57 = vpop.permute.xlu0 %1462 }
 0xa0c   :  { %v1454_v41 = vpop.permute.xlu1 %1453  ;;  %v1494_v23 = vrot.slane %v1463_v57, %v5486_v28 }
 0xa0d   :  { %v1482_v8 = vrot.slane %v1454_v41, %v5486_v28 }
 0xa0f   :  { %v1501_v54 = vsel %vm546_vm4, %v1482_v8, %v1500_v16 }
 0xa10   :  { %v1460_v0 = vpop.permute.xlu1 %1459  ;;  %v1502_v48 = vsel %vm548_vm5, %v1486_v27, %v1501_v54 }
 0xa11   :  { %v1490_v4 = vrot.slane %v1460_v0, %v5486_v28 }
 0xa13   :  { %v1503_v11 = vsel %vm550_vm6, %v1490_v4, %v1502_v48 }
 0xa14   :  { %v1466_v50 = vpop.permute.xlu1 %1465  ;;  %v1504_v30 = vsel %vm552_vm7, %v1494_v23, %v1503_v11 }
 0xa15   :  { %v1498_v34 = vrot.slane %v1466_v50, %v5486_v28 }
 0xa17   :  { %v1505_v35 = vsel %vm554_vm8, %v1498_v34, %v1504_v30 }
 0xa18   :  { %v1507_v40 = vsel %vm557_vm9, %v1505_v35, 0.0 }
 0xa19   :  { %1508 = vadd.xlane.f32.xlu0 %v1507_v40 }
 0xa2f   :  { %1840 = vrot.lane.b32.xlu0 %v5786_v58, %s5202_s7 }
 0xaa6   :  { %v1509_v6 = vpop.xlane.xlu0 %1508 }
 0xaa7   :  { %4846 = vrcp.f32 %v1509_v6 }
 0xab1   :  { %v4847_v29 = vpop.eup %4846 }
 0xab2   :  { %v1515_v43 = vrot.slane %v4847_v29, %v5424_v19  ;;  %v1519_v47 = vrot.slane %v4847_v29, %v5505_v60  ;;  %v1523_v59 = vrot.slane %v4847_v29, %v5508_v61  ;;  %v1527_v1 = vrot.slane %v4847_v29, %v5511_v62 }
 0xab3   :  { %v1531_v53 = vrot.slane %v4847_v29, %v5517_v10  ;;  %v1535_v41 = vrot.slane %v4847_v29, %v5521_v18  ;;  %v1539_v51 = vrot.slane %v4847_v29, %v5525_v24  ;;  %v1543_v8 = vrot.slane %v4847_v29, %v5529_v31 }
 0xab4   :  { %v1552_v36 = vmul.f32 %v4833_v32, %v1515_v43  ;;  %v1553_v63 = vmul.f32 %v4831_v25, %v1519_v47  ;;  %v1554_v42 = vmul.f32 %v4837_v20, %v1523_v59  ;;  %v1555_v56 = vmul.f32 %v4841_v52, %v1527_v1 }
 0xab5   :  { %v1556_v26 = vmul.f32 %v4835_v49, %v1531_v53  ;;  %v1557_v32 = vmul.f32 %v4843_v55, %v1535_v41  ;;  %v1558_v25 = vmul.f32 %v4839_v46, %v1539_v51  ;;  %v1559_v20 = vmul.f32 %v4845_v44, %v1543_v8 }
 0xab6   :  { %1570 = vperm.xlu1 %4772, %v1552_v36  }
 0xaba   :  { %1575 = vperm.xlu1 %4772, %v1553_v63  }
 0xabe   :  { %1580 = vperm.xlu1 %4772, %v1554_v42  }
 0xac2   :  { %1585 = vperm.xlu1 %4772, %v1555_v56  }
 0xac6   :  { %1590 = vperm.xlu1 %4772, %v1556_v26  }
 0xaca   :  { %1595 = vperm.xlu1 %4772, %v1557_v32  }
 0xace   :  { %1600 = vperm.xlu1 %4772, %v1558_v25  }
 0xad2   :  { %1605 = vperm.xlu1 %4772, %v1559_v20  }
 0xb35   :  { %v1571_v16 = vpop.permute.xlu1 %1570 }
 0xb36   :  { %v1608_v27 = vmul.f32 %v1571_v16, %v5576_v21  ;;  %v1861_v47 = vrot.slane %v1571_v16, %v5486_v28 }
 0xb38   :  { %v1616_v57 = vsel %vm162_vm1, %v1608_v27, 0.0 }
 0xb39   :  { %v1576_v54 = vpop.permute.xlu1 %1575  ;;  %v1617_v11 = vrot.slane %v1616_v57, 4 }
 0xb3a   :  { %v1609_v52 = vmul.f32 %v1576_v54, %v5574_v17  ;;  %v1865_v36 = vrot.slane %v1576_v54, %v5486_v28 }
 0xb3c   :  { %v1623_v55 = vsel %vm162_vm1, %v1609_v52, 0.0  ;;  %v1890_v25 = vsel %vm542_vm2, %v1865_v36, %v1861_v47 }
 0xb3d   :  { %v1581_v49 = vpop.permute.xlu1 %1580  ;;  %v1624_v44 = vrot.slane %v1623_v55, 4 }
 0xb3e   :  { %v1610_v0 = vmul.f32 %v1581_v49, %v5578_v22  ;;  %v1618_v22 = vadd.f32 %v1617_v11, %v1616_v57  ;;  %v1869_v59 = vrot.slane %v1581_v49, %v5486_v28 }
 0xb3f   :  { %v1625_v30 = vadd.f32 %v1624_v44, %v1623_v55 }
 0xb40   :  { %v1630_v46 = vsel %vm162_vm1, %v1610_v0, 0.0  ;;  %v1619_v1 = vrot.slane %v1618_v22, 2  ;;  %v1891_v54 = vsel %vm544_vm3, %v1869_v59, %v1890_v25 }
 0xb41   :  { %v1586_v4 = vpop.permute.xlu1 %1585  ;;  %v1631_v23 = vrot.slane %v1630_v46, 4  ;;  %v1626_v63 = vrot.slane %v1625_v30, 2 }
 0xb42   :  { %v1611_v48 = vmul.f32 %v1586_v4, %v5583_v33  ;;  %v1873_v56 = vrot.slane %v1586_v4, %v5486_v28  ;;  %v1620_v49 = vadd.f32 %v1619_v1, %v1618_v22 }
 0xb43   :  { %v1632_v35 = vadd.f32 %v1631_v23, %v1630_v46  ;;  %v1627_v16 = vadd.f32 %v1626_v63, %v1625_v30 }
 0xb44   :  { %v1637_v50 = vsel %vm162_vm1, %v1611_v48, 0.0  ;;  %v1892_v55 = vsel %vm546_vm4, %v1873_v56, %v1891_v54 }
 0xb45   :  { %v1638_v17 = vrot.slane %v1637_v50, 4  ;;  %v1591_v34 = vpop.permute.xlu1 %1590 }
 0xb46   :  { %v1612_v21 = vmul.f32 %v1591_v34, %v5589_v45  ;;  %v1633_v45 = vrot.slane %v1632_v35, 2  ;;  %v1877_v41 = vrot.slane %v1591_v34, %v5486_v28  ;;  %v1628_v34 = vrot.slane %v1627_v16, 1 }
 0xb47   :  { %v1639_v6 = vadd.f32 %v1638_v17, %v1637_v50 }
 0xb48   :  { %v1644_v40 = vsel %vm162_vm1, %v1612_v21, 0.0  ;;  %v1634_v0 = vadd.f32 %v1633_v45, %v1632_v35  ;;  %v1893_v4 = vsel %vm548_vm5, %v1877_v41, %v1892_v55  ;;  %v6405_v55 = vld [vmem:[#allocation24_spill] sm:$0xff] }
 0xb49   :  { %v1645_v29 = vrot.slane %v1644_v40, 4  ;;  %v1596_v43 = vpop.permute.xlu1 %1595  ;;  %v1640_v26 = vrot.slane %v1639_v6, 2 }
 0xb4a   :  { %v1613_v33 = vmul.f32 %v1596_v43, %v5593_v37  ;;  %v1881_v8 = vrot.slane %v1596_v43, %v5486_v28  ;;  %v1635_v35 = vrot.slane %v1634_v0, 1 }
 0xb4b   :  { %v1646_v42 = vadd.f32 %v1645_v29, %v1644_v40  ;;  %v1641_v46 = vadd.f32 %v1640_v26, %v1639_v6  ;;  %v1621_v29 = vrot.slane %v1620_v49, 1 }
 0xb4c   :  { %v1651_v53 = vsel %vm162_vm1, %v1613_v33, 0.0  ;;  %v1636_v1 = vadd.f32 %v1635_v35, %v1634_v0 }
 0xb4d   :  { %v1652_v32 = vrot.slane %v1651_v53, 4  ;;  %v1601_v51 = vpop.permute.xlu1 %1600  ;;  %v1647_v37 = vrot.slane %v1646_v42, 2  ;;  %v1642_v43 = vrot.slane %v1641_v46, 1  ;;  %v1622_v45 = vadd.f32 %v1621_v29, %v1620_v49 }
 0xb4e   :  { %v1614_v20 = vmul.f32 %v1601_v51, %v5600_v12  ;;  %v1885_v27 = vrot.slane %v1601_v51, %v5486_v28  ;;  %v1894_v12 = vsel %vm550_vm6, %v1881_v8, %v1893_v4 }
 0xb4f   :  { %v1653_v52 = vadd.f32 %v1652_v32, %v1651_v53  ;;  %v1648_v23 = vadd.f32 %v1647_v37, %v1646_v42  ;;  %v1643_v56 = vadd.f32 %v1642_v43, %v1641_v46 }
 0xb50   :  { %v1658_v57 = vsel %vm162_vm1, %v1614_v20, 0.0  ;;  %v1895_v22 = vsel %vm552_vm7, %v1885_v27, %v1894_v12 }
 0xb51   :  { %v1654_v48 = vrot.slane %v1653_v52, 2  ;;  %v1659_v44 = vrot.slane %v1658_v57, 4  ;;  %v1606_v11 = vpop.permute.xlu1 %1605  ;;  %v1649_v47 = vrot.slane %v1648_v23, 1 }
 0xb52   :  { %v1615_v50 = vmul.f32 %v1606_v11, %v5610_v38  ;;  %v1889_v17 = vrot.slane %v1606_v11, %v5486_v28  ;;  %v1629_v38 = vadd.f32 %v1628_v34, %v1627_v16 }
 0xb53   :  { %v1655_v21 = vadd.f32 %v1654_v48, %v1653_v52  ;;  %v1660_v30 = vadd.f32 %v1659_v44, %v1658_v57  ;;  %v1650_v41 = vadd.f32 %v1649_v47, %v1648_v23  ;;  %v1673_v57 = vld [vmem:[#allocation2 + $0x8] sm:$0xff] }
 0xb54   :  { %v1665_v40 = vsel %vm162_vm1, %v1615_v50, 0.0  ;;  %v1896_v6 = vsel %vm554_vm8, %v1889_v17, %v1895_v22  ;;  %v1682_v32 = vsel %vm542_vm2, %v1629_v38, %v1622_v45  ;;  %v1841_v17 = vpop.permute.xlu0 %1840 }
 0xb55   :  { %v1661_v36 = vrot.slane %v1660_v30, 2  ;;  %v1666_v33 = vrot.slane %v1665_v40, 4  ;;  %1899 = vst.msk [vmem:[#allocation16 + $0x8] sm:$0xff] %vm557_vm9, %v1896_v6  ;;  %v1656_v63 = vrot.slane %v1655_v21, 1  ;;  %v1683_v37 = vsel %vm544_vm3, %v1636_v1, %v1682_v32  ;;  %v5877_v32 = vld [vmem:[#allocation8 + $0x10] sm:$0xff] }
 0xb56   :  { %v1684_v20 = vsel %vm546_vm4, %v1643_v56, %v1683_v37 }
 0xb57   :  { %v1662_v59 = vadd.f32 %v1661_v36, %v1660_v30  ;;  %v1667_v42 = vadd.f32 %v1666_v33, %v1665_v40  ;;  %v1657_v51 = vadd.f32 %v1656_v63, %v1655_v21  ;;  %v1685_v16 = vsel %vm548_vm5, %v1650_v41, %v1684_v20  ;;  %v5875_v41 = vld [vmem:[#allocation8 + $0x8] sm:$0xff]  ;;  %v5881_v20 = vld [vmem:[#allocation8 + $0x18] sm:$0xff] }
 0xb59   :  { %v1663_v53 = vrot.slane %v1662_v59, 1  ;;  %v1668_v26 = vrot.slane %v1667_v42, 2  ;;  %v1686_v27 = vsel %vm550_vm6, %v1657_v51, %v1685_v16 }
 0xb5b   :  { %v1669_v25 = vadd.f32 %v1668_v26, %v1667_v42  ;;  %v1664_v8 = vadd.f32 %v1663_v53, %v1662_v59  ;;  %v5870_v42 = vld [vmem:[#allocation8] sm:$0xff] }
 0xb5d   :  { %v1670_v54 = vrot.slane %v1669_v25, 1  ;;  %v1687_v49 = vsel %vm552_vm7, %v1664_v8, %v1686_v27 }
 0xb5f   :  { %v1671_v52 = vadd.f32 %v1670_v54, %v1669_v25  ;;  %v5883_v54 = vld [vmem:[#allocation8 + $0x20] sm:$0xff] }
 0xb61   :  { %v1688_v0 = vsel %vm554_vm8, %v1671_v52, %v1687_v49 }
 0xb62   :  { %4545 = vmatmul.mubr.msk.f32.vlgmr.msra.gmra.mrb[6].mxu1 %vm162_vm1, %v1688_v0  ;;  %v5890_v0 = vld [vmem:[#allocation8 + $0x28] sm:$0xff] }
 0xb63   :  { %4701 = vmatpush3.bf16.msra.mxu1 %v5399_v5  ;;  %4566 = vmatprep.mubr.msk.f32.mxu1 %vm5198_vm0, %v6403_v39 }
 0xb64   :  { %4702 = vmatprep.subr.bf16.mxu1 %v6404_v7 }
 0xb67   :  { %4704 = vmatpush3.bf16.msra.mxu1 %v6405_v55 }
 0xb68   :  { %4711 = vmatprep.subr.bf16.mxu1 %v6404_v7 }
 0xc35   :  { %v1757_v46 = vpop.f32.mrb[6].mxu1 }
 0xc36   :  { %v1761_v4 = vadd.f32 %v1757_v46, %v1673_v57  ;;  %v4546_v48 = vpop.f32.mrb[7].mxu1 }
 0xc38   :  { %v1832_v44 = vadd.f32 %v5786_v58, %v1761_v4 }
 0xc3a   :  { %v4372_v11 = vmul.f32 -1.442695, %v1832_v44 }
 0xc3c   :  { %4848 = vpow2.f32 %v4372_v11 }
 0xc46   :  { %v4849_v23 = vpop.eup %4848 }
 0xc47   :  { %v1836_v12 = vadd.f32 1.0, %v4849_v23 }
 0xc49   :  { %4850 = vrcp.f32 %v1836_v12  ;;  %v5897_v12 = vld [vmem:[#allocation8 + $0x30] sm:$0xff] }
 0xc53   :  { %v4851_v50 = vpop.eup %4850 }
 0xc54   :  { %v1843_v34 = vmul.f32 %v4851_v50, %v1841_v17  ;;  %v1850_v35 = vsub.f32 1.0, %v4851_v50  ;;  %v1856_v58 = vmul.f32 %v4851_v50, %v5677_v13 }
 0xc56   :  { %1845 = vrot.lane.b32.xlu1 %v1843_v34, %s5202_s7 }
 0xcc8   :  { %v1846_v21 = vpop.permute.xlu1 %1845 }
 0xcc9   :  { %v1848_v30 = vadd.f32 %v1846_v21, %v1761_v4 }
 0xccb   :  { %4852 = vtanh.f32 %v1848_v30  ;;  %v5903_v30 = vld [vmem:[#allocation8 + $0x38] sm:$0xff] }
 0xcd5   :  { %v4853_v22 = vpop.eup %4852 }
 0xcd6   :  { %1852 = vrot.lane.b32.xlu1 %v4853_v22, %s5203_s25 }
 0xd48   :  { %v1853_v40 = vpop.permute.xlu1 %1852 }
 0xd49   :  { %v1855_v6 = vmul.f32 %v1853_v40, %v1850_v35 }
 0xd4b   :  { %v5848_v29 = vadd.f32 %v1856_v58, %v1855_v6  ;;  %v5910_v58 = vld [vmem:[%s6383_s5] ss:$0 sm:$0xff] }
 0xd4d   :  { %1901 = vrot.lane.b32.xlu1 %v5848_v29, %s5203_s25 }
 0xdbf   :  { %v1902_v43 = vpop.permute.xlu1 %1901 }
 0xdc0   :  { %1905 = vst.msk [vmem:[#allocation15 + $0x8] sm:$0xff] %vm162_vm1, %v1902_v43  ;;  %4567 = vmatmul.mubr.msk.f32.vlgmr.msra.gmra.mrb[8].mxu1 %vm162_vm1, %v1902_v43 }
 0xdc1   :  { %4713 = vmatpush3.bf16.msra.mxu1 %v5627_v3  ;;  %4588 = vmatprep.mubr.msk.f32.mxu1 %vm5198_vm0, %v6403_v39 }
 0xdc2   :  { %4714 = vmatprep.subr.bf16.mxu1 %v6404_v7 }
 0xdc5   :  { %4716 = vmatpush3.bf16.msra.mxu1 %v5633_v2 }
 0xdc6   :  { %4723 = vmatprep.subr.bf16.mxu1 %v6404_v7 }
 0xdc8   :  { %4589 = vmatmul.mubr.msk.f32.vlgmr.msra.gmra.mrb[10].mxu1 %vm162_vm1, %v1902_v43 }
 0xdc9   :  { %4725 = vmatpush3.bf16.msra.mxu1 %v5560_v9  ;;  %4610 = vmatprep.mubr.msk.f32.mxu1 %vm5198_vm0, %v6403_v39 }
 0xdca   :  { %4726 = vmatprep.subr.bf16.mxu1 %v6404_v7 }
 0xdcd   :  { %4728 = vmatpush3.bf16.msra.mxu1 %v5566_v15 }
 0xdce   :  { %4735 = vmatprep.subr.bf16.mxu1 %v6404_v7 }
 0xe93   :  { %v1974_v13 = vpop.f32.mrb[8].mxu1 }
 0xe94   :  { %v1987_v36 = vcombine.high %v1974_v13, %v1974_v13  ;;  %v1994_v33 = vrot.slane %v1974_v13, %v5420_v14  ;;  %v4568_v47 = vpop.f32.mrb[9].mxu1 }
 0xe96   :  { %v2001_v38 = vrot.slane %v1987_v36, %v5420_v14  ;;  %v2002_v63 = vcombine.high %v1994_v33, %v1994_v33  ;;  %v2010_v59 = vrot.slane %v1994_v33, %v5420_v14 }
 0xe98   :  { %v2003_v1 = vcombine.high %v2001_v38, %v2001_v38  ;;  %v2017_v45 = vrot.slane %v2001_v38, %v5420_v14  ;;  %v2024_v56 = vrot.slane %v2002_v63, %v5420_v14  ;;  %v2032_v53 = vcombine.high %v2010_v59, %v2010_v59 }
 0xe99   :  { %v2039_v26 = vrot.slane %v2010_v59, %v5424_v19 }
 0xe9a   :  { %v2031_v51 = vrot.slane %v2003_v1, %v5420_v14  ;;  %v2033_v25 = vcombine.high %v2017_v45, %v2017_v45  ;;  %v2034_v37 = vcombine.high %v2024_v56, %v2024_v56  ;;  %v2043_v8 = vrot.slane %v2024_v56, %v5424_v19 }
 0xe9b   :  { %v2047_v16 = vrot.slane %v2032_v53, %v5424_v19  ;;  %v2055_v52 = vrot.slane %v2017_v45, %v5424_v19  ;;  %v2076_v27 = vadd.f32 %v2039_v26, %v5870_v42  ;;  %v5888_v49 = vpop.f32.mrb[10].mxu1 }
 0xe9c   :  { %v2035_v57 = vcombine.high %v2031_v51, %v2031_v51  ;;  %v2051_v46 = vrot.slane %v2034_v37, %v5424_v19  ;;  %v2059_v4 = vrot.slane %v2031_v51, %v5424_v19  ;;  %v4590_v48 = vpop.f32.mrb[11].mxu1  ;;  %v2063_v44 = vrot.slane %v2033_v25, %v5424_v19 }
 0xe9d   :  { %v2077_v11 = vadd.f32 %v2043_v8, %v5875_v41  ;;  %v2078_v23 = vadd.f32 %v2047_v16, %v5877_v32  ;;  %4854 = vtanh.f32 %v2076_v27  ;;  %v2080_v17 = vadd.f32 %v2055_v52, %v5883_v54 }
 0xe9e   :  { %v2079_v50 = vadd.f32 %v2051_v46, %v5881_v20  ;;  %v2067_v34 = vrot.slane %v2035_v57, %v5424_v19  ;;  %v2081_v21 = vadd.f32 %v2059_v4, %v5890_v0  ;;  %v2082_v22 = vadd.f32 %v2063_v44, %v5897_v12 }
 0xe9f   :  { %4856 = vtanh.f32 %v2077_v11 }
 0xea0   :  { %4858 = vtanh.f32 %v2078_v23  ;;  %v2083_v35 = vadd.f32 %v2067_v34, %v5903_v30 }
 0xea1   :  { %4860 = vtanh.f32 %v2079_v50 }
 0xea2   :  { %4862 = vtanh.f32 %v2080_v17 }
 0xea3   :  { %4864 = vtanh.f32 %v2081_v21 }
 0xea4   :  { %4866 = vtanh.f32 %v2082_v22 }
 0xea5   :  { %4868 = vtanh.f32 %v2083_v35 }
 0xea7   :  { %v4855_v40 = vpop.eup %4854 }
 0xea8   :  { %v2092_v6 = vmul.f32 %v5910_v58, %v4855_v40 }
 0xea9   :  { %v4857_v43 = vpop.eup %4856 }
 0xeaa   :  { %v4859_v13 = vpop.eup %4858  ;;  %v2100_v36 = vsel %vm162_vm1, %v2092_v6, 0.0  ;;  %v2093_v33 = vmul.f32 %v5910_v58, %v4857_v43 }
 0xeab   :  { %v4861_v47 = vpop.eup %4860  ;;  %2101 = vadd.xlane.f32.xlu1 %v2100_v36  ;;  %v2094_v38 = vmul.f32 %v5910_v58, %v4859_v13 }
 0xeac   :  { %v4863_v63 = vpop.eup %4862  ;;  %v2103_v59 = vsel %vm162_vm1, %v2093_v33, 0.0  ;;  %v2095_v1 = vmul.f32 %v5910_v58, %v4861_v47 }
 0xead   :  { %v4865_v45 = vpop.eup %4864  ;;  %2104 = vadd.xlane.f32.xlu0 %v2103_v59  ;;  %v2106_v56 = vsel %vm162_vm1, %v2094_v38, 0.0  ;;  %v2096_v53 = vmul.f32 %v5910_v58, %v4863_v63 }
 0xeae   :  { %v4867_v26 = vpop.eup %4866  ;;  %v2109_v51 = vsel %vm162_vm1, %v2095_v1, 0.0  ;;  %v2097_v25 = vmul.f32 %v5910_v58, %v4865_v45 }
 0xeaf   :  { %2107 = vadd.xlane.f32.xlu1 %v2106_v56  ;;  %v4869_v37 = vpop.eup %4868  ;;  %v2112_v8 = vsel %vm162_vm1, %v2096_v53, 0.0  ;;  %v2098_v16 = vmul.f32 %v5910_v58, %v4867_v26 }
 0xeb0   :  { %v2115_v52 = vsel %vm162_vm1, %v2097_v25, 0.0  ;;  %v2099_v27 = vmul.f32 %v5910_v58, %v4869_v37 }
 0xeb1   :  { %2110 = vadd.xlane.f32.xlu0 %v2109_v51  ;;  %v2118_v57 = vsel %vm162_vm1, %v2098_v16, 0.0 }
 0xeb2   :  { %v2121_v46 = vsel %vm162_vm1, %v2099_v27, 0.0 }
 0xeb3   :  { %2113 = vadd.xlane.f32.xlu1 %v2112_v8 }
 0xeb5   :  { %2116 = vadd.xlane.f32.xlu0 %v2115_v52 }
 0xeb7   :  { %2119 = vadd.xlane.f32.xlu1 %v2118_v57 }
 0xeb9   :  { %2122 = vadd.xlane.f32.xlu0 %v2121_v46 }
 0xf38   :  { %v2102_v4 = vpop.xlane.xlu1 %2101 }
 0xf39   :  { %v2135_v44 = vrot.slane %v2102_v4, %v5486_v28 }
 0xf3a   :  { %v2105_v48 = vpop.xlane.xlu0 %2104 }
 0xf3b   :  { %v2139_v11 = vrot.slane %v2105_v48, %v5486_v28 }
 0xf3c   :  { %v2108_v23 = vpop.xlane.xlu1 %2107 }
 0xf3d   :  { %v2164_v50 = vsel %vm542_vm2, %v2139_v11, %v2135_v44  ;;  %v2143_v17 = vrot.slane %v2108_v23, %v5486_v28 }
 0xf3e   :  { %v2111_v34 = vpop.xlane.xlu0 %2110 }
 0xf3f   :  { %v2165_v21 = vsel %vm544_vm3, %v2143_v17, %v2164_v50  ;;  %v2147_v22 = vrot.slane %v2111_v34, %v5486_v28 }
 0xf40   :  { %v2114_v35 = vpop.xlane.xlu1 %2113 }
 0xf41   :  { %v2166_v40 = vsel %vm546_vm4, %v2147_v22, %v2165_v21  ;;  %v2151_v6 = vrot.slane %v2114_v35, %v5486_v28 }
 0xf42   :  { %v2117_v43 = vpop.xlane.xlu0 %2116 }
 0xf43   :  { %v2167_v13 = vsel %vm548_vm5, %v2151_v6, %v2166_v40  ;;  %v2155_v36 = vrot.slane %v2117_v43, %v5486_v28 }
 0xf44   :  { %v2120_v33 = vpop.xlane.xlu1 %2119 }
 0xf45   :  { %v2159_v47 = vrot.slane %v2120_v33, %v5486_v28  ;;  %v2168_v38 = vsel %vm550_vm6, %v2155_v36, %v2167_v13 }
 0xf46   :  { %v2123_v63 = vpop.xlane.xlu0 %2122 }
 0xf47   :  { %v2163_v59 = vrot.slane %v2123_v63, %v5486_v28  ;;  %v2169_v1 = vsel %vm552_vm7, %v2159_v47, %v2168_v38 }
 0xf49   :  { %v2170_v45 = vsel %vm554_vm8, %v2163_v59, %v2169_v1 }
 0xf4a   :  { %v2172_v56 = vsel %vm557_vm9, %v2170_v45, -inf }
 0xf4b   :  { %2173 = vmax.xlane.f32.xlu1 %v2172_v56 }
 0xfd8   :  { %v2174_v53 = vpop.xlane.xlu1 %2173 }
 0xfd9   :  { %v2179_v26 = vrot.slane %v2174_v53, %v5424_v19  ;;  %v2183_v51 = vrot.slane %v2174_v53, %v5505_v60  ;;  %v2187_v25 = vrot.slane %v2174_v53, %v5508_v61  ;;  %v2191_v37 = vrot.slane %v2174_v53, %v5511_v62 }
 0xfda   :  { %v2199_v8 = vrot.slane %v2174_v53, %v5521_v18  ;;  %v2195_v57 = vrot.slane %v2174_v53, %v5517_v10  ;;  %v2207_v50 = vrot.slane %v2174_v53, %v5529_v31  ;;  %v2203_v22 = vrot.slane %v2174_v53, %v5525_v24 }
 0xfdb   :  { %v2216_v16 = vsub.f32 %v2102_v4, %v2179_v26  ;;  %v2217_v52 = vsub.f32 %v2105_v48, %v2183_v51  ;;  %v2219_v27 = vsub.f32 %v2111_v34, %v2191_v37  ;;  %v2218_v46 = vsub.f32 %v2108_v23, %v2187_v25 }
 0xfdc   :  { %v2221_v17 = vsub.f32 %v2117_v43, %v2199_v8  ;;  %v2220_v40 = vsub.f32 %v2114_v35, %v2195_v57  ;;  %v2223_v13 = vsub.f32 %v2123_v63, %v2207_v50  ;;  %v2222_v48 = vsub.f32 %v2120_v33, %v2203_v22 }
 0xfdd   :  { %v2224_v44 = vmul.f32 1.442695, %v2216_v16  ;;  %v2226_v11 = vmul.f32 1.442695, %v2217_v52  ;;  %v2230_v21 = vmul.f32 1.442695, %v2219_v27 }
 0xfde   :  { %v2228_v6 = vmul.f32 1.442695, %v2218_v46  ;;  %v2234_v4 = vmul.f32 1.442695, %v2221_v17  ;;  %v2232_v34 = vmul.f32 1.442695, %v2220_v40 }
 0xfdf   :  { %4870 = vpow2.f32 %v2224_v44  ;;  %v2238_v23 = vmul.f32 1.442695, %v2223_v13  ;;  %v2236_v36 = vmul.f32 1.442695, %v2222_v48 }
 0xfe0   :  { %4872 = vpow2.f32 %v2226_v11 }
 0xfe1   :  { %4874 = vpow2.f32 %v2230_v21 }
 0xfe2   :  { %4876 = vpow2.f32 %v2228_v6 }
 0xfe3   :  { %4878 = vpow2.f32 %v2234_v4 }
 0xfe4   :  { %4880 = vpow2.f32 %v2232_v34 }
 0xfe5   :  { %4882 = vpow2.f32 %v2238_v23 }
 0xfe6   :  { %4884 = vpow2.f32 %v2236_v36 }
 0xfe9   :  { %v4871_v47 = vpop.eup %4870 }
 0xfea   :  { %v4873_v38 = vpop.eup %4872  ;;  %2249 = vperm.xlu0 %4773, %v4871_v47  }
 0xfeb   :  { %2252 = vperm.xlu1 %4772, %v4873_v38   ;;  %v4875_v43 = vpop.eup %4874 }
 0xfec   :  { %v4877_v35 = vpop.eup %4876 }
 0xfed   :  { %v4879_v63 = vpop.eup %4878 }
 0xfee   :  { %2258 = vperm.xlu0 %4773, %v4875_v43   ;;  %v4881_v59 = vpop.eup %4880 }
 0xfef   :  { %2255 = vperm.xlu1 %4772, %v4877_v35   ;;  %v4883_v33 = vpop.eup %4882 }
 0xff0   :  { %v4885_v1 = vpop.eup %4884 }
 0xff2   :  { %2264 = vperm.xlu0 %4773, %v4879_v63  }
 0xff3   :  { %2261 = vperm.xlu1 %4772, %v4881_v59  }
 0xff6   :  { %2270 = vperm.xlu0 %4773, %v4883_v33  }
 0xff7   :  { %2267 = vperm.xlu1 %4772, %v4885_v1  }
0x1069   :  { %v2250_v45 = vpop.permute.xlu0 %2249 }
0x106a   :  { %v2253_v56 = vpop.permute.xlu1 %2252  ;;  %v2275_v26 = vrot.slane %v2250_v45, %v5486_v28 }
0x106b   :  { %v2279_v53 = vrot.slane %v2253_v56, %v5486_v28 }
0x106d   :  { %v2259_v51 = vpop.permute.xlu0 %2258  ;;  %v2304_v8 = vsel %vm542_vm2, %v2279_v53, %v2275_v26 }
0x106e   :  { %v2256_v25 = vpop.permute.xlu1 %2255  ;;  %v2287_v16 = vrot.slane %v2259_v51, %v5486_v28 }
0x106f   :  { %v2283_v37 = vrot.slane %v2256_v25, %v5486_v28 }
0x1071   :  { %v2305_v52 = vsel %vm544_vm3, %v2283_v37, %v2304_v8  ;;  %v2265_v27 = vpop.permute.xlu0 %2264 }
0x1072   :  { %v2262_v57 = vpop.permute.xlu1 %2261  ;;  %v2306_v44 = vsel %vm546_vm4, %v2287_v16, %v2305_v52  ;;  %v2295_v11 = vrot.slane %v2265_v27, %v5486_v28 }
0x1073   :  { %v2291_v46 = vrot.slane %v2262_v57, %v5486_v28 }
0x1075   :  { %v2307_v50 = vsel %vm548_vm5, %v2291_v46, %v2306_v44  ;;  %v2271_v17 = vpop.permute.xlu0 %2270  ;;  %v5987_v46 = vld [vmem:[#allocation6 + $0x8] sm:$0xff]  ;;  %v5989_v44 = vld [vmem:[#allocation6] sm:$0xff] }
0x1076   :  { %v2268_v21 = vpop.permute.xlu1 %2267  ;;  %v2303_v22 = vrot.slane %v2271_v17, %v5486_v28  ;;  %v2308_v6 = vsel %vm550_vm6, %v2295_v11, %v2307_v50  ;;  %6406 = vst [vmem:[#allocation24_spill] sm:$0xff] %v5989_v44 }
0x1077   :  { %v2299_v40 = vrot.slane %v2268_v21, %v5486_v28 }
0x1079   :  { %v2309_v13 = vsel %vm552_vm7, %v2299_v40, %v2308_v6 }
0x107a   :  { %v2310_v4 = vsel %vm554_vm8, %v2303_v22, %v2309_v13 }
0x107b   :  { %v2312_v48 = vsel %vm557_vm9, %v2310_v4, 0.0 }
0x107c   :  { %2313 = vadd.xlane.f32.xlu1 %v2312_v48 }
0x1109   :  { %v2314_v34 = vpop.xlane.xlu1 %2313 }
0x110a   :  { %4886 = vrcp.f32 %v2314_v34  ;;  %v6002_v34 = vld [vmem:[#allocation6 + $0x20] sm:$0xff] }
0x110b   :  { %6409 = vst [vmem:[#allocation27_spill] sm:$0xff] %v6002_v34 }
0x1114   :  { %v4887_v23 = vpop.eup %4886 }
0x1115   :  { %v2320_v36 = vrot.slane %v4887_v23, %v5424_v19  ;;  %v2324_v56 = vrot.slane %v4887_v23, %v5505_v60  ;;  %v2328_v26 = vrot.slane %v4887_v23, %v5508_v61  ;;  %v2332_v25 = vrot.slane %v4887_v23, %v5511_v62 }
0x1116   :  { %v2336_v8 = vrot.slane %v4887_v23, %v5517_v10  ;;  %v2340_v52 = vrot.slane %v4887_v23, %v5521_v18  ;;  %v2344_v27 = vrot.slane %v4887_v23, %v5525_v24  ;;  %v2348_v57 = vrot.slane %v4887_v23, %v5529_v31 }
0x1117   :  { %v2357_v45 = vmul.f32 %v4871_v47, %v2320_v36  ;;  %v2358_v53 = vmul.f32 %v4873_v38, %v2324_v56  ;;  %v2359_v51 = vmul.f32 %v4877_v35, %v2328_v26  ;;  %v2360_v37 = vmul.f32 %v4875_v43, %v2332_v25  ;;  %v5979_v43 = vld [vmem:[%s6387_s9 + $0x1] ss:$0 sm:$0xff]  ;;  %v6006_v25 = vld [vmem:[#allocation6 + $0x28] sm:$0xff] }
0x1118   :  { %v2361_v16 = vmul.f32 %v4881_v59, %v2336_v8  ;;  %v2362_v47 = vmul.f32 %v4879_v63, %v2340_v52  ;;  %v2363_v38 = vmul.f32 %v4885_v1, %v2344_v27  ;;  %v2364_v35 = vmul.f32 %v4883_v33, %v2348_v57  ;;  %v5991_v33 = vld [vmem:[#allocation6 + $0x10] sm:$0xff]  ;;  %6410 = vst [vmem:[#allocation28_spill] sm:$0xff] %v6006_v25 }
0x1119   :  { %2375 = vperm.xlu0 %4773, %v2357_v45   ;;  %v5983_v59 = vadd.f32 %v5979_v43, %v5888_v49  ;;  %6407 = vst [vmem:[#allocation25_spill] sm:$0xff] %v5991_v33  ;;  %v5996_v49 = vld [vmem:[#allocation6 + $0x18] sm:$0xff] }
0x111a   :  { %6408 = vst [vmem:[#allocation26_spill] sm:$0xff] %v5996_v49 }
0x111d   :  { %2380 = vperm.xlu0 %4773, %v2358_v53  }
0x1121   :  { %2385 = vperm.xlu0 %4773, %v2359_v51  }
0x1125   :  { %2390 = vperm.xlu0 %4773, %v2360_v37  }
0x1129   :  { %2395 = vperm.xlu0 %4773, %v2361_v16  }
0x112d   :  { %2400 = vperm.xlu0 %4773, %v2362_v47  }
0x1131   :  { %2405 = vperm.xlu0 %4773, %v2363_v38  }
0x1135   :  { %2410 = vperm.xlu0 %4773, %v2364_v35  }
0x1139   :  { %2645 = vrot.lane.b32.xlu0 %v5983_v59, %s5202_s7 }
0x1198   :  { %v2376_v63 = vpop.permute.xlu0 %2375 }
0x1199   :  { %v2413_v50 = vmul.f32 %v2376_v63, %v5989_v44  ;;  %v2666_v35 = vrot.slane %v2376_v63, %v5486_v28 }
0x119b   :  { %v2421_v40 = vsel %vm162_vm1, %v2413_v50, 0.0 }
0x119c   :  { %v2381_v1 = vpop.permute.xlu0 %2380  ;;  %v2422_v23 = vrot.slane %v2421_v40, 4 }
0x119d   :  { %v2414_v11 = vmul.f32 %v2381_v1, %v5987_v46  ;;  %v2670_v38 = vrot.slane %v2381_v1, %v5486_v28 }
0x119e   :  { %v2423_v37 = vadd.f32 %v2422_v23, %v2421_v40 }
0x119f   :  { %v2428_v22 = vsel %vm162_vm1, %v2414_v11, 0.0 }
0x11a0   :  { %v2386_v17 = vpop.permute.xlu0 %2385  ;;  %v2429_v48 = vrot.slane %v2428_v22, 4 }
0x11a1   :  { %v2415_v21 = vmul.f32 %v2386_v17, %v5991_v33  ;;  %v2674_v50 = vrot.slane %v2386_v17, %v5486_v28 }
0x11a2   :  { %v2430_v51 = vadd.f32 %v2429_v48, %v2428_v22  ;;  %v6013_v22 = vld [vmem:[#allocation6 + $0x30] sm:$0xff] }
0x11a3   :  { %v2435_v6 = vsel %vm162_vm1, %v2415_v21, 0.0  ;;  %6411 = vst [vmem:[#allocation29_spill] sm:$0xff] %v6013_v22 }
0x11a4   :  { %v2391_v13 = vpop.permute.xlu0 %2390  ;;  %v2436_v36 = vrot.slane %v2435_v6, 4  ;;  %v2431_v11 = vrot.slane %v2430_v51, 2 }
0x11a5   :  { %v2416_v4 = vmul.f32 %v2391_v13, %v5996_v49 }
0x11a6   :  { %v2437_v8 = vadd.f32 %v2436_v36, %v2435_v6  ;;  %v2678_v6 = vrot.slane %v2391_v13, %v5486_v28 }
0x11a7   :  { %v2442_v45 = vsel %vm162_vm1, %v2416_v4, 0.0  ;;  %v2424_v4 = vrot.slane %v2423_v37, 2 }
0x11a8   :  { %v2443_v56 = vrot.slane %v2442_v45, 4  ;;  %v2396_v53 = vpop.permute.xlu0 %2395  ;;  %v2438_v40 = vrot.slane %v2437_v8, 2 }
0x11a9   :  { %v2417_v26 = vmul.f32 %v2396_v53, %v6002_v34  ;;  %v2682_v36 = vrot.slane %v2396_v53, %v5486_v28  ;;  %v6023_v34 = vld [vmem:[#allocation6 + $0x38] sm:$0xff] }
0x11aa   :  { %v2444_v52 = vadd.f32 %v2443_v56, %v2442_v45  ;;  %v2695_v56 = vsel %vm542_vm2, %v2670_v38, %v2666_v35  ;;  %v2439_v49 = vadd.f32 %v2438_v40, %v2437_v8 }
0x11ab   :  { %v2449_v16 = vsel %vm162_vm1, %v2417_v26, 0.0 }
0x11ac   :  { %v2450_v47 = vrot.slane %v2449_v16, 4  ;;  %v2401_v27 = vpop.permute.xlu0 %2400  ;;  %v2445_v23 = vrot.slane %v2444_v52, 2  ;;  %v2440_v40 = vrot.slane %v2439_v49, 1 }
0x11ad   :  { %v2418_v57 = vmul.f32 %v2401_v27, %v6006_v25  ;;  %v2686_v26 = vrot.slane %v2401_v27, %v5486_v28 }
0x11ae   :  { %v2451_v21 = vadd.f32 %v2450_v47, %v2449_v16  ;;  %v2432_v16 = vadd.f32 %v2431_v11, %v2430_v51  ;;  %v2696_v47 = vsel %vm544_vm3, %v2674_v50, %v2695_v56  ;;  %v2446_v38 = vadd.f32 %v2445_v23, %v2444_v52 }
0x11af   :  { %v2456_v48 = vsel %vm162_vm1, %v2418_v57, 0.0  ;;  %v2425_v57 = vadd.f32 %v2424_v4, %v2423_v37  ;;  %v2697_v53 = vsel %vm546_vm4, %v2678_v6, %v2696_v47 }
0x11b0   :  { %v2457_v1 = vrot.slane %v2456_v48, 4  ;;  %v2406_v45 = vpop.permute.xlu0 %2405  ;;  %v2452_v63 = vrot.slane %v2451_v21, 2  ;;  %v2698_v35 = vsel %vm548_vm5, %v2682_v36, %v2697_v53  ;;  %v2447_v36 = vrot.slane %v2446_v38, 1 }
0x11b1   :  { %v2419_v17 = vmul.f32 %v2406_v45, %v6013_v22  ;;  %v2690_v13 = vrot.slane %v2406_v45, %v5486_v28  ;;  %v2699_v11 = vsel %vm550_vm6, %v2686_v26, %v2698_v35  ;;  %v2426_v23 = vrot.slane %v2425_v57, 1 }
0x11b2   :  { %v2458_v25 = vadd.f32 %v2457_v1, %v2456_v48  ;;  %v2453_v51 = vadd.f32 %v2452_v63, %v2451_v21  ;;  %v2433_v1 = vrot.slane %v2432_v16, 1 }
0x11b3   :  { %v2463_v33 = vsel %vm162_vm1, %v2419_v17, 0.0  ;;  %v2700_v4 = vsel %vm552_vm7, %v2690_v13, %v2699_v11 }
0x11b4   :  { %v2459_v27 = vrot.slane %v2458_v25, 2  ;;  %v2464_v44 = vrot.slane %v2463_v33, 4  ;;  %v2411_v22 = vpop.permute.xlu0 %2410  ;;  %v2454_v56 = vrot.slane %v2453_v51, 1  ;;  %v2434_v63 = vadd.f32 %v2433_v1, %v2432_v16 }
0x11b5   :  { %v2420_v50 = vmul.f32 %v2411_v22, %v6023_v34  ;;  %v2694_v48 = vrot.slane %v2411_v22, %v5486_v28 }
0x11b6   :  { %v2460_v37 = vadd.f32 %v2459_v27, %v2458_v25  ;;  %v2465_v8 = vadd.f32 %v2464_v44, %v2463_v33  ;;  %v2441_v25 = vadd.f32 %v2440_v40, %v2439_v49  ;;  %v2427_v44 = vadd.f32 %v2426_v23, %v2425_v57 }
0x11b7   :  { %v2470_v52 = vsel %vm162_vm1, %v2420_v50, 0.0  ;;  %v2701_v6 = vsel %vm554_vm8, %v2694_v48, %v2700_v4  ;;  %v2448_v33 = vadd.f32 %v2447_v36, %v2446_v38  ;;  %v2455_v53 = vadd.f32 %v2454_v56, %v2453_v51  ;;  %v2478_v51 = vld [vmem:[#allocation2 + $0x10] sm:$0xff] }
0x11b8   :  { %v2466_v45 = vrot.slane %v2465_v8, 2  ;;  %v2471_v21 = vrot.slane %v2470_v52, 4  ;;  %2704 = vst.msk [vmem:[#allocation16 + $0x10] sm:$0xff] %vm557_vm9, %v2701_v6  ;;  %v2461_v26 = vrot.slane %v2460_v37, 1  ;;  %v2487_v35 = vsel %vm542_vm2, %v2434_v63, %v2427_v44  ;;  %v2646_v56 = vpop.permute.xlu0 %2645 }
0x11b9   :  { %v2488_v50 = vsel %vm544_vm3, %v2441_v25, %v2487_v35 }
0x11ba   :  { %v2467_v22 = vadd.f32 %v2466_v45, %v2465_v8  ;;  %v2472_v17 = vadd.f32 %v2471_v21, %v2470_v52  ;;  %v2462_v27 = vadd.f32 %v2461_v26, %v2460_v37  ;;  %v2489_v4 = vsel %vm546_vm4, %v2448_v33, %v2488_v50 }
0x11bb   :  { %v2490_v16 = vsel %vm548_vm5, %v2455_v53, %v2489_v4 }
0x11bc   :  { %v2468_v47 = vrot.slane %v2467_v22, 1  ;;  %v2473_v13 = vrot.slane %v2472_v17, 2  ;;  %v2491_v49 = vsel %vm550_vm6, %v2462_v27, %v2490_v16 }
0x11be   :  { %v2474_v11 = vadd.f32 %v2473_v13, %v2472_v17  ;;  %v2469_v48 = vadd.f32 %v2468_v47, %v2467_v22 }
0x11c0   :  { %v2475_v6 = vrot.slane %v2474_v11, 1  ;;  %v2492_v57 = vsel %vm552_vm7, %v2469_v48, %v2491_v49 }
0x11c2   :  { %v2476_v1 = vadd.f32 %v2475_v6, %v2474_v11 }
0x11c4   :  { %v2493_v38 = vsel %vm554_vm8, %v2476_v1, %v2492_v57 }
0x11c5   :  { %4578 = vmatmul.mubr.msk.f32.vlgmr.msra.gmra.mrb[14].mxu0 %vm162_vm1, %v2493_v38 }
0x11c6   :  { %4719 = vmatpush3.bf16.msra.mxu0 %v5399_v5  ;;  %4599 = vmatprep.mubr.msk.f32.mxu0 %vm5198_vm0, %v6403_v39 }
0x11c7   :  { %4720 = vmatprep.subr.bf16.mxu0 %v6404_v7 }
0x11ca   :  { %4722 = vmatpush3.bf16.msra.mxu0 %v6405_v55 }
0x11cb   :  { %4729 = vmatprep.subr.bf16.mxu0 %v6404_v7 }
0x1298   :  { %v2562_v37 = vpop.f32.mrb[14].mxu0 }
0x1299   :  { %v2566_v8 = vadd.f32 %v2562_v37, %v2478_v51  ;;  %v4579_v40 = vpop.f32.mrb[15].mxu0 }
0x129b   :  { %v2637_v52 = vadd.f32 %v5983_v59, %v2566_v8 }
0x129d   :  { %v4376_v23 = vmul.f32 -1.442695, %v2637_v52 }
0x129f   :  { %4888 = vpow2.f32 %v4376_v23 }
0x12a9   :  { %v4889_v36 = vpop.eup %4888 }
0x12aa   :  { %v2641_v45 = vadd.f32 1.0, %v4889_v36 }
0x12ac   :  { %4890 = vrcp.f32 %v2641_v45 }
0x12b6   :  { %v4891_v21 = vpop.eup %4890 }
0x12b7   :  { %v2648_v63 = vmul.f32 %v4891_v21, %v2646_v56  ;;  %v2655_v25 = vsub.f32 1.0, %v4891_v21  ;;  %v2661_v59 = vmul.f32 %v4891_v21, %v5848_v29 }
0x12b9   :  { %2650 = vrot.lane.b32.xlu1 %v2648_v63, %s5202_s7 }
0x132b   :  { %v2651_v26 = vpop.permute.xlu1 %2650 }
0x132c   :  { %v2653_v22 = vadd.f32 %v2651_v26, %v2566_v8 }
0x132e   :  { %4892 = vtanh.f32 %v2653_v22 }
0x1338   :  { %v4893_v17 = vpop.eup %4892 }
0x1339   :  { %2657 = vrot.lane.b32.xlu0 %v4893_v17, %s5203_s25 }
0x13ab   :  { %v2658_v44 = vpop.permute.xlu0 %2657 }
0x13ac   :  { %v2660_v33 = vmul.f32 %v2658_v44, %v2655_v25 }
0x13ae   :  { %v6053_v47 = vadd.f32 %v2661_v59, %v2660_v33 }
0x13b0   :  { %2706 = vrot.lane.b32.xlu0 %v6053_v47, %s5203_s25 }
0x1422   :  { %v2707_v13 = vpop.permute.xlu0 %2706 }
0x1423   :  { %2710 = vst.msk [vmem:[#allocation15 + $0x10] sm:$0xff] %vm162_vm1, %v2707_v13  ;;  %4600 = vmatmul.mubr.msk.f32.vlgmr.msra.gmra.mrb[16].mxu0 %vm162_vm1, %v2707_v13 }
0x1424   :  { %4731 = vmatpush3.bf16.msra.mxu0 %v5627_v3  ;;  %4621 = vmatprep.mubr.msk.f32.mxu0 %vm5198_vm0, %v6403_v39 }
0x1425   :  { %4732 = vmatprep.subr.bf16.mxu0 %v6404_v7 }
0x1428   :  { %4734 = vmatpush3.bf16.msra.mxu0 %v5633_v2 }
0x1429   :  { %4741 = vmatprep.subr.bf16.mxu0 %v6404_v7 }
0x142b   :  { %4622 = vmatmul.mubr.msk.f32.vlgmr.msra.gmra.mrb[18].mxu0 %vm162_vm1, %v2707_v13 }
0x142c   :  { %4743 = vmatpush3.bf16.msra.mxu0 %v5560_v9  ;;  %4643 = vmatprep.mubr.msk.f32.mxu0 %vm5198_vm0, %v6403_v39 }
0x142d   :  { %4744 = vmatprep.subr.bf16.mxu0 %v6404_v7 }
0x1430   :  { %4746 = vmatpush3.bf16.msra.mxu0 %v5566_v15 }
0x14f6   :  { %v2779_v29 = vpop.f32.mrb[16].mxu0 }
0x14f7   :  { %v2792_v53 = vcombine.high %v2779_v29, %v2779_v29  ;;  %v2799_v35 = vrot.slane %v2779_v29, %v5420_v14  ;;  %v4601_v27 = vpop.f32.mrb[17].mxu0 }
0x14f9   :  { %v2806_v11 = vrot.slane %v2792_v53, %v5420_v14  ;;  %v2807_v50 = vcombine.high %v2799_v35, %v2799_v35  ;;  %v2815_v48 = vrot.slane %v2799_v35, %v5420_v14 }
0x14fb   :  { %v2808_v4 = vcombine.high %v2806_v11, %v2806_v11  ;;  %v2822_v9 = vrot.slane %v2806_v11, %v5420_v14  ;;  %v2829_v6 = vrot.slane %v2807_v50, %v5420_v14  ;;  %v2837_v16 = vcombine.high %v2815_v48, %v2815_v48 }
0x14fc   :  { %v2844_v1 = vrot.slane %v2815_v48, %v5424_v19 }
0x14fd   :  { %v2836_v15 = vrot.slane %v2808_v4, %v5420_v14  ;;  %v2839_v49 = vcombine.high %v2829_v6, %v2829_v6  ;;  %v2848_v57 = vrot.slane %v2829_v6, %v5424_v19  ;;  %v2852_v38 = vrot.slane %v2837_v16, %v5424_v19 }
0x14fe   :  { %v2860_v51 = vrot.slane %v2822_v9, %v5424_v19  ;;  %v2881_v37 = vadd.f32 %v2844_v1, %v5870_v42  ;;  %v6082_v8 = vpop.f32.mrb[18].mxu0  ;;  %v2838_v45 = vcombine.high %v2822_v9, %v2822_v9 }
0x14ff   :  { %v2840_v40 = vcombine.high %v2836_v15, %v2836_v15  ;;  %v2856_v52 = vrot.slane %v2839_v49, %v5424_v19  ;;  %v2864_v23 = vrot.slane %v2836_v15, %v5424_v19  ;;  %v4623_v36 = vpop.f32.mrb[19].mxu0  ;;  %v2882_v21 = vadd.f32 %v2848_v57, %v5875_v41 }
0x1500   :  { %v2883_v56 = vadd.f32 %v2852_v38, %v5877_v32  ;;  %4894 = vtanh.f32 %v2881_v37  ;;  %v2885_v26 = vadd.f32 %v2860_v51, %v5883_v54  ;;  %v2868_v17 = vrot.slane %v2838_v45, %v5424_v19 }
0x1501   :  { %v2872_v63 = vrot.slane %v2840_v40, %v5424_v19  ;;  %v2886_v42 = vadd.f32 %v2864_v23, %v5890_v0  ;;  %4896 = vtanh.f32 %v2882_v21  ;;  %v2884_v22 = vadd.f32 %v2856_v52, %v5881_v20 }
0x1502   :  { %4898 = vtanh.f32 %v2883_v56  ;;  %v2887_v41 = vadd.f32 %v2868_v17, %v5897_v12 }
0x1503   :  { %v2888_v25 = vadd.f32 %v2872_v63, %v5903_v30  ;;  %4900 = vtanh.f32 %v2885_v26 }
0x1504   :  { %4902 = vtanh.f32 %v2886_v42 }
0x1505   :  { %4904 = vtanh.f32 %v2884_v22 }
0x1506   :  { %4906 = vtanh.f32 %v2888_v25 }
0x1507   :  { %4908 = vtanh.f32 %v2887_v41 }
0x150a   :  { %v4895_v32 = vpop.eup %4894 }
0x150b   :  { %v2897_v44 = vmul.f32 %v5910_v58, %v4895_v32  ;;  %v4897_v54 = vpop.eup %4896 }
0x150c   :  { %v4899_v0 = vpop.eup %4898  ;;  %v2898_v20 = vmul.f32 %v5910_v58, %v4897_v54 }
0x150d   :  { %v2905_v59 = vsel %vm162_vm1, %v2897_v44, 0.0  ;;  %v2899_v33 = vmul.f32 %v5910_v58, %v4899_v0  ;;  %v4901_v30 = vpop.eup %4900 }
0x150e   :  { %2906 = vadd.xlane.f32.xlu0 %v2905_v59  ;;  %v2908_v13 = vsel %vm162_vm1, %v2898_v20, 0.0  ;;  %v4903_v29 = vpop.eup %4902  ;;  %v2901_v27 = vmul.f32 %v5910_v58, %v4901_v30 }
0x150f   :  { %2909 = vadd.xlane.f32.xlu1 %v2908_v13  ;;  %v4905_v12 = vpop.eup %4904  ;;  %v2911_v53 = vsel %vm162_vm1, %v2899_v33, 0.0  ;;  %v2902_v35 = vmul.f32 %v5910_v58, %v4903_v29 }
0x1510   :  { %v4907_v11 = vpop.eup %4906  ;;  %v2917_v4 = vsel %vm162_vm1, %v2901_v27, 0.0  ;;  %v2900_v9 = vmul.f32 %v5910_v58, %v4905_v12 }
0x1511   :  { %v2920_v50 = vsel %vm162_vm1, %v2902_v35, 0.0  ;;  %v2904_v48 = vmul.f32 %v5910_v58, %v4907_v11  ;;  %v4909_v6 = vpop.eup %4908 }
0x1512   :  { %2912 = vadd.xlane.f32.xlu0 %v2911_v53  ;;  %v2914_v1 = vsel %vm162_vm1, %v2900_v9, 0.0  ;;  %v2903_v15 = vmul.f32 %v5910_v58, %v4909_v6 }
0x1513   :  { %2921 = vadd.xlane.f32.xlu1 %v2920_v50  ;;  %v2926_v16 = vsel %vm162_vm1, %v2904_v48, 0.0 }
0x1514   :  { %v2923_v49 = vsel %vm162_vm1, %v2903_v15, 0.0 }
0x1516   :  { %2918 = vadd.xlane.f32.xlu0 %v2917_v4 }
0x1517   :  { %2927 = vadd.xlane.f32.xlu1 %v2926_v16 }
0x151a   :  { %2915 = vadd.xlane.f32.xlu0 %v2914_v1 }
0x151e   :  { %2924 = vadd.xlane.f32.xlu0 %v2923_v49 }
0x159b   :  { %v2907_v57 = vpop.xlane.xlu0 %2906 }
0x159c   :  { %v2910_v38 = vpop.xlane.xlu1 %2909  ;;  %v2940_v52 = vrot.slane %v2907_v57, %v5486_v28 }
0x159d   :  { %v2944_v37 = vrot.slane %v2910_v38, %v5486_v28 }
0x159f   :  { %v2913_v51 = vpop.xlane.xlu0 %2912  ;;  %v2969_v45 = vsel %vm542_vm2, %v2944_v37, %v2940_v52 }
0x15a0   :  { %v2922_v23 = vpop.xlane.xlu1 %2921  ;;  %v2948_v36 = vrot.slane %v2913_v51, %v5486_v28 }
0x15a1   :  { %v2960_v26 = vrot.slane %v2922_v23, %v5486_v28 }
0x15a2   :  { %v2970_v56 = vsel %vm544_vm3, %v2948_v36, %v2969_v45 }
0x15a3   :  { %v2919_v40 = vpop.xlane.xlu0 %2918 }
0x15a4   :  { %v2956_v63 = vrot.slane %v2919_v40, %v5486_v28  ;;  %v2928_v42 = vpop.xlane.xlu1 %2927 }
0x15a5   :  { %v2968_v44 = vrot.slane %v2928_v42, %v5486_v28 }
0x15a7   :  { %v2916_v21 = vpop.xlane.xlu0 %2915 }
0x15a8   :  { %v2952_v58 = vrot.slane %v2916_v21, %v5486_v28 }
0x15aa   :  { %v2971_v22 = vsel %vm546_vm4, %v2952_v58, %v2970_v56 }
0x15ab   :  { %v2972_v17 = vsel %vm548_vm5, %v2956_v63, %v2971_v22  ;;  %v2925_v25 = vpop.xlane.xlu0 %2924 }
0x15ac   :  { %v2964_v41 = vrot.slane %v2925_v25, %v5486_v28  ;;  %v2973_v32 = vsel %vm550_vm6, %v2960_v26, %v2972_v17 }
0x15ae   :  { %v2974_v54 = vsel %vm552_vm7, %v2964_v41, %v2973_v32 }
0x15af   :  { %v2975_v0 = vsel %vm554_vm8, %v2968_v44, %v2974_v54 }
0x15b0   :  { %v2977_v59 = vsel %vm557_vm9, %v2975_v0, -inf }
0x15b1   :  { %2978 = vmax.xlane.f32.xlu0 %v2977_v59 }
0x163e   :  { %v2979_v20 = vpop.xlane.xlu0 %2978 }
0x163f   :  { %v2984_v33 = vrot.slane %v2979_v20, %v5424_v19  ;;  %v2988_v30 = vrot.slane %v2979_v20, %v5505_v60  ;;  %v2992_v13 = vrot.slane %v2979_v20, %v5508_v61  ;;  %v3000_v29 = vrot.slane %v2979_v20, %v5517_v10 }
0x1640   :  { %v2996_v12 = vrot.slane %v2979_v20, %v5511_v62  ;;  %v3008_v11 = vrot.slane %v2979_v20, %v5525_v24  ;;  %v3004_v9 = vrot.slane %v2979_v20, %v5521_v18  ;;  %v3012_v49 = vrot.slane %v2979_v20, %v5529_v31 }
0x1641   :  { %v3021_v53 = vsub.f32 %v2907_v57, %v2984_v33  ;;  %v3022_v35 = vsub.f32 %v2910_v38, %v2988_v30  ;;  %v3023_v27 = vsub.f32 %v2913_v51, %v2992_v13  ;;  %v3025_v50 = vsub.f32 %v2919_v40, %v3000_v29 }
0x1642   :  { %v3024_v6 = vsub.f32 %v2916_v21, %v2996_v12  ;;  %v3027_v1 = vsub.f32 %v2925_v25, %v3008_v11  ;;  %v3026_v37 = vsub.f32 %v2922_v23, %v3004_v9  ;;  %v3028_v51 = vsub.f32 %v2928_v42, %v3012_v49 }
0x1643   :  { %v3029_v48 = vmul.f32 1.442695, %v3021_v53  ;;  %v3031_v4 = vmul.f32 1.442695, %v3022_v35  ;;  %v3033_v16 = vmul.f32 1.442695, %v3023_v27 }
0x1644   :  { %v3037_v15 = vmul.f32 1.442695, %v3025_v50  ;;  %v3035_v57 = vmul.f32 1.442695, %v3024_v6  ;;  %v3041_v38 = vmul.f32 1.442695, %v3027_v1  ;;  %v6153_v6 = vadd.f32 %v5979_v43, %v6082_v8 }
0x1645   :  { %4910 = vpow2.f32 %v3029_v48  ;;  %v3039_v40 = vmul.f32 1.442695, %v3026_v37  ;;  %v3043_v45 = vmul.f32 1.442695, %v3028_v51 }
0x1646   :  { %4912 = vpow2.f32 %v3031_v4 }
0x1647   :  { %4914 = vpow2.f32 %v3033_v16 }
0x1648   :  { %4916 = vpow2.f32 %v3037_v15 }
0x1649   :  { %4918 = vpow2.f32 %v3035_v57 }
0x164a   :  { %4920 = vpow2.f32 %v3041_v38 }
0x164b   :  { %4922 = vpow2.f32 %v3039_v40 }
0x164c   :  { %4924 = vpow2.f32 %v3043_v45 }
0x164f   :  { %v4911_v52 = vpop.eup %4910 }
0x1650   :  { %v4913_v36 = vpop.eup %4912  ;;  %3054 = vperm.xlu1 %4772, %v4911_v52  }
0x1651   :  { %3057 = vperm.xlu0 %4773, %v4913_v36   ;;  %v4915_v21 = vpop.eup %4914 }
0x1652   :  { %v4917_v58 = vpop.eup %4916 }
0x1653   :  { %v4919_v23 = vpop.eup %4918 }
0x1654   :  { %3060 = vperm.xlu1 %4772, %v4915_v21   ;;  %v4921_v56 = vpop.eup %4920 }
0x1655   :  { %3066 = vperm.xlu0 %4773, %v4917_v58   ;;  %v4923_v63 = vpop.eup %4922 }
0x1656   :  { %v4925_v26 = vpop.eup %4924 }
0x1658   :  { %3063 = vperm.xlu1 %4772, %v4919_v23  }
0x1659   :  { %3072 = vperm.xlu0 %4773, %v4921_v56  }
0x165c   :  { %3069 = vperm.xlu1 %4772, %v4923_v63  }
0x1660   :  { %3075 = vperm.xlu1 %4772, %v4925_v26  }
0x16cf   :  { %v3055_v42 = vpop.permute.xlu1 %3054 }
0x16d0   :  { %v3058_v22 = vpop.permute.xlu0 %3057  ;;  %v3080_v41 = vrot.slane %v3055_v42, %v5486_v28 }
0x16d1   :  { %v3084_v25 = vrot.slane %v3058_v22, %v5486_v28 }
0x16d3   :  { %v3061_v17 = vpop.permute.xlu1 %3060  ;;  %v3109_v0 = vsel %vm542_vm2, %v3084_v25, %v3080_v41 }
0x16d4   :  { %v3088_v32 = vrot.slane %v3061_v17, %v5486_v28  ;;  %v3067_v44 = vpop.permute.xlu0 %3066 }
0x16d5   :  { %v3096_v30 = vrot.slane %v3067_v44, %v5486_v28 }
0x16d6   :  { %v3110_v20 = vsel %vm544_vm3, %v3088_v32, %v3109_v0  ;;  %v6412_v32 = vld [vmem:[#allocation24_spill] sm:$0xff] }
0x16d7   :  { %v3064_v54 = vpop.permute.xlu1 %3063 }
0x16d8   :  { %v3092_v59 = vrot.slane %v3064_v54, %v5486_v28  ;;  %v3073_v29 = vpop.permute.xlu0 %3072  ;;  %v6413_v54 = vld [vmem:[#allocation25_spill] sm:$0xff] }
0x16d9   :  { %v3104_v27 = vrot.slane %v3073_v29, %v5486_v28 }
0x16da   :  { %v3111_v33 = vsel %vm546_vm4, %v3092_v59, %v3110_v20 }
0x16db   :  { %v3070_v13 = vpop.permute.xlu1 %3069  ;;  %v3112_v53 = vsel %vm548_vm5, %v3096_v30, %v3111_v33  ;;  %v6414_v33 = vld [vmem:[#allocation26_spill] sm:$0xff] }
0x16dc   :  { %v3100_v12 = vrot.slane %v3070_v13, %v5486_v28 }
0x16de   :  { %v3113_v35 = vsel %vm550_vm6, %v3100_v12, %v3112_v53 }
0x16df   :  { %v3076_v11 = vpop.permute.xlu1 %3075  ;;  %v3114_v48 = vsel %vm552_vm7, %v3104_v27, %v3113_v35  ;;  %v6415_v35 = vld [vmem:[#allocation27_spill] sm:$0xff] }
0x16e0   :  { %v3108_v50 = vrot.slane %v3076_v11, %v5486_v28 }
0x16e2   :  { %v3115_v4 = vsel %vm554_vm8, %v3108_v50, %v3114_v48 }
0x16e3   :  { %v3117_v9 = vsel %vm557_vm9, %v3115_v4, 0.0 }
0x16e4   :  { %3118 = vadd.xlane.f32.xlu0 %v3117_v9 }
0x16fa   :  { %3450 = vrot.lane.b32.xlu0 %v6153_v6, %s5202_s7 }
0x1771   :  { %v3119_v16 = vpop.xlane.xlu0 %3118 }
0x1772   :  { %4926 = vrcp.f32 %v3119_v16 }
0x177c   :  { %v4927_v1 = vpop.eup %4926 }
0x177d   :  { %v3125_v15 = vrot.slane %v4927_v1, %v5424_v19  ;;  %v3129_v37 = vrot.slane %v4927_v1, %v5505_v60  ;;  %v3133_v38 = vrot.slane %v4927_v1, %v5508_v61  ;;  %v3137_v43 = vrot.slane %v4927_v1, %v5511_v62 }
0x177e   :  { %v3141_v40 = vrot.slane %v4927_v1, %v5517_v10  ;;  %v3145_v42 = vrot.slane %v4927_v1, %v5521_v18  ;;  %v3149_v22 = vrot.slane %v4927_v1, %v5525_v24  ;;  %v3153_v17 = vrot.slane %v4927_v1, %v5529_v31 }
0x177f   :  { %v3162_v49 = vmul.f32 %v4911_v52, %v3125_v15  ;;  %v3163_v57 = vmul.f32 %v4913_v36, %v3129_v37  ;;  %v3164_v51 = vmul.f32 %v4915_v21, %v3133_v38  ;;  %v3165_v8 = vmul.f32 %v4919_v23, %v3137_v43 }
0x1780   :  { %v3166_v45 = vmul.f32 %v4917_v58, %v3141_v40  ;;  %v3167_v52 = vmul.f32 %v4923_v63, %v3145_v42  ;;  %v3168_v36 = vmul.f32 %v4921_v56, %v3149_v22  ;;  %v3169_v21 = vmul.f32 %v4925_v26, %v3153_v17 }
0x1781   :  { %3180 = vperm.xlu1 %4772, %v3162_v49   ;;  %v6416_v49 = vld [vmem:[#allocation28_spill] sm:$0xff] }
0x1785   :  { %3185 = vperm.xlu1 %4772, %v3163_v57  }
0x1789   :  { %3190 = vperm.xlu1 %4772, %v3164_v51  }
0x178d   :  { %3195 = vperm.xlu1 %4772, %v3165_v8  }
0x1791   :  { %3200 = vperm.xlu1 %4772, %v3166_v45  }
0x1795   :  { %3205 = vperm.xlu1 %4772, %v3167_v52  }
0x1799   :  { %3210 = vperm.xlu1 %4772, %v3168_v36  }
0x179d   :  { %3215 = vperm.xlu1 %4772, %v3169_v21  }
0x1800   :  { %v3181_v25 = vpop.permute.xlu1 %3180 }
0x1801   :  { %v3218_v44 = vmul.f32 %v3181_v25, %v6412_v32  ;;  %v3471_v57 = vrot.slane %v3181_v25, %v5486_v28 }
0x1803   :  { %v3226_v59 = vsel %vm162_vm1, %v3218_v44, 0.0 }
0x1804   :  { %v3186_v41 = vpop.permute.xlu1 %3185  ;;  %v3227_v13 = vrot.slane %v3226_v59, 4 }
0x1805   :  { %v3219_v23 = vmul.f32 %v3186_v41, %v5987_v46  ;;  %v3475_v15 = vrot.slane %v3186_v41, %v5486_v28 }
0x1806   :  { %v3228_v50 = vadd.f32 %v3227_v13, %v3226_v59 }
0x1807   :  { %v3233_v63 = vsel %vm162_vm1, %v3219_v23, 0.0  ;;  %v3500_v21 = vsel %vm542_vm2, %v3475_v15, %v3471_v57  ;;  %v6417_v23 = vld [vmem:[#allocation29_spill] sm:$0xff] }
0x1808   :  { %v3191_v58 = vpop.permute.xlu1 %3190  ;;  %v3234_v26 = vrot.slane %v3233_v63, 4  ;;  %v3229_v8 = vrot.slane %v3228_v50, 2 }
0x1809   :  { %v3220_v0 = vmul.f32 %v3191_v58, %v6413_v54  ;;  %v3479_v51 = vrot.slane %v3191_v58, %v5486_v28 }
0x180a   :  { %v3235_v11 = vadd.f32 %v3234_v26, %v3233_v63  ;;  %v3230_v63 = vadd.f32 %v3229_v8, %v3228_v50 }
0x180b   :  { %v3240_v56 = vsel %vm162_vm1, %v3220_v0, 0.0  ;;  %v3501_v58 = vsel %vm544_vm3, %v3479_v51, %v3500_v21 }
0x180c   :  { %v3196_v20 = vpop.permute.xlu1 %3195  ;;  %v3241_v29 = vrot.slane %v3240_v56, 4  ;;  %v3236_v38 = vrot.slane %v3235_v11, 2 }
0x180d   :  { %v3221_v30 = vmul.f32 %v3196_v20, %v6414_v33  ;;  %v3483_v45 = vrot.slane %v3196_v20, %v5486_v28 }
0x180e   :  { %v3242_v48 = vadd.f32 %v3241_v29, %v3240_v56  ;;  %v3237_v44 = vadd.f32 %v3236_v38, %v3235_v11 }
0x180f   :  { %v3247_v12 = vsel %vm162_vm1, %v3221_v30, 0.0  ;;  %v3502_v56 = vsel %vm546_vm4, %v3483_v45, %v3501_v58 }
0x1810   :  { %v3248_v46 = vrot.slane %v3247_v12, 4  ;;  %v3201_v53 = vpop.permute.xlu1 %3200  ;;  %v3243_v40 = vrot.slane %v3242_v48, 2 }
0x1811   :  { %v3222_v27 = vmul.f32 %v3201_v53, %v6415_v35  ;;  %v3487_v22 = vrot.slane %v3201_v53, %v5486_v28 }
0x1812   :  { %v3249_v9 = vadd.f32 %v3248_v46, %v3247_v12  ;;  %v3244_v59 = vadd.f32 %v3243_v40, %v3242_v48 }
0x1813   :  { %v3254_v4 = vsel %vm162_vm1, %v3222_v27, 0.0  ;;  %v3503_v30 = vsel %vm548_vm5, %v3487_v22, %v3502_v56  ;;  %v3238_v27 = vrot.slane %v3237_v44, 1 }
0x1814   :  { %v3255_v16 = vrot.slane %v3254_v4, 4  ;;  %v3206_v1 = vpop.permute.xlu1 %3205  ;;  %v3250_v52 = vrot.slane %v3249_v9, 2 }
0x1815   :  { %v3223_v37 = vmul.f32 %v3206_v1, %v6416_v49  ;;  %v3491_v25 = vrot.slane %v3206_v1, %v5486_v28  ;;  %v3231_v1 = vrot.slane %v3230_v63, 1 }
0x1816   :  { %v3256_v43 = vadd.f32 %v3255_v16, %v3254_v4  ;;  %v3251_v33 = vadd.f32 %v3250_v52, %v3249_v9  ;;  %v3245_v4 = vrot.slane %v3244_v59, 1 }
0x1817   :  { %v3261_v42 = vsel %vm162_vm1, %v3223_v37, 0.0  ;;  %v3504_v46 = vsel %vm550_vm6, %v3491_v25, %v3503_v30  ;;  %v3232_v40 = vadd.f32 %v3231_v1, %v3230_v63 }
0x1818   :  { %v3262_v36 = vrot.slane %v3261_v42, 4  ;;  %v3211_v17 = vpop.permute.xlu1 %3210  ;;  %v3257_v41 = vrot.slane %v3256_v43, 2  ;;  %v3252_v15 = vrot.slane %v3251_v33, 1  ;;  %v3246_v8 = vadd.f32 %v3245_v4, %v3244_v59  ;;  %v3283_v59 = vld [vmem:[#allocation2 + $0x18] sm:$0xff] }
0x1819   :  { %v3224_v32 = vmul.f32 %v3211_v17, %v6417_v23  ;;  %v3495_v0 = vrot.slane %v3211_v17, %v5486_v28 }
0x181a   :  { %v3263_v54 = vadd.f32 %v3262_v36, %v3261_v42  ;;  %v3258_v12 = vadd.f32 %v3257_v41, %v3256_v43  ;;  %v3253_v45 = vadd.f32 %v3252_v15, %v3251_v33 }
0x181b   :  { %v3268_v20 = vsel %vm162_vm1, %v3224_v32, 0.0  ;;  %v3505_v48 = vsel %vm552_vm7, %v3495_v0, %v3504_v46 }
0x181c   :  { %v3264_v26 = vrot.slane %v3263_v54, 2  ;;  %v3269_v13 = vrot.slane %v3268_v20, 4  ;;  %v3216_v29 = vpop.permute.xlu1 %3215  ;;  %v3259_v57 = vrot.slane %v3258_v12, 1 }
0x181d   :  { %v3225_v53 = vmul.f32 %v3216_v29, %v6023_v34  ;;  %v3499_v35 = vrot.slane %v3216_v29, %v5486_v28  ;;  %v3239_v34 = vadd.f32 %v3238_v27, %v3237_v44 }
0x181e   :  { %v3265_v11 = vadd.f32 %v3264_v26, %v3263_v54  ;;  %v3270_v50 = vadd.f32 %v3269_v13, %v3268_v20  ;;  %v3260_v22 = vadd.f32 %v3259_v57, %v3258_v12  ;;  %v3451_v12 = vpop.permute.xlu0 %3450 }
0x181f   :  { %v3275_v9 = vsel %vm162_vm1, %v3225_v53, 0.0  ;;  %v3506_v16 = vsel %vm554_vm8, %v3499_v35, %v3505_v48  ;;  %v3292_v36 = vsel %vm542_vm2, %v3239_v34, %v3232_v40 }
0x1820   :  { %v3271_v49 = vrot.slane %v3270_v50, 2  ;;  %v3276_v37 = vrot.slane %v3275_v9, 4  ;;  %3509 = vst.msk [vmem:[#allocation16 + $0x18] sm:$0xff] %vm557_vm9, %v3506_v16  ;;  %v3266_v38 = vrot.slane %v3265_v11, 1  ;;  %v3293_v41 = vsel %vm544_vm3, %v3246_v8, %v3292_v36 }
0x1821   :  { %v3294_v23 = vsel %vm546_vm4, %v3253_v45, %v3293_v41  ;;  %v3593_v41 = vld [vmem:[#allocation8 + $0x28] sm:$0xff] }
0x1822   :  { %v3272_v51 = vadd.f32 %v3271_v49, %v3270_v50  ;;  %v3277_v43 = vadd.f32 %v3276_v37, %v3275_v9  ;;  %v3267_v17 = vadd.f32 %v3266_v38, %v3265_v11  ;;  %v3295_v44 = vsel %vm548_vm5, %v3260_v22, %v3294_v23  ;;  %v3589_v38 = vld [vmem:[#allocation8 + $0x8] sm:$0xff] }
0x1824   :  { %v3273_v42 = vrot.slane %v3272_v51, 1  ;;  %v3278_v52 = vrot.slane %v3277_v43, 2  ;;  %v3296_v54 = vsel %vm550_vm6, %v3267_v17, %v3295_v44 }
0x1826   :  { %v3279_v21 = vadd.f32 %v3278_v52, %v3277_v43  ;;  %v3274_v25 = vadd.f32 %v3273_v42, %v3272_v51  ;;  %v3590_v51 = vld [vmem:[#allocation8 + $0x10] sm:$0xff]  ;;  %v3591_v42 = vld [vmem:[#allocation8 + $0x18] sm:$0xff]  ;;  %v3592_v52 = vld [vmem:[#allocation8 + $0x20] sm:$0xff] }
0x1828   :  { %v3280_v32 = vrot.slane %v3279_v21, 1  ;;  %v3297_v0 = vsel %vm552_vm7, %v3274_v25, %v3296_v54 }
0x182a   :  { %v3281_v58 = vadd.f32 %v3280_v32, %v3279_v21 }
0x182c   :  { %v3298_v63 = vsel %vm554_vm8, %v3281_v58, %v3297_v0  ;;  %v3594_v0 = vld [vmem:[#allocation8 + $0x30] sm:$0xff] }
0x182d   :  { %4611 = vmatmul.mubr.msk.f32.vlgmr.msra.gmra.mrb[12].mxu1 %vm162_vm1, %v3298_v63 }
0x182e   :  { %4737 = vmatpush3.bf16.msra.mxu1 %v5399_v5  ;;  %4632 = vmatprep.mubr.msk.f32.mxu1 %vm5198_vm0, %v6403_v39 }
0x182f   :  { %4738 = vmatprep.subr.bf16.mxu1 %v6404_v7 }
0x1832   :  { %4740 = vmatpush3.bf16.msra.mxu1 %v6405_v55 }
0x1833   :  { %4747 = vmatprep.subr.bf16.mxu1 %v6404_v7 }
0x1900   :  { %v3367_v56 = vpop.f32.mrb[12].mxu1 }
0x1901   :  { %v3371_v20 = vadd.f32 %v3367_v56, %v3283_v59  ;;  %v4612_v33 = vpop.f32.mrb[13].mxu1 }
0x1902   :  { %v3595_v33 = vld [vmem:[#allocation8 + $0x38] sm:$0xff] }
0x1903   :  { %v3442_v30 = vadd.f32 %v6153_v6, %v3371_v20 }
0x1905   :  { %v4380_v26 = vmul.f32 -1.442695, %v3442_v30 }
0x1907   :  { %4928 = vpow2.f32 %v4380_v26 }
0x1911   :  { %v4929_v13 = vpop.eup %4928 }
0x1912   :  { %v3446_v29 = vadd.f32 1.0, %v4929_v13 }
0x1914   :  { %4930 = vrcp.f32 %v3446_v29  ;;  %v4976_v29 = vld [vmem:[%s6383_s5] ss:$0 sm:$0xff] }
0x191e   :  { %v4931_v5 = vpop.eup %4930 }
0x191f   :  { %v3453_v46 = vmul.f32 %v4931_v5, %v3451_v12  ;;  %v3460_v27 = vsub.f32 1.0, %v4931_v5  ;;  %v3466_v6 = vmul.f32 %v4931_v5, %v6053_v47 }
0x1921   :  { %3455 = vrot.lane.b32.xlu1 %v3453_v46, %s5202_s7 }
0x1993   :  { %v3456_v53 = vpop.permute.xlu1 %3455 }
0x1994   :  { %v3458_v55 = vadd.f32 %v3456_v53, %v3371_v20 }
0x1996   :  { %4932 = vtanh.f32 %v3458_v55 }
0x19a0   :  { %v4933_v35 = vpop.eup %4932 }
0x19a1   :  { %3462 = vrot.lane.b32.xlu1 %v4933_v35, %s5203_s25 }
0x1a13   :  { %v3463_v11 = vpop.permute.xlu1 %3462 }
0x1a14   :  { %v3465_v50 = vmul.f32 %v3463_v11, %v3460_v27 }
0x1a16   :  { %v6215_v48 = vadd.f32 %v3466_v6, %v3465_v50 }
0x1a18   :  { %3511 = vrot.lane.b32.xlu1 %v6215_v48, %s5203_s25 }
0x1a8a   :  { %v3512_v4 = vpop.permute.xlu1 %3511 }
0x1a8b   :  { %3515 = vst.msk [vmem:[#allocation15 + $0x18] sm:$0xff] %vm162_vm1, %v3512_v4  ;;  %4633 = vmatmul.mubr.msk.f32.vlgmr.msra.gmra.mrb[14].mxu1 %vm162_vm1, %v3512_v4 }
0x1a8c   :  { %4749 = vmatpush3.bf16.msra.mxu1 %v5627_v3  ;;  %4654 = vmatprep.mubr.msk.f32.mxu1 %vm5198_vm0, %v6403_v39  ;;  %v3588_v3 = vld [vmem:[#allocation8] sm:$0xff] }
0x1a8d   :  { %4750 = vmatprep.subr.bf16.mxu1 %v6404_v7 }
0x1a90   :  { %4752 = vmatpush3.bf16.msra.mxu1 %v5633_v2 }
0x1a93   :  { %4655 = vmatmul.mubr.msk.f32.vlgmr.msra.gmra.mrb[16].mxu1 %vm162_vm1, %v3512_v4 }
0x1b5e   :  { %v3584_v47 = vpop.f32.mrb[14].mxu1 }
0x1b5f   :  { %v3597_v9 = vcombine.high %v3584_v47, %v3584_v47  ;;  %v3604_v16 = vrot.slane %v3584_v47, %v5420_v14  ;;  %v4634_v1 = vpop.f32.mrb[15].mxu1 }
0x1b61   :  { %v3611_v15 = vrot.slane %v3597_v9, %v5420_v14  ;;  %v3612_v49 = vcombine.high %v3604_v16, %v3604_v16  ;;  %v3620_v37 = vrot.slane %v3604_v16, %v5420_v14 }
0x1b63   :  { %v3613_v57 = vcombine.high %v3611_v15, %v3611_v15  ;;  %v3627_v39 = vrot.slane %v3611_v15, %v5420_v14  ;;  %v3634_v7 = vrot.slane %v3612_v49, %v5420_v14  ;;  %v3642_v34 = vcombine.high %v3620_v37, %v3620_v37 }
0x1b64   :  { %v3649_v2 = vrot.slane %v3620_v37, %v5424_v19 }
0x1b65   :  { %v3641_v43 = vrot.slane %v3613_v57, %v5420_v14  ;;  %v3643_v8 = vcombine.high %v3627_v39, %v3627_v39  ;;  %v3644_v40 = vcombine.high %v3634_v7, %v3634_v7  ;;  %v3653_v45 = vrot.slane %v3634_v7, %v5424_v19 }
0x1b66   :  { %v3657_v22 = vrot.slane %v3642_v34, %v5424_v19  ;;  %v3665_v36 = vrot.slane %v3627_v39, %v5424_v19  ;;  %v3686_v17 = vadd.f32 %v3649_v2, %v3588_v3  ;;  %v6237_v21 = vpop.f32.mrb[16].mxu1 }
0x1b67   :  { %v3645_v25 = vcombine.high %v3641_v43, %v3641_v43  ;;  %v3661_v23 = vrot.slane %v3644_v40, %v5424_v19  ;;  %v3669_v32 = vrot.slane %v3641_v43, %v5424_v19  ;;  %v4656_v14 = vpop.f32.mrb[17].mxu1  ;;  %v3673_v44 = vrot.slane %v3643_v8, %v5424_v19 }
0x1b68   :  { %v3687_v58 = vadd.f32 %v3653_v45, %v3589_v38  ;;  %v3688_v54 = vadd.f32 %v3657_v22, %v3590_v51  ;;  %4934 = vtanh.f32 %v3686_v17  ;;  %v3690_v59 = vadd.f32 %v3665_v36, %v3592_v52 }
0x1b69   :  { %v3689_v63 = vadd.f32 %v3661_v23, %v3591_v42  ;;  %v3677_v56 = vrot.slane %v3645_v25, %v5424_v19  ;;  %v3691_v20 = vadd.f32 %v3669_v32, %v3593_v41  ;;  %v3692_v30 = vadd.f32 %v3673_v44, %v3594_v0 }
0x1b6a   :  { %4936 = vtanh.f32 %v3687_v58 }
0x1b6b   :  { %4938 = vtanh.f32 %v3688_v54  ;;  %v3693_v26 = vadd.f32 %v3677_v56, %v3595_v33 }
0x1b6c   :  { %4940 = vtanh.f32 %v3689_v63 }
0x1b6d   :  { %4942 = vtanh.f32 %v3690_v59 }
0x1b6e   :  { %4944 = vtanh.f32 %v3691_v20 }
0x1b6f   :  { %4946 = vtanh.f32 %v3692_v30 }
0x1b70   :  { %4948 = vtanh.f32 %v3693_v26 }
0x1b72   :  { %v4935_v13 = vpop.eup %4934 }
0x1b73   :  { %v3702_v5 = vmul.f32 %v4976_v29, %v4935_v13 }
0x1b74   :  { %v4937_v12 = vpop.eup %4936 }
0x1b75   :  { %v4939_v46 = vpop.eup %4938  ;;  %v3710_v53 = vsel %vm162_vm1, %v3702_v5, 0.0  ;;  %v3703_v55 = vmul.f32 %v4976_v29, %v4937_v12 }
0x1b76   :  { %v4941_v35 = vpop.eup %4940  ;;  %3711 = vadd.xlane.f32.xlu1 %v3710_v53  ;;  %v3704_v27 = vmul.f32 %v4976_v29, %v4939_v46 }
0x1b77   :  { %v4943_v11 = vpop.eup %4942  ;;  %v3713_v6 = vsel %vm162_vm1, %v3703_v55, 0.0  ;;  %v3705_v50 = vmul.f32 %v4976_v29, %v4941_v35 }
0x1b78   :  { %v4945_v4 = vpop.eup %4944  ;;  %3714 = vadd.xlane.f32.xlu0 %v3713_v6  ;;  %v3716_v47 = vsel %vm162_vm1, %v3704_v27, 0.0  ;;  %v3706_v9 = vmul.f32 %v4976_v29, %v4943_v11 }
0x1b79   :  { %v4947_v16 = vpop.eup %4946  ;;  %v3719_v1 = vsel %vm162_vm1, %v3705_v50, 0.0  ;;  %v3707_v15 = vmul.f32 %v4976_v29, %v4945_v4 }
0x1b7a   :  { %3717 = vadd.xlane.f32.xlu1 %v3716_v47  ;;  %v4949_v49 = vpop.eup %4948  ;;  %v3722_v37 = vsel %vm162_vm1, %v3706_v9, 0.0  ;;  %v3708_v3 = vmul.f32 %v4976_v29, %v4947_v16 }
0x1b7b   :  { %v3725_v57 = vsel %vm162_vm1, %v3707_v15, 0.0  ;;  %v3709_v39 = vmul.f32 %v4976_v29, %v4949_v49 }
0x1b7c   :  { %3720 = vadd.xlane.f32.xlu0 %v3719_v1  ;;  %v3728_v7 = vsel %vm162_vm1, %v3708_v3, 0.0 }
0x1b7d   :  { %v3731_v34 = vsel %vm162_vm1, %v3709_v39, 0.0 }
0x1b7e   :  { %3723 = vadd.xlane.f32.xlu1 %v3722_v37 }
0x1b80   :  { %3726 = vadd.xlane.f32.xlu0 %v3725_v57 }
0x1b82   :  { %3729 = vadd.xlane.f32.xlu1 %v3728_v7 }
0x1b84   :  { %3732 = vadd.xlane.f32.xlu0 %v3731_v34 }
0x1c03   :  { %v3712_v2 = vpop.xlane.xlu1 %3711 }
0x1c04   :  { %v3745_v51 = vrot.slane %v3712_v2, %v5486_v28 }
0x1c05   :  { %v3715_v38 = vpop.xlane.xlu0 %3714 }
0x1c06   :  { %v3749_v43 = vrot.slane %v3715_v38, %v5486_v28 }
0x1c07   :  { %v3718_v8 = vpop.xlane.xlu1 %3717 }
0x1c08   :  { %v3774_v40 = vsel %vm542_vm2, %v3749_v43, %v3745_v51  ;;  %v3753_v45 = vrot.slane %v3718_v8, %v5486_v28 }
0x1c09   :  { %v3721_v42 = vpop.xlane.xlu0 %3720 }
0x1c0a   :  { %v3775_v52 = vsel %vm544_vm3, %v3753_v45, %v3774_v40  ;;  %v3757_v22 = vrot.slane %v3721_v42, %v5486_v28 }
0x1c0b   :  { %v3724_v36 = vpop.xlane.xlu1 %3723 }
0x1c0c   :  { %v3776_v17 = vsel %vm546_vm4, %v3757_v22, %v3775_v52  ;;  %v3761_v41 = vrot.slane %v3724_v36, %v5486_v28 }
0x1c0d   :  { %v3727_v25 = vpop.xlane.xlu0 %3726 }
0x1c0e   :  { %v3777_v23 = vsel %vm548_vm5, %v3761_v41, %v3776_v17  ;;  %v3765_v32 = vrot.slane %v3727_v25, %v5486_v28 }
0x1c0f   :  { %v3730_v14 = vpop.xlane.xlu1 %3729 }
0x1c10   :  { %v3778_v44 = vsel %vm550_vm6, %v3765_v32, %v3777_v23  ;;  %v3769_v58 = vrot.slane %v3730_v14, %v5486_v28 }
0x1c11   :  { %v3733_v54 = vpop.xlane.xlu0 %3732 }
0x1c12   :  { %v3773_v0 = vrot.slane %v3733_v54, %v5486_v28  ;;  %v3779_v63 = vsel %vm552_vm7, %v3769_v58, %v3778_v44 }
0x1c14   :  { %v3780_v59 = vsel %vm554_vm8, %v3773_v0, %v3779_v63 }
0x1c15   :  { %v3782_v56 = vsel %vm557_vm9, %v3780_v59, -inf }
0x1c16   :  { %3783 = vmax.xlane.f32.xlu1 %v3782_v56 }
0x1ca3   :  { %v3784_v20 = vpop.xlane.xlu1 %3783 }
0x1ca4   :  { %v3789_v33 = vrot.slane %v3784_v20, %v5424_v19  ;;  %v3793_v30 = vrot.slane %v3784_v20, %v5505_v60  ;;  %v3797_v26 = vrot.slane %v3784_v20, %v5508_v61  ;;  %v3801_v13 = vrot.slane %v3784_v20, %v5511_v62 }
0x1ca5   :  { %v3809_v29 = vrot.slane %v3784_v20, %v5521_v18  ;;  %v3805_v53 = vrot.slane %v3784_v20, %v5517_v10  ;;  %v3817_v11 = vrot.slane %v3784_v20, %v5529_v31  ;;  %v3813_v4 = vrot.slane %v3784_v20, %v5525_v24 }
0x1ca6   :  { %v3826_v5 = vsub.f32 %v3712_v2, %v3789_v33  ;;  %v3827_v12 = vsub.f32 %v3715_v38, %v3793_v30  ;;  %v3829_v46 = vsub.f32 %v3721_v42, %v3801_v13  ;;  %v3828_v55 = vsub.f32 %v3718_v8, %v3797_v26 }
0x1ca7   :  { %v3831_v6 = vsub.f32 %v3727_v25, %v3809_v29  ;;  %v3830_v47 = vsub.f32 %v3724_v36, %v3805_v53  ;;  %v3833_v16 = vsub.f32 %v3733_v54, %v3817_v11  ;;  %v3832_v15 = vsub.f32 %v3730_v14, %v3813_v4 }
0x1ca8   :  { %v3834_v35 = vmul.f32 1.442695, %v3826_v5  ;;  %v3836_v27 = vmul.f32 1.442695, %v3827_v12  ;;  %v3840_v50 = vmul.f32 1.442695, %v3829_v46 }
0x1ca9   :  { %v3838_v9 = vmul.f32 1.442695, %v3828_v55  ;;  %v3844_v1 = vmul.f32 1.442695, %v3831_v6  ;;  %v3842_v49 = vmul.f32 1.442695, %v3830_v47 }
0x1caa   :  { %4950 = vpow2.f32 %v3834_v35  ;;  %v3848_v37 = vmul.f32 1.442695, %v3833_v16  ;;  %v3846_v3 = vmul.f32 1.442695, %v3832_v15  ;;  %v3976_v16 = vld [vmem:[#allocation6 + $0x8] sm:$0xff]  ;;  %v3977_v15 = vld [vmem:[#allocation6 + $0x10] sm:$0xff] }
0x1cab   :  { %4952 = vpow2.f32 %v3836_v27 }
0x1cac   :  { %4954 = vpow2.f32 %v3840_v50 }
0x1cad   :  { %4956 = vpow2.f32 %v3838_v9 }
0x1cae   :  { %4958 = vpow2.f32 %v3844_v1  ;;  %v3975_v1 = vld [vmem:[#allocation6] sm:$0xff] }
0x1caf   :  { %4960 = vpow2.f32 %v3842_v49 }
0x1cb0   :  { %4962 = vpow2.f32 %v3848_v37 }
0x1cb1   :  { %4964 = vpow2.f32 %v3846_v3 }
0x1cb4   :  { %v4951_v57 = vpop.eup %4950 }
0x1cb5   :  { %v4953_v39 = vpop.eup %4952  ;;  %3859 = vperm.xlu0 %4773, %v4951_v57  }
0x1cb6   :  { %3862 = vperm.xlu1 %4772, %v4953_v39   ;;  %v4955_v7 = vpop.eup %4954 }
0x1cb7   :  { %v4957_v34 = vpop.eup %4956 }
0x1cb8   :  { %v4959_v2 = vpop.eup %4958 }
0x1cb9   :  { %3868 = vperm.xlu0 %4773, %v4955_v7   ;;  %v4961_v38 = vpop.eup %4960 }
0x1cba   :  { %3865 = vperm.xlu1 %4772, %v4957_v34   ;;  %v4963_v51 = vpop.eup %4962 }
0x1cbb   :  { %v4965_v43 = vpop.eup %4964 }
0x1cbd   :  { %3874 = vperm.xlu0 %4773, %v4959_v2  }
0x1cbe   :  { %3871 = vperm.xlu1 %4772, %v4961_v38  }
0x1cc1   :  { %3880 = vperm.xlu0 %4773, %v4963_v51  }
0x1cc2   :  { %3877 = vperm.xlu1 %4772, %v4965_v43  }
0x1d34   :  { %v3860_v8 = vpop.permute.xlu0 %3859 }
0x1d35   :  { %v3863_v40 = vpop.permute.xlu1 %3862  ;;  %v3885_v42 = vrot.slane %v3860_v8, %v5486_v28 }
0x1d36   :  { %v3889_v45 = vrot.slane %v3863_v40, %v5486_v28 }
0x1d38   :  { %v3869_v52 = vpop.permute.xlu0 %3868  ;;  %v3914_v17 = vsel %vm542_vm2, %v3889_v45, %v3885_v42 }
0x1d39   :  { %v3866_v22 = vpop.permute.xlu1 %3865  ;;  %v3897_v41 = vrot.slane %v3869_v52, %v5486_v28 }
0x1d3a   :  { %v3893_v36 = vrot.slane %v3866_v22, %v5486_v28 }
0x1d3c   :  { %v3915_v25 = vsel %vm544_vm3, %v3893_v36, %v3914_v17  ;;  %v3875_v23 = vpop.permute.xlu0 %3874  ;;  %v3980_v36 = vld [vmem:[#allocation6 + $0x28] sm:$0xff] }
0x1d3d   :  { %v3872_v32 = vpop.permute.xlu1 %3871  ;;  %v3916_v44 = vsel %vm546_vm4, %v3897_v41, %v3915_v25  ;;  %v3905_v58 = vrot.slane %v3875_v23, %v5486_v28 }
0x1d3e   :  { %v3901_v14 = vrot.slane %v3872_v32, %v5486_v28 }
0x1d40   :  { %v3917_v54 = vsel %vm548_vm5, %v3901_v14, %v3916_v44  ;;  %v3881_v0 = vpop.permute.xlu0 %3880 }
0x1d41   :  { %v3878_v63 = vpop.permute.xlu1 %3877  ;;  %v3913_v59 = vrot.slane %v3881_v0, %v5486_v28  ;;  %v3918_v20 = vsel %vm550_vm6, %v3905_v58, %v3917_v54 }
0x1d42   :  { %v3909_v56 = vrot.slane %v3878_v63, %v5486_v28 }
0x1d44   :  { %v3919_v33 = vsel %vm552_vm7, %v3909_v56, %v3918_v20  ;;  %v3981_v56 = vld [vmem:[#allocation6 + $0x30] sm:$0xff] }
0x1d45   :  { %v3920_v30 = vsel %vm554_vm8, %v3913_v59, %v3919_v33 }
0x1d46   :  { %v3922_v26 = vsel %vm557_vm9, %v3920_v30, 0.0 }
0x1d47   :  { %3923 = vadd.xlane.f32.xlu1 %v3922_v26 }
0x1dd4   :  { %v3924_v13 = vpop.xlane.xlu1 %3923 }
0x1dd5   :  { %4966 = vrcp.f32 %v3924_v13 }
0x1ddf   :  { %v4967_v29 = vpop.eup %4966 }
0x1de0   :  { %v3930_v5 = vrot.slane %v4967_v29, %v5424_v19  ;;  %v3934_v46 = vrot.slane %v4967_v29, %v5505_v60  ;;  %v3938_v55 = vrot.slane %v4967_v29, %v5508_v61  ;;  %v3942_v27 = vrot.slane %v4967_v29, %v5511_v62  ;;  %v4977_v62 = vld [vmem:[%s6387_s9 + $0x1] ss:$0 sm:$0xff]  ;;  %s5205_s9 = smov [#allocation16]  }
0x1de1   :  { %v3946_v6 = vrot.slane %v4967_v29, %v5517_v10  ;;  %v3950_v4 = vrot.slane %v4967_v29, %v5521_v18  ;;  %v3954_v60 = vrot.slane %v4967_v29, %v5525_v24  ;;  %v3958_v61 = vrot.slane %v4967_v29, %v5529_v31  ;;  %s4338_s19 = sshll.u32 %s5205_s9, 4  ;;  %s4339_s19 = int_to_ptr.vmem [resolvable:$true] %s4338_s19 }
0x1de2   :  { %v3967_v12 = vmul.f32 %v4951_v57, %v3930_v5  ;;  %v3968_v53 = vmul.f32 %v4953_v39, %v3934_v46  ;;  %v3969_v35 = vmul.f32 %v4957_v34, %v3938_v55  ;;  %v3970_v11 = vmul.f32 %v4955_v7, %v3942_v27  ;;  %v3978_v57 = vld [vmem:[#allocation6 + $0x18] sm:$0xff]  ;;  %s5132_s21 = scalar_lea.vmem %s4339_s19, 640  ;;  %p5137_p1 = scmp.lt.s32.totalorder %s4339_s19, %s4339_s19 }
0x1de3   :  { %v3971_v50 = vmul.f32 %v4961_v38, %v3946_v6  ;;  %v3972_v19 = vmul.f32 %v4959_v2, %v3950_v4  ;;  %v3973_v47 = vmul.f32 %v4965_v43, %v3954_v60  ;;  %v3974_v9 = vmul.f32 %v4963_v51, %v3958_v61  ;;  %v3979_v51 = vld [vmem:[#allocation6 + $0x20] sm:$0xff]  ;;  %v3982_v4 = vld [vmem:[#allocation6 + $0x38] sm:$0xff]  ;;  %p5133_p0 = scmp.ne.s32.totalorder %s4339_s19, %s5132_s21  ;;  %p5138_p2 = scmp.lt.s32.totalorder %s5132_s21, %s5132_s21 }
0x1de4   :  { %3985 = vperm.xlu0 %4773, %v3967_v12   ;;  %v6306_v10 = vadd.f32 %v4977_v62, %v6237_v21 }
0x1de5   :  { %p5139_p3 = por %p5138_p2, %p5137_p1 }
0x1de7   :  { %p5140_p4 = pnand %p5139_p3, %p5133_p0 }
0x1de8   :  { %3990 = vperm.xlu0 %4773, %v3968_v53  }
0x1dec   :  { %3995 = vperm.xlu0 %4773, %v3969_v35  }
0x1df0   :  { %4000 = vperm.xlu0 %4773, %v3970_v11  }
0x1df4   :  { %4005 = vperm.xlu0 %4773, %v3971_v50  }
0x1df8   :  { %4010 = vperm.xlu0 %4773, %v3972_v19  }
0x1dfc   :  { %4015 = vperm.xlu0 %4773, %v3973_v47  }
0x1e00   :  { %4020 = vperm.xlu0 %4773, %v3974_v9  }
0x1e04   :  { %4255 = vrot.lane.b32.xlu0 %v6306_v10, %s5202_s7 }
0x1e63   :  { %v3986_v18 = vpop.permute.xlu0 %3985 }
0x1e64   :  { %v4023_v31 = vmul.f32 %v3986_v18, %v3975_v1  ;;  %v4276_v54 = vrot.slane %v3986_v18, %v5486_v28 }
0x1e66   :  { %v4031_v7 = vsel %vm162_vm1, %v4023_v31, 0.0 }
0x1e67   :  { %v3991_v24 = vpop.permute.xlu0 %3990  ;;  %v4032_v43 = vrot.slane %v4031_v7, 4 }
0x1e68   :  { %v4024_v49 = vmul.f32 %v3991_v24, %v3976_v16  ;;  %v4280_v44 = vrot.slane %v3991_v24, %v5486_v28 }
0x1e69   :  { %v4033_v17 = vadd.f32 %v4032_v43, %v4031_v7 }
0x1e6a   :  { %v4038_v39 = vsel %vm162_vm1, %v4024_v49, 0.0  ;;  %v4305_v46 = vsel %vm542_vm2, %v4280_v44, %v4276_v54 }
0x1e6b   :  { %v3996_v37 = vpop.permute.xlu0 %3995  ;;  %v4039_v38 = vrot.slane %v4038_v39, 4  ;;  %v4034_v20 = vrot.slane %v4033_v17, 2 }
0x1e6c   :  { %v4025_v3 = vmul.f32 %v3996_v37, %v3977_v15  ;;  %v4284_v63 = vrot.slane %v3996_v37, %v5486_v28 }
0x1e6d   :  { %v4040_v22 = vadd.f32 %v4039_v38, %v4038_v39  ;;  %v4035_v19 = vadd.f32 %v4034_v20, %v4033_v17 }
0x1e6e   :  { %v4045_v21 = vsel %vm162_vm1, %v4025_v3, 0.0  ;;  %v4306_v11 = vsel %vm544_vm3, %v4284_v63, %v4305_v46 }
0x1e6f   :  { %v4001_v34 = vpop.permute.xlu0 %4000  ;;  %v4046_v8 = vrot.slane %v4045_v21, 4  ;;  %v4041_v0 = vrot.slane %v4040_v22, 2 }
0x1e70   :  { %v4026_v2 = vmul.f32 %v4001_v34, %v3978_v57  ;;  %v4288_v30 = vrot.slane %v4001_v34, %v5486_v28 }
0x1e71   :  { %v4047_v41 = vadd.f32 %v4046_v8, %v4045_v21  ;;  %v4042_v27 = vadd.f32 %v4041_v0, %v4040_v22 }
0x1e72   :  { %v4052_v40 = vsel %vm162_vm1, %v4026_v2, 0.0  ;;  %v4307_v47 = vsel %vm546_vm4, %v4288_v30, %v4306_v11  ;;  %v4036_v2 = vrot.slane %v4035_v19, 1  ;;  %v4088_v30 = vld [vmem:[#allocation2 + $0x20] sm:$0xff] }
0x1e73   :  { %v4053_v45 = vrot.slane %v4052_v40, 4  ;;  %v4006_v42 = vpop.permute.xlu0 %4005  ;;  %v4048_v33 = vrot.slane %v4047_v41, 2  ;;  %v4043_v37 = vrot.slane %v4042_v27, 1 }
0x1e74   :  { %v4027_v52 = vmul.f32 %v4006_v42, %v3979_v51  ;;  %v4292_v29 = vrot.slane %v4006_v42, %v5486_v28  ;;  %v4037_v22 = vadd.f32 %v4036_v2, %v4035_v19 }
0x1e75   :  { %v4054_v23 = vadd.f32 %v4053_v45, %v4052_v40  ;;  %v4049_v60 = vadd.f32 %v4048_v33, %v4047_v41  ;;  %v4044_v40 = vadd.f32 %v4043_v37, %v4042_v27 }
0x1e76   :  { %v4059_v25 = vsel %vm162_vm1, %v4027_v52, 0.0  ;;  %v4308_v62 = vsel %vm548_vm5, %v4292_v29, %v4307_v47 }
0x1e77   :  { %v4060_v32 = vrot.slane %v4059_v25, 4  ;;  %v4011_v14 = vpop.permute.xlu0 %4010  ;;  %v4055_v13 = vrot.slane %v4054_v23, 2  ;;  %v4050_v7 = vrot.slane %v4049_v60, 1 }
0x1e78   :  { %v4028_v58 = vmul.f32 %v4011_v14, %v3980_v36  ;;  %v4296_v55 = vrot.slane %v4011_v14, %v5486_v28 }
0x1e79   :  { %v4061_v59 = vadd.f32 %v4060_v32, %v4059_v25  ;;  %v4056_v9 = vadd.f32 %v4055_v13, %v4054_v23  ;;  %v4051_v52 = vadd.f32 %v4050_v7, %v4049_v60  ;;  %v4097_v23 = vsel %vm542_vm2, %v4044_v40, %v4037_v22 }
0x1e7a   :  { %v4066_v26 = vsel %vm162_vm1, %v4028_v58, 0.0  ;;  %v4309_v15 = vsel %vm550_vm6, %v4296_v55, %v4308_v62 }
0x1e7b   :  { %v4067_v5 = vrot.slane %v4066_v26, 4  ;;  %v4016_v12 = vpop.permute.xlu0 %4015  ;;  %v4062_v53 = vrot.slane %v4061_v59, 2  ;;  %v4057_v38 = vrot.slane %v4056_v9, 1  ;;  %v4098_v44 = vsel %vm544_vm3, %v4051_v52, %v4097_v23 }
0x1e7c   :  { %v4029_v35 = vmul.f32 %v4016_v12, %v3981_v56  ;;  %v4300_v50 = vrot.slane %v4016_v12, %v5486_v28 }
0x1e7d   :  { %v4068_v6 = vadd.f32 %v4067_v5, %v4066_v26  ;;  %v4063_v1 = vadd.f32 %v4062_v53, %v4061_v59  ;;  %v4058_v36 = vadd.f32 %v4057_v38, %v4056_v9 }
0x1e7e   :  { %v4073_v61 = vsel %vm162_vm1, %v4029_v35, 0.0  ;;  %v4310_v39 = vsel %vm552_vm7, %v4300_v50, %v4309_v15 }
0x1e7f   :  { %v4069_v18 = vrot.slane %v4068_v6, 2  ;;  %v4074_v16 = vrot.slane %v4073_v61, 4  ;;  %v4021_v24 = vpop.permute.xlu0 %4020  ;;  %v4064_v8 = vrot.slane %v4063_v1, 1  ;;  %v4099_v54 = vsel %vm546_vm4, %v4058_v36, %v4098_v44 }
0x1e80   :  { %v4030_v49 = vmul.f32 %v4021_v24, %v3982_v4  ;;  %v4304_v31 = vrot.slane %v4021_v24, %v5486_v28 }
0x1e81   :  { %v4070_v3 = vadd.f32 %v4069_v18, %v4068_v6  ;;  %v4075_v57 = vadd.f32 %v4074_v16, %v4073_v61  ;;  %v4065_v25 = vadd.f32 %v4064_v8, %v4063_v1 }
0x1e82   :  { %v4080_v21 = vsel %vm162_vm1, %v4030_v49, 0.0  ;;  %v4311_v34 = vsel %vm554_vm8, %v4304_v31, %v4310_v39 }
0x1e83   :  { %v4076_v51 = vrot.slane %v4075_v57, 2  ;;  %v4081_v43 = vrot.slane %v4080_v21, 4  ;;  %4314 = vst.msk [vmem:[#allocation16 + $0x20] sm:$0xff] %vm557_vm9, %v4311_v34  ;;  %v4071_v45 = vrot.slane %v4070_v3, 1  ;;  %v4100_v63 = vsel %vm548_vm5, %v4065_v25, %v4099_v54  ;;  %v4256_v35 = vpop.permute.xlu0 %4255 }
0x1e85   :  { %v4077_v28 = vadd.f32 %v4076_v51, %v4075_v57  ;;  %v4082_v42 = vadd.f32 %v4081_v43, %v4080_v21  ;;  %v4072_v32 = vadd.f32 %v4071_v45, %v4070_v3 }
0x1e87   :  { %v4078_v17 = vrot.slane %v4077_v28, 1  ;;  %v4083_v41 = vrot.slane %v4082_v42, 2  ;;  %v4101_v56 = vsel %vm550_vm6, %v4072_v32, %v4100_v63 }
0x1e89   :  { %v4084_v14 = vadd.f32 %v4083_v41, %v4082_v42  ;;  %v4079_v58 = vadd.f32 %v4078_v17, %v4077_v28 }
0x1e8b   :  { %v4085_v0 = vrot.slane %v4084_v14, 1  ;;  %v4102_v20 = vsel %vm552_vm7, %v4079_v58, %v4101_v56 }
0x1e8d   :  { %v4086_v59 = vadd.f32 %v4085_v0, %v4084_v14 }
0x1e8f   :  { %v4103_v33 = vsel %vm554_vm8, %v4086_v59, %v4102_v20 }
0x1e90   :  { %4644 = vmatmul.mubr.msk.f32.vlgmr.msra.gmra.mrb[20].mxu0 %vm162_vm1, %v4103_v33 }
0x1f63   :  { %v4172_v26 = vpop.f32.mrb[20].mxu0 }
0x1f64   :  { %v4176_v13 = vadd.f32 %v4172_v26, %v4088_v30  ;;  %v4645_v29 = vpop.f32.mrb[21].mxu0 }
0x1f66   :  { %v4247_v5 = vadd.f32 %v6306_v10, %v4176_v13 }
0x1f68   :  { %v4384_v12 = vmul.f32 -1.442695, %v4247_v5 }
0x1f6a   :  { %4968 = vpow2.f32 %v4384_v12 }
0x1f74   :  { %v4969_v46 = vpop.eup %4968 }
0x1f75   :  { %v4251_v53 = vadd.f32 1.0, %v4969_v46 }
0x1f77   :  { %4970 = vrcp.f32 %v4251_v53 }
0x1f81   :  { %v4971_v55 = vpop.eup %4970 }
0x1f82   :  { %v4258_v27 = vmul.f32 %v4971_v55, %v4256_v35 }
0x1f84   :  { %4260 = vrot.lane.b32.xlu1 %v4258_v27, %s5202_s7 }
0x1ff6   :  { %v4261_v11 = vpop.permute.xlu1 %4260 }
0x1ff7   :  { %v4263_v6 = vadd.f32 %v4261_v11, %v4176_v13 }
0x1ff9   :  { %4972 = vtanh.f32 %v4263_v6 }
0x2003   :  { %v4973_v50 = vpop.eup %4972 }
0x2004   :  { %4267 = vrot.lane.b32.xlu0 %v4973_v50, %s5203_s25 }
0x2005   :  { %5143 = shalt.err (!%p5140_p4)
}
0x2006   :  { %s5144_s27 = scalar_lea.hbm %s6389_s11, 640 }
0x2007   :  { %p5145_p5 = scmp.ne.s32.totalorder %s6389_s11, %s5144_s27  ;;  %p5148_p6 = scmp.lt.u32.totalorder %s5144_s27, %s6389_s11 }
0x2009   :  { %p5150_p7 = pnand %p5148_p6, %p5145_p5 }
0x200b   :  { %5153 = shalt.err (!%p5150_p7)
}
0x200c   :  { %4344 = dma.vmem_to_hbm [thread:$0]  %s4339_s19, 640, %s6389_s11, [#allocation17], %s5190_s29, %s5190_s29, %s5191_s30   ;;  %v4265_v10 = vsub.f32 1.0, %v4971_v55  ;;  %v4271_v19 = vmul.f32 %v4971_v55, %v6215_v48 }
0x200d   :  { %s5206_s18 = smov [#allocation15]  }
0x200e   :  { %s4326_s24 = sshll.u32 %s5206_s18, 4  ;;  %s4327_s24 = int_to_ptr.vmem [resolvable:$true] %s4326_s24 }
0x200f   :  { %s5154_s26 = scalar_lea.vmem %s4327_s24, 640  ;;  %p5159_p9 = scmp.lt.s32.totalorder %s4327_s24, %s4327_s24 }
0x2010   :  { %p5155_p8 = scmp.ne.s32.totalorder %s4327_s24, %s5154_s26  ;;  %p5160_p10 = scmp.lt.s32.totalorder %s5154_s26, %s5154_s26 }
0x2012   :  { %p5161_p11 = por %p5160_p10, %p5159_p9 }
0x2014   :  { %p5162_p12 = pnand %p5161_p11, %p5155_p8 }
0x2076   :  { %v4268_v4 = vpop.permute.xlu0 %4267 }
0x2077   :  { %v4270_v60 = vmul.f32 %v4268_v4, %v4265_v10 }
0x2079   :  { %v4272_v47 = vadd.f32 %v4271_v19, %v4270_v60 }
0x207b   :  { %4316 = vrot.lane.b32.xlu0 %v4272_v47, %s5203_s25 }
0x20ed   :  { %v4317_v61 = vpop.permute.xlu0 %4316 }
0x20ee   :  { %4320 = vst.msk [vmem:[#allocation15 + $0x20] sm:$0xff] %vm162_vm1, %v4317_v61 }
0x20ef   :  { %5165 = shalt.err (!%p5162_p12)
}
0x20f0   :  { %s5166_s7 = scalar_lea.hbm %s6388_s10, 640 }
0x20f1   :  { %p5167_p13 = scmp.ne.s32.totalorder %s6388_s10, %s5166_s7  ;;  %p5170_p0 = scmp.lt.u32.totalorder %s5166_s7, %s6388_s10 }
0x20f3   :  { %p5172_p1 = pnand %p5170_p0, %p5167_p13 }
0x20f5   :  { %5175 = shalt.err (!%p5172_p1)
}
0x20f6   :  { %4332 = dma.vmem_to_hbm [thread:$0]  %s4327_s24, 640, %s6388_s10, [#allocation5], %s5190_s29, %s5190_s29, %s5191_s30  }
0x20f7   :  { %5184 = dma.done.wait [#allocation5], 640  }
0x20f8   :  { %5185 = vsyncadd [#allocation5], 4294966656 }
0x20f9   :  { %5186 = dma.done.wait [#allocation17], 640  }
0x20fa   :  { %5187 = vsyncadd [#allocation17], 4294966656 }
0x20fb   :  { %4351 = vsyncpa [#allocation4], 1 }
0x20fc   :  { %4352 = vsyncpa [#allocation7], 1 }
0x20fd   :  { %4353 = vsyncpa [#allocation10], 1 }
0x20fe   :  { %4354 = vsyncpa [#allocation13], 1 }
0x20ff   :  { %4355 = vsyncpa [#allocation5], 1 }
0x2100   :  { %4356 = vsyncpa [#allocation17], 1 }

</bundles_post_ra>
